<compile_context>
chip_gen: v7x
topology: tpu7x:2x2x1
jax: 0.10.0
libtpu: 0.0.40
codegen_flags: <defaults>
</compile_context>

<pallas_src>
import functools

import jax
import jax.numpy as jnp
from jax import lax
from jax.experimental import pallas as pl
from jax.experimental.pallas import tpu as pltpu

LANE = 128


def _round_up(a, b):
    return (a + b - 1) // b * b


def _double_conv_kernel(x_ref, w1_ref, w2_ref, s1_ref, b1_ref, s2_ref, b2_ref,
                        mask_ref, o_ref, mid_ref, *, wf, cin, cmid_p, compute_dtype):
    # x_ref:   (1, 1, lin, Cin)       flattened padded input rows for this (batch, row-tile)
    # w1_ref:  (9*Cin, Cmid_p)        w2_ref: (9*Cmid_p, Cout_p)     (pre-cast, pre-reshaped)
    # s*/b*:   (1, C)                 folded BatchNorm scale / bias (f32)
    # mask_ref:(1, m1, 1)             0/1 mask = conv2's SAME zero padding at the image border
    # o_ref:   (1, 1, m2, Cout_p)     flattened output tile (lane-dense)
    # mid_ref: (m1, Cmid_p)           VMEM scratch for the conv1 activation (compute_dtype)
    m1 = mid_ref.shape[0]            # conv1 positions per tile
    m2 = o_ref.shape[2]              # conv2 positions per tile == tile_h * wf

    # ---- conv1 (3x3, SAME, no bias) + BN1 + ReLU, flattened layout -------------------
    xb = x_ref[0, 0].astype(compute_dtype)                    # (lin, Cin)
    if cin % LANE == 0:
        # lane-aligned taps: one im2col matmul, K = 9*Cin
        p1 = jnp.concatenate(
            [xb[dy * wf + dx: dy * wf + dx + m1, :]
             for dy in range(3) for dx in range(3)], axis=1)
        acc1 = jnp.dot(p1, w1_ref[...], preferred_element_type=jnp.float32)
    else:
        # small / unaligned Cin: 9 accumulated dots (still bf16 operands on the MXU)
        acc1 = jnp.zeros((m1, cmid_p), jnp.float32)
        for t in range(9):
            dy, dx = t // 3, t % 3
            acc1 += jnp.dot(xb[dy * wf + dx: dy * wf + dx + m1, :],
                            w1_ref[t * cin:(t + 1) * cin, :],
                            preferred_element_type=jnp.float32)
    y = jnp.maximum(acc1 * s1_ref[...] + b1_ref[...], 0.0)
    y = y * mask_ref[0]                                        # zero outside-image ring
    mid_ref[...] = y.astype(compute_dtype)

    # ---- conv2 (3x3, SAME, no bias) + BN2 + ReLU -------------------------------------
    # Cmid_p is a multiple of 128 -> lane-aligned im2col concat, single matmul K = 9*Cmid_p.
    p2 = jnp.concatenate(
        [mid_ref[dy * wf + dx: dy * wf + dx + m2, :]
         for dy in range(3) for dx in range(3)], axis=1)
    acc2 = jnp.dot(p2, w2_ref[...], preferred_element_type=jnp.float32)
    z = jnp.maximum(acc2 * s2_ref[...] + b2_ref[...], 0.0)
    o_ref[0, 0] = z.astype(o_ref.dtype)


def _fold_bn(gamma, beta, mean, var, eps, c_pad):
    scale = gamma / jnp.sqrt(var + eps)
    bias = beta - mean * scale
    c = scale.shape[0]
    s = jnp.zeros((1, c_pad), jnp.float32).at[0, :c].set(scale.astype(jnp.float32))
    b = jnp.zeros((1, c_pad), jnp.float32).at[0, :c].set(bias.astype(jnp.float32))
    return s, b


def _pick_tile_h(H, W, cin, cmid_p, cout_p, budget_bytes=6 * 2 ** 20):
    """Largest divisor of H whose per-tile VMEM working set fits the budget."""
    wf = _round_up(W + 4, 8)
    best = None
    for th in range(1, H + 1):
        if H % th:
            continue
        m1 = _round_up((th + 2) * wf + 2, 8)
        m2 = th * wf
        lin = _round_up(m1 + 2 * wf + 2, wf)
        est = (2 * lin * cin * 4 + 2 * m2 * cout_p * 4 + m1 * cmid_p * 2
               + m2 * 9 * cmid_p * 2 + m1 * max(9 * cin, cmid_p) * 4)
        if est <= budget_bytes or best is None:
            best = th
    return best


def double_conv(x_nchw, w1, w2, bn1, bn2, eps=1e-5, tile_h=None, precision="bf16"):
    """x_nchw: (N, Cin, H, W); w1: (3,3,Cin,Cmid) HWIO; w2: (3,3,Cmid,Cout) HWIO;
    bn* = (gamma, beta, running_mean, running_var), each (C,). Eval-mode BatchNorm."""
    N, Cin, H, W = x_nchw.shape
    Cmid = w1.shape[3]
    Cout = w2.shape[3]
    assert w1.shape[:3] == (3, 3, Cin) and w2.shape[:3] == (3, 3, Cmid)

    compute_dtype = jnp.bfloat16 if precision == "bf16" else jnp.float32
    cmid_p = _round_up(Cmid, LANE)
    cout_p = _round_up(Cout, LANE)
    wf = _round_up(W + 4, 8)                       # flattened row stride (>= W+4)

    if tile_h is None:
        tile_h = _pick_tile_h(H, W, Cin, cmid_p, cout_p)
    assert H % tile_h == 0, "tile_h must divide H"
    n_h = H // tile_h

    m1 = _round_up((tile_h + 2) * wf + 2, 8)       # conv1 positions per tile
    m2 = tile_h * wf                               # conv2 positions per tile
    lin = _round_up(m1 + 2 * wf + 2, wf)           # flattened input length per tile
    rin = lin // wf                                # padded-image rows shipped per tile

    # ---- host-side glue: NCHW -> NHWC, zero-pad, row-tile with halo, flatten ----
    x = jnp.transpose(x_nchw, (0, 2, 3, 1))        # (N, H, W, Cin)
    bottom = rin - tile_h - 2
    xpad = jnp.pad(x, ((0, 0), (2, bottom), (2, wf - W - 2), (0, 0)))
    x_tiles = jnp.stack([xpad[:, t * tile_h: t * tile_h + rin] for t in range(n_h)],
                        axis=1)                    # (N, n_h, rin, wf, Cin)
    x_tiles = x_tiles.reshape(N, n_h, lin, Cin)

    # weights: HWIO -> im2col layout, zero-pad channels, pre-cast (done once, host side)
    w1_p = jnp.zeros((3, 3, Cin, cmid_p), compute_dtype).at[..., :Cmid].set(
        w1.astype(compute_dtype))
    w1r = w1_p.reshape(9 * Cin, cmid_p)
    w2_p = jnp.zeros((3, 3, cmid_p, cout_p), compute_dtype).at[:, :, :Cmid, :Cout].set(
        w2.astype(compute_dtype))
    w2r = w2_p.reshape(9 * cmid_p, cout_p)

    s1, b1 = _fold_bn(*bn1, eps, cmid_p)
    s2, b2 = _fold_bn(*bn2, eps, cout_p)

    # 0/1 mask (per row-tile, flattened) = conv2's SAME zero padding at the image border.
    n_rl = -(-m1 // wf)
    rl = jnp.arange(n_rl)
    col = jnp.arange(wf)
    col_ok = (col >= 1) & (col <= W)
    grow = jnp.arange(n_h)[:, None] * tile_h + rl[None, :]
    row_ok = (grow >= 1) & (grow <= H)
    mask = (row_ok[:, :, None] & col_ok[None, None, :]).astype(jnp.float32)
    mask = mask.reshape(n_h, n_rl * wf)[:, :m1].reshape(n_h, m1, 1)

    # explicit scoped-VMEM limit: double-buffered blocks + scratch + im2col temporaries, 2x headroom
    est = (2 * lin * Cin * x.dtype.itemsize + 2 * m2 * cout_p * x.dtype.itemsize
           + 2 * m1 * 4 + w1r.size * 2 + w2r.size * 2
           + m1 * cmid_p * 2 + m2 * 9 * cmid_p * 2 + m1 * max(9 * Cin, cmid_p) * 4)
    vmem_limit = int(min(64 * 2 ** 20, max(16 * 2 ** 20, 2 * est)))

    kernel = functools.partial(_double_conv_kernel, wf=wf, cin=Cin,
                               cmid_p=cmid_p, compute_dtype=compute_dtype)

    out_flat = pl.pallas_call(
        kernel,
        out_shape=jax.ShapeDtypeStruct((N, n_h, m2, cout_p), x.dtype),
        grid_spec=pltpu.PrefetchScalarGridSpec(
            num_scalar_prefetch=0,
            grid=(N, n_h),
            in_specs=[
                pl.BlockSpec((1, 1, lin, Cin), lambda n, t: (n, t, 0, 0)),
                pl.BlockSpec((9 * Cin, cmid_p), lambda n, t: (0, 0)),
                pl.BlockSpec((9 * cmid_p, cout_p), lambda n, t: (0, 0)),
                pl.BlockSpec((1, cmid_p), lambda n, t: (0, 0)),
                pl.BlockSpec((1, cmid_p), lambda n, t: (0, 0)),
                pl.BlockSpec((1, cout_p), lambda n, t: (0, 0)),
                pl.BlockSpec((1, cout_p), lambda n, t: (0, 0)),
                pl.BlockSpec((1, m1, 1), lambda n, t: (t, 0, 0)),
            ],
            out_specs=pl.BlockSpec((1, 1, m2, cout_p), lambda n, t: (n, t, 0, 0)),
            scratch_shapes=[pltpu.VMEM((m1, cmid_p), compute_dtype)],
        ),
        compiler_params=pltpu.CompilerParams(
            dimension_semantics=("parallel", "parallel"),
            vmem_limit_bytes=vmem_limit),
    )(x_tiles, w1r, w2r, s1, b1, s2, b2, mask)

    # un-flatten, crop column/channel padding, back to NCHW
    out = out_flat.reshape(N, n_h, tile_h, wf, cout_p)[:, :, :, :W, :Cout]
    out = out.reshape(N, H, W, Cout)
    return jnp.transpose(out, (0, 3, 1, 2))


def _ref_double_conv(x_nchw, w1, w2, bn1, bn2, eps=1e-5):
    """Pure-JAX reference (same eval-mode BN semantics, f32)."""
    def conv(x, w):  # x NHWC, w HWIO
        return lax.conv_general_dilated(
            x, w, window_strides=(1, 1), padding="SAME",
            dimension_numbers=("NHWC", "HWIO", "NHWC"))

    def bn_relu(y, p):
        gamma, beta, mean, var = p
        return jnp.maximum((y - mean) / jnp.sqrt(var + eps) * gamma + beta, 0.0)

    x = jnp.transpose(x_nchw, (0, 2, 3, 1)).astype(jnp.float32)
    y = bn_relu(conv(x, w1), bn1)
    z = bn_relu(conv(y, w2), bn2)
    return jnp.transpose(z, (0, 3, 1, 2))


if __name__ == "__main__":
    key = jax.random.PRNGKey(0)
    N, Cin, Cout, H, W = 2, 4, 8, 16, 16
    ks = jax.random.split(key, 11)

    x = jax.random.normal(ks[0], (N, Cin, H, W), jnp.float32)
    # Conv weights (HWIO); PyTorch's (Cout, Cin, 3, 3) layout is just a transpose of this.
    w1 = jax.random.normal(ks[1], (3, 3, Cin, Cout), jnp.float32) * 0.1
    w2 = jax.random.normal(ks[2], (3, 3, Cout, Cout), jnp.float32) * 0.1
    # BatchNorm params: (gamma, beta, running_mean, running_var)
    bn1 = (jax.random.uniform(ks[3], (Cout,), minval=0.5, maxval=1.5),
           jax.random.normal(ks[4], (Cout,)) * 0.1,
           jax.random.normal(ks[5], (Cout,)) * 0.1,
           jax.random.uniform(ks[6], (Cout,), minval=0.5, maxval=1.5))
    bn2 = (jax.random.uniform(ks[7], (Cout,), minval=0.5, maxval=1.5),
           jax.random.normal(ks[8], (Cout,)) * 0.1,
           jax.random.normal(ks[9], (Cout,)) * 0.1,
           jax.random.uniform(ks[10], (Cout,), minval=0.5, maxval=1.5))

    # tile_h=8 exercises the multi-row-tile (halo) path on the 16-row test image.
    out = double_conv(x, w1, w2, bn1, bn2, tile_h=8)
    out = jax.block_until_ready(out)

    ref = _ref_double_conv(x, w1, w2, bn1, bn2)
    assert out.shape == (N, Cout, H, W)
    # bf16 MXU operands (f32 accumulation) -> slightly looser tolerance than pure f32.
    assert jnp.allclose(out, ref, atol=5e-2, rtol=5e-2), "mismatch vs JAX reference"
    print("KERNEL_OK")
</pallas_src>

<mosaic_0001>
module attributes {stable_mosaic.version = 11 : i64} {
  func.func @_double_conv_kernel(%arg0: i32, %arg1: i32, %arg2: memref<1x1x312x4xf32, #tpu.memory_space<vmem>>, %arg3: memref<36x128xbf16, #tpu.memory_space<vmem>>, %arg4: memref<1152x128xbf16, #tpu.memory_space<vmem>>, %arg5: memref<1x128xf32, #tpu.memory_space<vmem>>, %arg6: memref<1x128xf32, #tpu.memory_space<vmem>>, %arg7: memref<1x128xf32, #tpu.memory_space<vmem>>, %arg8: memref<1x128xf32, #tpu.memory_space<vmem>>, %arg9: memref<1x248x1xf32, #tpu.memory_space<vmem>>, %arg10: memref<1x1x192x128xf32, #tpu.memory_space<vmem>>, %arg11: memref<248x128xbf16, #tpu.memory_space<vmem>>) attributes {dimension_semantics = [#tpu.dimension_semantics<parallel>, #tpu.dimension_semantics<parallel>], iteration_bounds = array<i64: 2, 2>, scalar_prefetch = 0 : i64, scratch_operands = 1 : i64, tpu.core_type = #tpu.core_type<tc>, window_params = [{transform_indices = @transform_0, window_bounds = array<i64: 1, 1, 312, 4>}, {pipeline_mode = #tpu.pipeline_mode<synchronous>, transform_indices = @transform_1, window_bounds = array<i64: 36, 128>}, {pipeline_mode = #tpu.pipeline_mode<synchronous>, transform_indices = @transform_2, window_bounds = array<i64: 1152, 128>}, {pipeline_mode = #tpu.pipeline_mode<synchronous>, transform_indices = @transform_3, window_bounds = array<i64: 1, 128>}, {pipeline_mode = #tpu.pipeline_mode<synchronous>, transform_indices = @transform_4, window_bounds = array<i64: 1, 128>}, {pipeline_mode = #tpu.pipeline_mode<synchronous>, transform_indices = @transform_5, window_bounds = array<i64: 1, 128>}, {pipeline_mode = #tpu.pipeline_mode<synchronous>, transform_indices = @transform_6, window_bounds = array<i64: 1, 128>}, {transform_indices = @transform_7, window_bounds = array<i64: 1, 248, 1>}, {transform_indices = @transform_8, window_bounds = array<i64: 1, 1, 192, 128>}]} {
    %c0 = arith.constant 0 : index
    %c0_0 = arith.constant 0 : index
    %c0_1 = arith.constant 0 : index
    %c0_2 = arith.constant 0 : index
    %0 = vector.load %arg2[%c0, %c0_0, %c0_1, %c0_2] : memref<1x1x312x4xf32, #tpu.memory_space<vmem>>, vector<1x1x312x4xf32>
    %1 = vector.shape_cast %0 : vector<1x1x312x4xf32> to vector<312x4xf32>
    %2 = arith.truncf %1 : vector<312x4xf32> to vector<312x4xbf16>
    %cst = arith.constant 0.000000e+00 : f32
    %3 = vector.broadcast %cst : f32 to vector<248x128xf32>
    %4 = vector.extract_strided_slice %2 {offsets = [0, 0], sizes = [248, 4], strides = [1, 1]} : vector<312x4xbf16> to vector<248x4xbf16>
    %c0_3 = arith.constant 0 : index
    %c0_4 = arith.constant 0 : index
    %5 = vector.load %arg3[%c0_3, %c0_4] : memref<36x128xbf16, #tpu.memory_space<vmem>>, vector<4x128xbf16>
    %cst_5 = arith.constant dense<0.000000e+00> : vector<248x128xf32>
    %6 = tpu.matmul %4, %5, %cst_5 {dimension_numbers = #tpu.dot_dimension_numbers<[1], [0], [0], [1], [0, 0, 1, 1], [], []>} : vector<248x4xbf16>, vector<4x128xbf16>, vector<248x128xf32> -> vector<248x128xf32>
    %7 = arith.addf %3, %6 : vector<248x128xf32>
    %8 = vector.extract_strided_slice %2 {offsets = [1, 0], sizes = [248, 4], strides = [1, 1]} : vector<312x4xbf16> to vector<248x4xbf16>
    %c4 = arith.constant 4 : index
    %c0_6 = arith.constant 0 : index
    %9 = vector.load %arg3[%c4, %c0_6] : memref<36x128xbf16, #tpu.memory_space<vmem>>, vector<4x128xbf16>
    %cst_7 = arith.constant dense<0.000000e+00> : vector<248x128xf32>
    %10 = tpu.matmul %8, %9, %cst_7 {dimension_numbers = #tpu.dot_dimension_numbers<[1], [0], [0], [1], [0, 0, 1, 1], [], []>} : vector<248x4xbf16>, vector<4x128xbf16>, vector<248x128xf32> -> vector<248x128xf32>
    %11 = arith.addf %7, %10 : vector<248x128xf32>
    %12 = vector.extract_strided_slice %2 {offsets = [2, 0], sizes = [248, 4], strides = [1, 1]} : vector<312x4xbf16> to vector<248x4xbf16>
    %c8 = arith.constant 8 : index
    %c0_8 = arith.constant 0 : index
    %13 = vector.load %arg3[%c8, %c0_8] : memref<36x128xbf16, #tpu.memory_space<vmem>>, vector<4x128xbf16>
    %cst_9 = arith.constant dense<0.000000e+00> : vector<248x128xf32>
    %14 = tpu.matmul %12, %13, %cst_9 {dimension_numbers = #tpu.dot_dimension_numbers<[1], [0], [0], [1], [0, 0, 1, 1], [], []>} : vector<248x4xbf16>, vector<4x128xbf16>, vector<248x128xf32> -> vector<248x128xf32>
    %15 = arith.addf %11, %14 : vector<248x128xf32>
    %16 = vector.extract_strided_slice %2 {offsets = [24, 0], sizes = [248, 4], strides = [1, 1]} : vector<312x4xbf16> to vector<248x4xbf16>
    %c12 = arith.constant 12 : index
    %c0_10 = arith.constant 0 : index
    %17 = vector.load %arg3[%c12, %c0_10] : memref<36x128xbf16, #tpu.memory_space<vmem>>, vector<4x128xbf16>
    %cst_11 = arith.constant dense<0.000000e+00> : vector<248x128xf32>
    %18 = tpu.matmul %16, %17, %cst_11 {dimension_numbers = #tpu.dot_dimension_numbers<[1], [0], [0], [1], [0, 0, 1, 1], [], []>} : vector<248x4xbf16>, vector<4x128xbf16>, vector<248x128xf32> -> vector<248x128xf32>
    %19 = arith.addf %15, %18 : vector<248x128xf32>
    %20 = vector.extract_strided_slice %2 {offsets = [25, 0], sizes = [248, 4], strides = [1, 1]} : vector<312x4xbf16> to vector<248x4xbf16>
    %c16 = arith.constant 16 : index
    %c0_12 = arith.constant 0 : index
    %21 = vector.load %arg3[%c16, %c0_12] : memref<36x128xbf16, #tpu.memory_space<vmem>>, vector<4x128xbf16>
    %cst_13 = arith.constant dense<0.000000e+00> : vector<248x128xf32>
    %22 = tpu.matmul %20, %21, %cst_13 {dimension_numbers = #tpu.dot_dimension_numbers<[1], [0], [0], [1], [0, 0, 1, 1], [], []>} : vector<248x4xbf16>, vector<4x128xbf16>, vector<248x128xf32> -> vector<248x128xf32>
    %23 = arith.addf %19, %22 : vector<248x128xf32>
    %24 = vector.extract_strided_slice %2 {offsets = [26, 0], sizes = [248, 4], strides = [1, 1]} : vector<312x4xbf16> to vector<248x4xbf16>
    %c20 = arith.constant 20 : index
    %c0_14 = arith.constant 0 : index
    %25 = vector.load %arg3[%c20, %c0_14] : memref<36x128xbf16, #tpu.memory_space<vmem>>, vector<4x128xbf16>
    %cst_15 = arith.constant dense<0.000000e+00> : vector<248x128xf32>
    %26 = tpu.matmul %24, %25, %cst_15 {dimension_numbers = #tpu.dot_dimension_numbers<[1], [0], [0], [1], [0, 0, 1, 1], [], []>} : vector<248x4xbf16>, vector<4x128xbf16>, vector<248x128xf32> -> vector<248x128xf32>
    %27 = arith.addf %23, %26 : vector<248x128xf32>
    %28 = vector.extract_strided_slice %2 {offsets = [48, 0], sizes = [248, 4], strides = [1, 1]} : vector<312x4xbf16> to vector<248x4xbf16>
    %c24 = arith.constant 24 : index
    %c0_16 = arith.constant 0 : index
    %29 = vector.load %arg3[%c24, %c0_16] : memref<36x128xbf16, #tpu.memory_space<vmem>>, vector<4x128xbf16>
    %cst_17 = arith.constant dense<0.000000e+00> : vector<248x128xf32>
    %30 = tpu.matmul %28, %29, %cst_17 {dimension_numbers = #tpu.dot_dimension_numbers<[1], [0], [0], [1], [0, 0, 1, 1], [], []>} : vector<248x4xbf16>, vector<4x128xbf16>, vector<248x128xf32> -> vector<248x128xf32>
    %31 = arith.addf %27, %30 : vector<248x128xf32>
    %32 = vector.extract_strided_slice %2 {offsets = [49, 0], sizes = [248, 4], strides = [1, 1]} : vector<312x4xbf16> to vector<248x4xbf16>
    %c28 = arith.constant 28 : index
    %c0_18 = arith.constant 0 : index
    %33 = vector.load %arg3[%c28, %c0_18] : memref<36x128xbf16, #tpu.memory_space<vmem>>, vector<4x128xbf16>
    %cst_19 = arith.constant dense<0.000000e+00> : vector<248x128xf32>
    %34 = tpu.matmul %32, %33, %cst_19 {dimension_numbers = #tpu.dot_dimension_numbers<[1], [0], [0], [1], [0, 0, 1, 1], [], []>} : vector<248x4xbf16>, vector<4x128xbf16>, vector<248x128xf32> -> vector<248x128xf32>
    %35 = arith.addf %31, %34 : vector<248x128xf32>
    %36 = vector.extract_strided_slice %2 {offsets = [50, 0], sizes = [248, 4], strides = [1, 1]} : vector<312x4xbf16> to vector<248x4xbf16>
    %c32 = arith.constant 32 : index
    %c0_20 = arith.constant 0 : index
    %37 = vector.load %arg3[%c32, %c0_20] : memref<36x128xbf16, #tpu.memory_space<vmem>>, vector<4x128xbf16>
    %cst_21 = arith.constant dense<0.000000e+00> : vector<248x128xf32>
    %38 = tpu.matmul %36, %37, %cst_21 {dimension_numbers = #tpu.dot_dimension_numbers<[1], [0], [0], [1], [0, 0, 1, 1], [], []>} : vector<248x4xbf16>, vector<4x128xbf16>, vector<248x128xf32> -> vector<248x128xf32>
    %39 = arith.addf %35, %38 : vector<248x128xf32>
    %c0_22 = arith.constant 0 : index
    %c0_23 = arith.constant 0 : index
    %40 = vector.load %arg5[%c0_22, %c0_23] : memref<1x128xf32, #tpu.memory_space<vmem>>, vector<1x128xf32>
    %41 = vector.broadcast %40 : vector<1x128xf32> to vector<248x128xf32>
    %42 = arith.mulf %39, %41 : vector<248x128xf32>
    %c0_24 = arith.constant 0 : index
    %c0_25 = arith.constant 0 : index
    %43 = vector.load %arg6[%c0_24, %c0_25] : memref<1x128xf32, #tpu.memory_space<vmem>>, vector<1x128xf32>
    %44 = vector.broadcast %43 : vector<1x128xf32> to vector<248x128xf32>
    %45 = arith.addf %42, %44 : vector<248x128xf32>
    %cst_26 = arith.constant 0.000000e+00 : f32
    %46 = vector.broadcast %cst_26 : f32 to vector<248x128xf32>
    %47 = arith.maximumf %45, %46 : vector<248x128xf32>
    %c0_27 = arith.constant 0 : index
    %c0_28 = arith.constant 0 : index
    %c0_29 = arith.constant 0 : index
    %48 = vector.load %arg9[%c0_27, %c0_28, %c0_29] : memref<1x248x1xf32, #tpu.memory_space<vmem>>, vector<1x248x1xf32>
    %49 = vector.shape_cast %48 : vector<1x248x1xf32> to vector<248x1xf32>
    %50 = vector.broadcast %49 : vector<248x1xf32> to vector<248x128xf32>
    %51 = arith.mulf %47, %50 : vector<248x128xf32>
    %52 = arith.truncf %51 : vector<248x128xf32> to vector<248x128xbf16>
    %c0_30 = arith.constant 0 : index
    %c0_31 = arith.constant 0 : index
    %53 = vector.load %arg11[%c0_30, %c0_31] : memref<248x128xbf16, #tpu.memory_space<vmem>>, vector<248x128xbf16>
    tpu.vector_store %arg11[%c0_30, %c0_31], %52 {strides = array<i32>} : memref<248x128xbf16, #tpu.memory_space<vmem>>, vector<248x128xbf16>,
    %c0_32 = arith.constant 0 : index
    %c0_33 = arith.constant 0 : index
    %54 = vector.load %arg11[%c0_32, %c0_33] : memref<248x128xbf16, #tpu.memory_space<vmem>>, vector<192x128xbf16>
    %c1 = arith.constant 1 : index
    %c0_34 = arith.constant 0 : index
    %55 = vector.load %arg11[%c1, %c0_34] : memref<248x128xbf16, #tpu.memory_space<vmem>>, vector<192x128xbf16>
    %c2 = arith.constant 2 : index
    %c0_35 = arith.constant 0 : index
    %56 = vector.load %arg11[%c2, %c0_35] : memref<248x128xbf16, #tpu.memory_space<vmem>>, vector<192x128xbf16>
    %c24_36 = arith.constant 24 : index
    %c0_37 = arith.constant 0 : index
    %57 = vector.load %arg11[%c24_36, %c0_37] : memref<248x128xbf16, #tpu.memory_space<vmem>>, vector<192x128xbf16>
    %c25 = arith.constant 25 : index
    %c0_38 = arith.constant 0 : index
    %58 = vector.load %arg11[%c25, %c0_38] : memref<248x128xbf16, #tpu.memory_space<vmem>>, vector<192x128xbf16>
    %c26 = arith.constant 26 : index
    %c0_39 = arith.constant 0 : index
    %59 = vector.load %arg11[%c26, %c0_39] : memref<248x128xbf16, #tpu.memory_space<vmem>>, vector<192x128xbf16>
    %c48 = arith.constant 48 : index
    %c0_40 = arith.constant 0 : index
    %60 = vector.load %arg11[%c48, %c0_40] : memref<248x128xbf16, #tpu.memory_space<vmem>>, vector<192x128xbf16>
    %c49 = arith.constant 49 : index
    %c0_41 = arith.constant 0 : index
    %61 = vector.load %arg11[%c49, %c0_41] : memref<248x128xbf16, #tpu.memory_space<vmem>>, vector<192x128xbf16>
    %c50 = arith.constant 50 : index
    %c0_42 = arith.constant 0 : index
    %62 = vector.load %arg11[%c50, %c0_42] : memref<248x128xbf16, #tpu.memory_space<vmem>>, vector<192x128xbf16>
    %63 = tpu.concatenate %54, %55, %56, %57, %58, %59, %60, %61, %62 in 1 : vector<192x128xbf16>, vector<192x128xbf16>, vector<192x128xbf16>, vector<192x128xbf16>, vector<192x128xbf16>, vector<192x128xbf16>, vector<192x128xbf16>, vector<192x128xbf16>, vector<192x128xbf16> -> vector<192x1152xbf16>
    %c0_43 = arith.constant 0 : index
    %c0_44 = arith.constant 0 : index
    %64 = vector.load %arg4[%c0_43, %c0_44] : memref<1152x128xbf16, #tpu.memory_space<vmem>>, vector<1152x128xbf16>
    %cst_45 = arith.constant dense<0.000000e+00> : vector<192x128xf32>
    %65 = tpu.matmul %63, %64, %cst_45 {dimension_numbers = #tpu.dot_dimension_numbers<[1], [0], [0], [1], [0, 0, 1, 1], [], []>} : vector<192x1152xbf16>, vector<1152x128xbf16>, vector<192x128xf32> -> vector<192x128xf32>
    %c0_46 = arith.constant 0 : index
    %c0_47 = arith.constant 0 : index
    %66 = vector.load %arg7[%c0_46, %c0_47] : memref<1x128xf32, #tpu.memory_space<vmem>>, vector<1x128xf32>
    %67 = vector.broadcast %66 : vector<1x128xf32> to vector<192x128xf32>
    %68 = arith.mulf %65, %67 : vector<192x128xf32>
    %c0_48 = arith.constant 0 : index
    %c0_49 = arith.constant 0 : index
    %69 = vector.load %arg8[%c0_48, %c0_49] : memref<1x128xf32, #tpu.memory_space<vmem>>, vector<1x128xf32>
    %70 = vector.broadcast %69 : vector<1x128xf32> to vector<192x128xf32>
    %71 = arith.addf %68, %70 : vector<192x128xf32>
    %cst_50 = arith.constant 0.000000e+00 : f32
    %72 = vector.broadcast %cst_50 : f32 to vector<192x128xf32>
    %73 = arith.maximumf %71, %72 : vector<192x128xf32>
    %c0_51 = arith.constant 0 : index
    %c0_52 = arith.constant 0 : index
    %c0_53 = arith.constant 0 : index
    %c0_54 = arith.constant 0 : index
    %74 = vector.load %arg10[%c0_51, %c0_52, %c0_53, %c0_54] : memref<1x1x192x128xf32, #tpu.memory_space<vmem>>, vector<1x1x192x128xf32>
    %75 = vector.shape_cast %74 : vector<1x1x192x128xf32> to vector<192x128xf32>
    %76 = vector.shape_cast %73 : vector<192x128xf32> to vector<1x1x192x128xf32>
    tpu.vector_store %arg10[%c0_51, %c0_52, %c0_53, %c0_54], %76 {strides = array<i32>} : memref<1x1x192x128xf32, #tpu.memory_space<vmem>>, vector<1x1x192x128xf32>,
    return
  }
  func.func @transform_0(%arg0: i32, %arg1: i32) -> (i32, i32, i32, i32) {
    %c0_i32 = arith.constant 0 : i32
    %c0_i32_0 = arith.constant 0 : i32
    %c0_i32_1 = arith.constant 0 : i32
    return %arg0, %arg1, %c0_i32, %c0_i32_0 : i32, i32, i32, i32
  }
  func.func @transform_1(%arg0: i32, %arg1: i32) -> (i32, i32) {
    %c0_i32 = arith.constant 0 : i32
    %c0_i32_0 = arith.constant 0 : i32
    %c0_i32_1 = arith.constant 0 : i32
    return %c0_i32, %c0_i32_0 : i32, i32
  }
  func.func @transform_2(%arg0: i32, %arg1: i32) -> (i32, i32) {
    %c0_i32 = arith.constant 0 : i32
    %c0_i32_0 = arith.constant 0 : i32
    %c0_i32_1 = arith.constant 0 : i32
    return %c0_i32, %c0_i32_0 : i32, i32
  }
  func.func @transform_3(%arg0: i32, %arg1: i32) -> (i32, i32) {
    %c0_i32 = arith.constant 0 : i32
    %c0_i32_0 = arith.constant 0 : i32
    %c0_i32_1 = arith.constant 0 : i32
    return %c0_i32, %c0_i32_0 : i32, i32
  }
  func.func @transform_4(%arg0: i32, %arg1: i32) -> (i32, i32) {
    %c0_i32 = arith.constant 0 : i32
    %c0_i32_0 = arith.constant 0 : i32
    %c0_i32_1 = arith.constant 0 : i32
    return %c0_i32, %c0_i32_0 : i32, i32
  }
  func.func @transform_5(%arg0: i32, %arg1: i32) -> (i32, i32) {
    %c0_i32 = arith.constant 0 : i32
    %c0_i32_0 = arith.constant 0 : i32
    %c0_i32_1 = arith.constant 0 : i32
    return %c0_i32, %c0_i32_0 : i32, i32
  }
  func.func @transform_6(%arg0: i32, %arg1: i32) -> (i32, i32) {
    %c0_i32 = arith.constant 0 : i32
    %c0_i32_0 = arith.constant 0 : i32
    %c0_i32_1 = arith.constant 0 : i32
    return %c0_i32, %c0_i32_0 : i32, i32
  }
  func.func @transform_7(%arg0: i32, %arg1: i32) -> (i32, i32, i32) {
    %c0_i32 = arith.constant 0 : i32
    %c0_i32_0 = arith.constant 0 : i32
    %c0_i32_1 = arith.constant 0 : i32
    return %arg1, %c0_i32, %c0_i32_0 : i32, i32, i32
  }
  func.func @transform_8(%arg0: i32, %arg1: i32) -> (i32, i32, i32, i32) {
    %c0_i32 = arith.constant 0 : i32
    %c0_i32_0 = arith.constant 0 : i32
    %c0_i32_1 = arith.constant 0 : i32
    return %arg0, %arg1, %c0_i32, %c0_i32_0 : i32, i32, i32, i32
  }
}

</mosaic_0001>

<bundles_post_ra>
// kernel: tpu_custom_call.1
= control target key start
LH: loop header
LB: loop body
LE: loop exit
PB: predicated region body
PF: predicated region fallthrough
CT: control target
= control target key end

     0   :  { %13 = vsyncpa [#allocation4], 0  ;;  %s9456_s0 = inlined_call_operand.vmem [shape: f32[2,2,312,4], index: 0, kind: input, shape index: {}]   ;;  %s9457_s1 = inlined_call_operand.vmem [shape: bf16[36,128], index: 1, kind: input, shape index: {}]   ;;  %s9458_s2 = inlined_call_operand.vmem [shape: bf16[1152,128], index: 2, kind: input, shape index: {}]   ;;  %s9459_s3 = inlined_call_operand.vmem [shape: f32[1,128], index: 3, kind: input, shape index: {}]   ;;  %s9460_s4 = inlined_call_operand.vmem [shape: f32[1,128], index: 4, kind: input, shape index: {}]   ;;  %s9461_s5 = inlined_call_operand.vmem [shape: f32[1,128], index: 5, kind: input, shape index: {}]   ;;  %s9462_s6 = inlined_call_operand.vmem [shape: f32[1,128], index: 6, kind: input, shape index: {}]   ;;  %s9463_s7 = inlined_call_operand.vmem [shape: f32[2,248,1], index: 7, kind: input, shape index: {}]   ;;  %s9464_s8 = inlined_call_operand.hbm [shape: f32[2,2,192,128], index: 8, kind: output, shape index: {}]  }
   0x1   :  { %15 = vsyncpa [#allocation4 + $0x1], 0  ;;  %s7300_s27 = smov 0   ;;  %s7302_s28 = smov 0  }
   0x2   :  { %s7304_s29 = smov 0   ;;  %s7306_s30 = smov 0  }
   0x3   :  { %s7308_s9 = smov 0   ;;  %s7310_s10 = smov 0  }
   0x4   :  { %s7312_s11 = smov 0   ;;  %s7314_s12 = smov 0  }
   0x5 LB: > { %9484 = sst [smem:[#allocation6_spill]] %s7245_s11  ;;  %s5387_s13 = sadd.s32 4294967295, %s7249_s12   ;;  %s7249_s12 = sphi %s7314_s12, %s21_s12   ;;  %s7245_s11 = sphi %s7312_s11, %s9524_s11   ;;  %s7241_s10 = sphi %s7310_s10, %s9529_s10   ;;  %s7237_s9 = sphi %s7308_s9, %s9522_s9   ;;  %s7233_s30 = sphi %s7306_s30, %s9528_s30   ;;  %s7229_s29 = sphi %s7304_s29, %s9527_s29   ;;  %s7225_s28 = sphi %s7302_s28, %s9526_s28   ;;  %s7221_s27 = sphi %s7300_s27, %s9525_s27  }
   0x6   : > { %s5388_s14 = sadd.s32 4294967294, %s7249_s12   ;;  %s30_s15 = sadd.s32 1, %s7241_s10 }
   0x7   : > { %p31_p0 = scmp.ge.s32.totalorder %s30_s15, 2  ;;  %s33_s16 = sadd.s32 1, %s7245_s11 }
   0x8   : > { %p232_p1 = scmp.ne.s32.totalorder %s7229_s29, %s7225_s28  ;;  %p233_p2 = scmp.eq.s32.totalorder %s5387_s13, 3 }
   0x9   : > { %s9531_s15 = smov (%p31_p0, %s30_s15), 0  ;;  %s9533_s16 = smov (!%p31_p0, %s33_s16), %s7245_s11 }
   0xa   : > { %9485 = sst [smem:[#allocation7_spill]] %s9531_s15  ;;  %s218_s17 = ssub.s32 %s7241_s10, %s9531_s15 }
   0xb   : > { %p7351_p3 = por %p233_p2, %p232_p1  ;;  %p35_p4 = scmp.ge.s32.totalorder %s9533_s16, 2 }
   0xc   : > { %p238_p5 = scmp.ne.s32.totalorder %s7225_s28, %s7221_s27  ;;  %p239_p6 = scmp.eq.s32.totalorder %s5388_s14, 3 }
   0xd   : > { %p5391_p7 = scmp.ge.s32.totalorder %s7249_s12, 1  ;;  %s9535_s16 = smov (%p35_p4, %s9533_s16), 0 }
   0xe   : > { %9487 = sst [smem:[#allocation8_spill]] %s9535_s16  ;;  %p7360_p8 = por %p239_p6, %p238_p5 }
   0xf   : > { %p295_p9 = scmp.lt.s32.totalorder %s7249_s12, 5  ;;  %s217_s20 = ssub.s32 %s7245_s11, %s9535_s16 }
  0x10   : > { %s222_s21 = sadd.s32 1, %s7229_s29  ;;  %s219_s22 = sor.u32 %s218_s17, %s217_s20 }
  0x11   : > { %p296_p10 = pnand %p5391_p7, %p295_p9  ;;  %p220_p11 = scmp.eq.s32.totalorder %s219_s22, 0 }
  0x13   : > { %s7369_s23 = scalar_select %p220_p11, %s7229_s29, %s222_s21  }
  0x14   : > { %299 = sbr.rel (%p296_p10) target bundleno = 1397 (0x575), region = 52 }
  0x1b   : > { %v410_v0 = vld [vmem:[%s9457_s1] sm:$0x3]  ;;  %vm593_vm0 = vcmask 1041408   ;;  %p338_p12 = scmp.lt.s32.totalorder %s7237_s9, 1  ;;  %p340_p13 = scmp.lt.s32.totalorder %s7233_s30, 1  ;;  %vm544_vm1 = vcmask 31744  }
  0x1c   : > { %6944 = vmatprep.subr.msk.bf16.mxu0 %vm593_vm0, %v410_v0  ;;  %v790_v1 = vsel %vm593_vm0, %v410_v0, 0  ;;  %v952_v2 = vld [vmem:[%s9457_s1 + $0x4] sm:$0x3]  ;;  %vm969_vm2 = vcmask 1046528   ;;  %v1523_v62 = vld [vmem:[%s9457_s1 + $0x8] sm:$0x3] }
  0x1d   : > { %6377 = vmatpush3.bf16.msra.mxu0 %v790_v1  ;;  %s339_s14 = scalar_select %p338_p12, %s7237_s9, 1  ;;  %v7390_v3 = vld [vmem:[%s9457_s1 + $0x4] ss:$0 sps:$4 sm:$0xcc]   ;;  %v1050_v12 = vsel %vm593_vm0, %v952_v2, 0  ;;  %vm1245_vm3 = vcmask 1043456  }
  0x1e   : > { %s7383_s17 = scalar_select %p340_p13, %s7233_s30, 1  ;;  %6945 = vmatprep.subr.msk.bf16.mxu0 %vm593_vm0, %v952_v2  ;;  %v1280_v14 = vrot.slane %v7390_v3, 2  ;;  %vm1524_vm4 = vsmask.f32 3328  ;;  %vm1842_vm5 = vcmask 1042432  }
  0x1f   : > { %s6954_s20 = smul.u32 78, %s339_s14  ;;  %vm412_vm6 = vsmask.f32 7424 }
  0x20   : > { %s6953_s21 = smul.u32 39, %s7383_s17  ;;  %v1330_v60 = vsel %vm593_vm0, %v1280_v14, 0 }
  0x22   : > { %s344_s25 = sadd.s32 %s6954_s20, %s6953_s21 }
  0x23   : > { %s5392_s16 = sshll.u32 %s344_s25, 3 }
  0x24   : > { %s7395_s26 = scalar_lea.vmem %s9456_s0, %s5392_s16  ;;  %s6955_s16 = smul.u32 248, %s7383_s17 }
  0x25   : > { %v353_v4 = vld [vmem:[%s7395_s26] sm:$0xff]  ;;  %v354_v5 = vld [vmem:[%s7395_s26 + $0x8] sm:$0xff]  ;;  %v355_v6 = vld [vmem:[%s7395_s26 + $0x10] sm:$0xff]  ;;  %s6956_s17 = smul.u32 24, %s7233_s30 }
  0x26   : > { %v7400_v7 = vpack.c.bf16 %v354_v5, %v353_v4  ;;  %v356_v8 = vld [vmem:[%s7395_s26 + $0x18] sm:$0xff]  ;;  %v357_v9 = vld [vmem:[%s7395_s26 + $0x20] sm:$0xff]  ;;  %v358_v10 = vld [vmem:[%s7395_s26 + $0x28] sm:$0xff]  ;;  %s7975_s20 = scalar_lea.vmem %s9463_s7, %s6955_s16  ;;  %s7252_s16 = smov [#allocation3]  }
  0x27   : > { %v7405_v11 = vpack.c.bf16 %v356_v8, %v355_v6  ;;  %v7408_v13 = vpack.c.bf16 %v358_v10, %v357_v9  ;;  %v359_v15 = vld [vmem:[%s7395_s26 + $0x30] sm:$0xff]  ;;  %v360_v16 = vld [vmem:[%s7395_s26 + $0x38] sm:$0xff]  ;;  %v361_v17 = vld [vmem:[%s7395_s26 + $0x40] sm:$0xff]  ;;  %s7159_s13 = sshll.u32 %s7252_s16, 4  ;;  %s7160_s13 = int_to_ptr.vmem [resolvable:$false] %s7159_s13 }
  0x28   : > { %6378 = vmatprep.mubr.msk.bf16.mxu0 %vm544_vm1, %v7400_v7  ;;  %v362_v18 = vld [vmem:[%s7395_s26 + $0x48] sm:$0xff]  ;;  %v7424_v19 = vpack.c.bf16 %v360_v16, %v359_v15  ;;  %v363_v21 = vld [vmem:[%s7395_s26 + $0x50] sm:$0xff]  ;;  %v364_v22 = vld [vmem:[%s7395_s26 + $0x58] sm:$0xff]  ;;  %v970_v53 = vrot.slane %v7400_v7, 1 }
  0x29   : > { %6379 = vmatmul.mubr.msk.bf16.vlgmr.msra.gmra.mrb[0].mxu0 %vm544_vm1, %v7405_v11  ;;  %v7426_v20 = vpack.c.bf16 %v362_v18, %v361_v17  ;;  %v365_v23 = vld [vmem:[%s7395_s26 + $0x60] sm:$0xff]  ;;  %v366_v24 = vld [vmem:[%s7395_s26 + $0x68] sm:$0xff]  ;;  %v7436_v25 = vpack.c.bf16 %v364_v22, %v363_v21  ;;  %v367_v27 = vld [vmem:[%s7395_s26 + $0x70] sm:$0xff]  ;;  %v971_v54 = vrot.slane %v7405_v11, 1  ;;  %v973_v57 = vrot.slane %v7408_v13, 1 }
  0x2a   : > { %6411 = vmatpush3.bf16.msra.mxu0 %v1050_v12  ;;  %6382 = vmatprep.mubr.msk.bf16.mxu0 %vm544_vm1, %v7408_v13  ;;  %v7438_v26 = vpack.c.bf16 %v366_v24, %v365_v23  ;;  %v368_v28 = vld [vmem:[%s7395_s26 + $0x78] sm:$0xff]  ;;  %v369_v29 = vld [vmem:[%s7395_s26 + $0x80] sm:$0xff]  ;;  %v370_v30 = vld [vmem:[%s7395_s26 + $0x88] sm:$0xff]  ;;  %v975_v58 = vrot.slane %v7424_v19, 1 }
  0x2b   : > { %6946 = vmatprep.subr.msk.bf16.mxu0 %vm593_vm0, %v1280_v14  ;;  %v7448_v31 = vpack.c.bf16 %v368_v28, %v367_v27  ;;  %v7450_v32 = vpack.c.bf16 %v370_v30, %v369_v29  ;;  %v371_v33 = vld [vmem:[%s7395_s26 + $0x90] sm:$0xff]  ;;  %v372_v34 = vld [vmem:[%s7395_s26 + $0x98] sm:$0xff]  ;;  %v373_v35 = vld [vmem:[%s7395_s26 + $0xa0] sm:$0xff]  ;;  %v972_v56 = vsel %vm969_vm2, %v970_v53, %v971_v54  ;;  %v974_v59 = vsel %vm969_vm2, %v971_v54, %v973_v57 }
  0x2c   : > { %v374_v36 = vld [vmem:[%s7395_s26 + $0xa8] sm:$0xff]  ;;  %v7460_v37 = vpack.c.bf16 %v372_v34, %v371_v33  ;;  %v375_v39 = vld [vmem:[%s7395_s26 + $0xb0] sm:$0xff]  ;;  %v376_v40 = vld [vmem:[%s7395_s26 + $0xb8] sm:$0xff]  ;;  %v976_v61 = vsel %vm969_vm2, %v973_v57, %v975_v58  ;;  %v977_v63 = vrot.slane %v7426_v20, 1  ;;  %v979_v0 = vrot.slane %v7436_v25, 1 }
  0x2d   : > { %v7462_v38 = vpack.c.bf16 %v374_v36, %v373_v35  ;;  %v377_v41 = vld [vmem:[%s7395_s26 + $0xc0] sm:$0xff]  ;;  %v378_v42 = vld [vmem:[%s7395_s26 + $0xc8] sm:$0xff]  ;;  %v7472_v43 = vpack.c.bf16 %v376_v40, %v375_v39  ;;  %v379_v45 = vld [vmem:[%s7395_s26 + $0xd0] sm:$0xff]  ;;  %v981_v3 = vrot.slane %v7438_v26, 1  ;;  %v983_v4 = vrot.slane %v7448_v31, 1 }
  0x2e   : > { %v7474_v44 = vpack.c.bf16 %v378_v42, %v377_v41  ;;  %v380_v46 = vld [vmem:[%s7395_s26 + $0xd8] sm:$0xff]  ;;  %v381_v47 = vld [vmem:[%s7395_s26 + $0xe0] sm:$0xff]  ;;  %v382_v48 = vld [vmem:[%s7395_s26 + $0xe8] sm:$0xff]  ;;  %v7518_v1 = vsel %vm969_vm2, %v975_v58, %v977_v63  ;;  %v7521_v2 = vsel %vm969_vm2, %v977_v63, %v979_v0  ;;  %v985_v8 = vrot.slane %v7450_v32, 1 }
  0x2f   : > { %v7484_v49 = vpack.c.bf16 %v380_v46, %v379_v45  ;;  %v7486_v50 = vpack.c.bf16 %v382_v48, %v381_v47  ;;  %v383_v51 = vld [vmem:[%s7395_s26 + $0xf0] sm:$0xff]  ;;  %v384_v52 = vld [vmem:[%s7395_s26 + $0xf8] sm:$0xff]  ;;  %v7530_v5 = vsel %vm969_vm2, %v979_v0, %v981_v3  ;;  %v7533_v6 = vsel %vm969_vm2, %v981_v3, %v983_v4  ;;  %v7601_v39 = vld [vmem:[%s9457_s1 + $0x8] ss:$0 sps:$4 sm:$0xcc]  }
  0x30   : > { %v7496_v55 = vpack.c.bf16 %v384_v52, %v383_v51  ;;  %v987_v9 = vrot.slane %v7460_v37, 1  ;;  %v7542_v10 = vsel %vm969_vm2, %v983_v4, %v985_v8  ;;  %v989_v14 = vrot.slane %v7462_v38, 1 }
  0x31   : > { %6383 = vmatmul.mubr.msk.bf16.gmra.mrb[4].mxu0 %vm544_vm1, %v7424_v19  ;;  %v991_v15 = vrot.slane %v7472_v43, 1  ;;  %v993_v18 = vrot.slane %v7474_v44, 1  ;;  %v995_v21 = vrot.slane %v7484_v49, 1  ;;  %v997_v24 = vrot.slane %v7486_v50, 1 }
  0x32   : > { %6386 = vmatprep.mubr.msk.bf16.mxu0 %vm544_vm1, %v7426_v20  ;;  %v7545_v12 = vsel %vm969_vm2, %v985_v8, %v987_v9  ;;  %v7554_v16 = vsel %vm969_vm2, %v987_v9, %v989_v14  ;;  %v7577_v27 = vrot.slane %v7496_v55, 1  ;;  %v1246_v30 = vrot.slane %v7405_v11, 4  ;;  %v385_v8 = vld [vmem:[%s7395_s26 + $0x100] sm:$0xff]  ;;  %v386_v9 = vld [vmem:[%s7395_s26 + $0x108] sm:$0xff] }
  0x33   : > { %v7557_v17 = vsel %vm969_vm2, %v989_v14, %v991_v15  ;;  %v7566_v22 = vsel %vm969_vm2, %v991_v15, %v993_v18  ;;  %v7569_v23 = vsel %vm969_vm2, %v993_v18, %v995_v21  ;;  %v7580_v28 = vsel %vm969_vm2, %v995_v21, %v997_v24 }
  0x34   : > { %v7584_v29 = vsel %vm969_vm2, %v997_v24, %v7577_v27  ;;  %v1247_v33 = vrot.slane %v7408_v13, 4  ;;  %v1249_v35 = vrot.slane %v7424_v19, 4  ;;  %v1251_v36 = vrot.slane %v7426_v20, 4 }
  0x35   : > { %v1647_v41 = vsel %vm593_vm0, %v1523_v62, 0  ;;  %v1879_v45 = vrot.slane %v7601_v39, 2  ;;  %v1253_v46 = vrot.slane %v7436_v25, 4  ;;  %v1255_v47 = vrot.slane %v7438_v26, 4 }
  0x36   : > { %v1248_v34 = vsel %vm1245_vm3, %v1246_v30, %v1247_v33  ;;  %v1250_v40 = vsel %vm1245_vm3, %v1247_v33, %v1249_v35  ;;  %v1252_v42 = vsel %vm1245_vm3, %v1249_v35, %v1251_v36  ;;  %v1257_v52 = vrot.slane %v7448_v31, 4 }
  0x37   : > { %v1254_v48 = vsel %vm1245_vm3, %v1251_v36, %v1253_v46  ;;  %v1256_v51 = vsel %vm1245_vm3, %v1253_v46, %v1255_v47  ;;  %v1259_v53 = vrot.slane %v7450_v32, 4  ;;  %v1261_v57 = vrot.slane %v7460_v37, 4 }
  0x38   : > { %v1258_v54 = vsel %vm1245_vm3, %v1255_v47, %v1257_v52  ;;  %v1263_v58 = vrot.slane %v7462_v38, 4  ;;  %v1269_v3 = vrot.slane %v7484_v49, 4  ;;  %v1271_v4 = vrot.slane %v7486_v50, 4 }
  0x39   : > { %6387 = vmatmul.mubr.msk.bf16.gmra.mrb[8].mxu0 %vm544_vm1, %v7436_v25  ;;  %v7641_v15 = vpack.c.bf16 %v386_v9, %v385_v8  ;;  %v1273_v21 = vrot.slane %v7496_v55, 4  ;;  %v421_v30 = vshll.u32 %v7405_v11, 16  ;;  %v425_v33 = vshrl.u32 %v7405_v11, 16 }
  0x3a   : > { %6390 = vmatprep.mubr.msk.bf16.mxu0 %vm544_vm1, %v7438_v26  ;;  %v1272_v18 = vsel %vm1245_vm3, %v1269_v3, %v1271_v4  ;;  %v433_v35 = vshrl.u32 %v7408_v13, 16  ;;  %v465_v8 = vshrl.u32 %v7438_v26, 16 }
  0x3b   : > { %v1275_v24 = vrot.slane %v7641_v15, 4  ;;  %v1274_v36 = vsel %vm1245_vm3, %v1271_v4, %v1273_v21  ;;  %v461_v4 = vshll.u32 %v7438_v26, 16 }
  0x3c   : > { %v1528_v46 = vrot.slane %v433_v35, 4 }
  0x41   : > { %6391 = vmatmul.mubr.msk.bf16.gmra.mrb[12].mxu0 %vm544_vm1, %v7448_v31 }
  0x42   : > { %6394 = vmatprep.mubr.msk.bf16.mxu0 %vm544_vm1, %v7450_v32 }
  0x49   : > { %6395 = vmatmul.mubr.msk.bf16.gmra.mrb[16].mxu0 %vm544_vm1, %v7460_v37 }
  0x4a   : > { %6398 = vmatprep.mubr.msk.bf16.mxu0 %vm544_vm1, %v7462_v38 }
  0x51   : > { %6399 = vmatmul.mubr.msk.bf16.gmra.mrb[20].mxu0 %vm544_vm1, %v7472_v43 }
  0x52   : > { %6402 = vmatprep.mubr.msk.bf16.mxu0 %vm544_vm1, %v7474_v44 }
  0x59   : > { %6403 = vmatmul.mubr.msk.bf16.gmra.mrb[24].mxu0 %vm544_vm1, %v7484_v49 }
  0x5a   : > { %6406 = vmatprep.mubr.msk.bf16.mxu0 %vm544_vm1, %v7486_v50 }
  0x61   : > { %6407 = vmatmul.mubr.msk.bf16.gmra.mrb[28].mxu0 %vm544_vm1, %v7496_v55 }
  0x62   : > { %6412 = vmatprep.mubr.msk.bf16.mxu0 %vm544_vm1, %v972_v56  ;;  %v1260_v56 = vsel %vm1245_vm3, %v1257_v52, %v1259_v53 }
  0x69   : > { %6413 = vmatmul.mubr.msk.bf16.vlgmr.msra.gmra.mrb[0].mxu0 %vm544_vm1, %v974_v59  ;;  %v1262_v59 = vsel %vm1245_vm3, %v1259_v53, %v1261_v57 }
  0x6a   : > { %6445 = vmatpush3.bf16.msra.mxu0 %v1330_v60  ;;  %6416 = vmatprep.mubr.msk.bf16.mxu0 %vm544_vm1, %v976_v61  ;;  %v1264_v60 = vsel %vm1245_vm3, %v1261_v57, %v1263_v58  ;;  %v1265_v61 = vrot.slane %v7472_v43, 4 }
  0x6b   : > { %6947 = vmatprep.subr.msk.bf16.mxu0 %vm593_vm0, %v1523_v62  ;;  %v1267_v62 = vrot.slane %v7474_v44, 4 }
  0x6c   : > { %v1266_v63 = vsel %vm1245_vm3, %v1263_v58, %v1265_v61 }
  0x6d   : > { %v1268_v0 = vsel %vm1245_vm3, %v1265_v61, %v1267_v62  ;;  %v1270_v14 = vsel %vm1245_vm3, %v1267_v62, %v1269_v3 }
  0x71   : > { %6417 = vmatmul.mubr.msk.bf16.gmra.mrb[4].mxu0 %vm544_vm1, %v7518_v1 }
  0x72   : > { %6420 = vmatprep.mubr.msk.bf16.mxu0 %vm544_vm1, %v7521_v2 }
  0x79   : > { %6421 = vmatmul.mubr.msk.bf16.gmra.mrb[8].mxu0 %vm544_vm1, %v7530_v5 }
  0x7a   : > { %6424 = vmatprep.mubr.msk.bf16.mxu0 %vm544_vm1, %v7533_v6 }
  0x81   : > { %6425 = vmatmul.mubr.msk.bf16.gmra.mrb[12].mxu0 %vm544_vm1, %v7542_v10 }
  0x82   : > { %6428 = vmatprep.mubr.msk.bf16.mxu0 %vm544_vm1, %v7545_v12 }
  0x89   : > { %6429 = vmatmul.mubr.msk.bf16.gmra.mrb[16].mxu0 %vm544_vm1, %v7554_v16 }
  0x8a   : > { %6432 = vmatprep.mubr.msk.bf16.mxu0 %vm544_vm1, %v7557_v17 }
  0x91   : > { %6433 = vmatmul.mubr.msk.bf16.gmra.mrb[20].mxu0 %vm544_vm1, %v7566_v22 }
  0x92   : > { %6436 = vmatprep.mubr.msk.bf16.mxu0 %vm544_vm1, %v7569_v23 }
  0x99   : > { %6437 = vmatmul.mubr.msk.bf16.gmra.mrb[24].mxu0 %vm544_vm1, %v7580_v28 }
  0x9a   : > { %6440 = vmatprep.mubr.msk.bf16.mxu0 %vm544_vm1, %v7584_v29 }
  0xa1   : > { %6441 = vmatmul.mubr.msk.bf16.gmra.mrb[28].mxu0 %vm544_vm1, %v7577_v27 }
  0xa2   : > { %6446 = vmatprep.mubr.msk.bf16.mxu0 %vm544_vm1, %v1248_v34  ;;  %v429_v34 = vshll.u32 %v7408_v13, 16 }
  0xa4   : > { %v1529_v47 = vrot.slane %v429_v34, 5 }
  0xa6   : > { %v1530_v53 = vor.u32 %v1529_v47, %v1528_v46  ;;  %v477_v47 = vshll.u32 %v7450_v32, 16 }
  0xa9   : > { %6447 = vmatmul.mubr.msk.bf16.vlgmr.msra.gmra.mrb[0].mxu0 %vm544_vm1, %v1250_v40  ;;  %v1276_v40 = vsel %vm1245_vm3, %v1273_v21, %v1275_v24  ;;  %v1929_v21 = vsel %vm593_vm0, %v1879_v45, 0 }
  0xaa   : > { %6479 = vmatpush3.bf16.msra.mxu0 %v1647_v41  ;;  %6450 = vmatprep.mubr.msk.bf16.mxu0 %vm544_vm1, %v1252_v42  ;;  %v1525_v41 = vrot.slane %v425_v33, 4  ;;  %v1526_v42 = vrot.slane %v421_v30, 5 }
  0xab   : > { %6948 = vmatprep.subr.msk.bf16.mxu0 %vm593_vm0, %v1879_v45  ;;  %v469_v45 = vshll.u32 %v7448_v31, 16 }
  0xac   : > { %v1527_v52 = vor.u32 %v1526_v42, %v1525_v41  ;;  %v7699_v41 = vld [vmem:[%s9457_s1 + $0xc] sm:$0x3]  ;;  %v473_v42 = vshrl.u32 %v7448_v31, 16 }
  0xb1   : > { %6451 = vmatmul.mubr.msk.bf16.gmra.mrb[4].mxu0 %vm544_vm1, %v1254_v48  ;;  %v437_v48 = vshll.u32 %v7424_v19, 16 }
  0xb2   : > { %6454 = vmatprep.mubr.msk.bf16.mxu0 %vm544_vm1, %v1256_v51  ;;  %v441_v51 = vshrl.u32 %v7424_v19, 16 }
  0xb3   : > { %v1533_v58 = vrot.slane %v437_v48, 5 }
  0xb4   : > { %v1532_v57 = vrot.slane %v441_v51, 4 }
  0xb6   : > { %v1534_v62 = vor.u32 %v1533_v58, %v1532_v57  ;;  %v1548_v57 = vrot.slane %v473_v42, 4  ;;  %v1549_v58 = vrot.slane %v469_v45, 5 }
  0xb8   : > { %v1535_v9 = vsel %vm1524_vm4, %v1530_v53, %v1534_v62 }
  0xb9   : > { %6455 = vmatmul.mubr.msk.bf16.gmra.mrb[8].mxu0 %vm544_vm1, %v1258_v54  ;;  %v445_v54 = vshll.u32 %v7426_v20, 16 }
  0xba   : > { %6458 = vmatprep.mubr.msk.bf16.mxu0 %vm544_vm1, %v1260_v56  ;;  %v449_v56 = vshrl.u32 %v7426_v20, 16 }
  0xbb   : > { %v1537_v61 = vrot.slane %v445_v54, 5 }
  0xc1   : > { %6459 = vmatmul.mubr.msk.bf16.gmra.mrb[12].mxu0 %vm544_vm1, %v1262_v59  ;;  %v1531_v59 = vsel %vm1524_vm4, %v1527_v52, %v1530_v53  ;;  %v481_v52 = vshrl.u32 %v7450_v32, 16 }
  0xc2   : > { %6462 = vmatprep.mubr.msk.bf16.mxu0 %vm544_vm1, %v1264_v60  ;;  %v1536_v60 = vrot.slane %v449_v56, 4 }
  0xc4   : > { %v1538_v3 = vor.u32 %v1537_v61, %v1536_v60  ;;  %v1552_v60 = vrot.slane %v481_v52, 4  ;;  %v1553_v61 = vrot.slane %v477_v47, 5 }
  0xc9   : > { %6463 = vmatmul.mubr.msk.bf16.gmra.mrb[16].mxu0 %vm544_vm1, %v1266_v63  ;;  %v453_v63 = vshll.u32 %v7436_v25, 16 }
  0xca   : > { %6466 = vmatprep.mubr.msk.bf16.mxu0 %vm544_vm1, %v1268_v0  ;;  %v457_v0 = vshrl.u32 %v7436_v25, 16 }
  0xd1   : > { %6467 = vmatmul.mubr.msk.bf16.gmra.mrb[20].mxu0 %vm544_vm1, %v1270_v14  ;;  %v1540_v14 = vrot.slane %v457_v0, 4 }
  0xd2   : > { %6470 = vmatprep.mubr.msk.bf16.mxu0 %vm544_vm1, %v1272_v18  ;;  %v1541_v18 = vrot.slane %v453_v63, 5 }
  0xd4   : > { %v1542_v39 = vor.u32 %v1541_v18, %v1540_v14  ;;  %v1554_v14 = vor.u32 %v1553_v61, %v1552_v60  ;;  %v9472_v18 = vshll.u32 %v7462_v38, 16  ;;  %v9478_v61 = vshll.u32 %v7474_v44, 16 }
  0xd6   : > { %v1543_v53 = vsel %vm1524_vm4, %v1538_v3, %v1542_v39 }
  0xd9   : > { %6471 = vmatmul.mubr.msk.bf16.gmra.mrb[24].mxu0 %vm544_vm1, %v1274_v36  ;;  %v1544_v36 = vrot.slane %v465_v8, 4 }
  0xda   : > { %6474 = vmatprep.mubr.msk.bf16.mxu0 %vm544_vm1, %v1276_v40  ;;  %v1545_v40 = vrot.slane %v461_v4, 5 }
  0xdc   : > { %v1546_v46 = vor.u32 %v1545_v40, %v1544_v36 }
  0xe1   : > { %6475 = vmatmul.mubr.msk.bf16.gmra.mrb[28].mxu0 %vm544_vm1, %v1275_v24  ;;  %v1539_v24 = vsel %vm1524_vm4, %v1534_v62, %v1538_v3  ;;  %v1550_v62 = vor.u32 %v1549_v58, %v1548_v57  ;;  %v9481_v3 = vshll.u32 %v7460_v37, 16  ;;  %v1561_v57 = vrot.slane %v9472_v18, 5 }
  0xe2   : > { %6480 = vmatprep.mubr.msk.bf16.mxu0 %vm544_vm1, %v1531_v59  ;;  %v1547_v59 = vsel %vm1524_vm4, %v1542_v39, %v1546_v46 }
  0xe3   : > { %v1557_v40 = vrot.slane %v9481_v3, 5  ;;  %v1555_v39 = vsel %vm1524_vm4, %v1550_v62, %v1554_v14 }
  0xe9   : > { %6481 = vmatmul.mubr.msk.bf16.vlgmr.msra.gmra.mrb[0].mxu0 %vm544_vm1, %v1535_v9  ;;  %v9468_v9 = vshrl.u32 %v7460_v37, 16 }
  0xea   : > { %6513 = vmatpush3.bf16.msra.mxu0 %v1929_v21  ;;  %6484 = vmatprep.mubr.msk.bf16.mxu0 %vm544_vm1, %v1539_v24  ;;  %v9469_v21 = vshrl.u32 %v7462_v38, 16  ;;  %v1551_v24 = vsel %vm1524_vm4, %v1546_v46, %v1550_v62  ;;  %v9471_v46 = vshll.u32 %v7472_v43, 16  ;;  %v9473_v62 = vshrl.u32 %v7474_v44, 16 }
  0xeb   : > { %6949 = vmatprep.subr.msk.bf16.mxu0 %vm593_vm0, %v7699_v41  ;;  %v1556_v36 = vrot.slane %v9468_v9, 4 }
  0xed   : > { %v1558_v58 = vor.u32 %v1557_v40, %v1556_v36  ;;  %v1568_v36 = vrot.slane %v9473_v62, 4  ;;  %v1569_v40 = vrot.slane %v9478_v61, 5 }
  0xef   : > { %v1559_v9 = vsel %vm1524_vm4, %v1554_v14, %v1558_v58  ;;  %v9475_v14 = vshll.u32 %v7484_v49, 16 }
  0xf1   : > { %6485 = vmatmul.mubr.msk.bf16.gmra.mrb[4].mxu0 %vm544_vm1, %v1543_v53  ;;  %v1560_v53 = vrot.slane %v9469_v21, 4 }
  0xf2   : > { %6488 = vmatprep.mubr.msk.bf16.mxu0 %vm544_vm1, %v1547_v59  ;;  %v9470_v59 = vshrl.u32 %v7472_v43, 16 }
  0xf3   : > { %v1562_v60 = vor.u32 %v1561_v57, %v1560_v53  ;;  %v9474_v57 = vshrl.u32 %v7484_v49, 16 }
  0xf4   : > { %v1564_v21 = vrot.slane %v9470_v59, 4  ;;  %v1570_v59 = vor.u32 %v1569_v40, %v1568_v36  ;;  %v9480_v36 = vshll.u32 %v7496_v55, 16  ;;  %v9479_v40 = vshrl.u32 %v7496_v55, 16 }
  0xf5   : > { %v1572_v62 = vrot.slane %v9474_v57, 4 }
  0xf9   : > { %6489 = vmatmul.mubr.msk.bf16.gmra.mrb[8].mxu0 %vm544_vm1, %v1551_v24  ;;  %v1565_v24 = vrot.slane %v9471_v46, 5  ;;  %v9477_v46 = vshll.u32 %v7486_v50, 16 }
  0xfa   : > { %6492 = vmatprep.mubr.msk.bf16.mxu0 %vm544_vm1, %v1555_v39  ;;  %v1563_v39 = vsel %vm1524_vm4, %v1558_v58, %v1562_v60  ;;  %v9476_v58 = vshrl.u32 %v7486_v50, 16 }
  0xfb   : > { %v1566_v53 = vor.u32 %v1565_v24, %v1564_v21  ;;  %v1577_v24 = vrot.slane %v9477_v46, 5  ;;  %v1580_v46 = vrot.slane %v9479_v40, 4 }
  0xfc   : > { %v1576_v21 = vrot.slane %v9476_v58, 4 }
  0xfd   : > { %v1567_v18 = vsel %vm1524_vm4, %v1562_v60, %v1566_v53 }
  0xfe   : > { %v1578_v57 = vor.u32 %v1577_v24, %v1576_v21  ;;  %v387_v21 = vld [vmem:[%s7395_s26 + $0x110] sm:$0xff]  ;;  %v388_v24 = vld [vmem:[%s7395_s26 + $0x118] sm:$0xff] }
  0xff   : > { %v7787_v61 = vpack.c.bf16 %v388_v24, %v387_v21  ;;  %v1850_v21 = vrot.slane %v7436_v25, 5  ;;  %v1852_v24 = vrot.slane %v7438_v26, 5 }
 0x101   : > { %6493 = vmatmul.mubr.msk.bf16.gmra.mrb[12].mxu0 %vm544_vm1, %v1559_v9  ;;  %v1573_v9 = vrot.slane %v9475_v14, 5  ;;  %v1588_v14 = vshll.u32 %v7641_v15, 16 }
 0x102   : > { %6496 = vmatprep.mubr.msk.bf16.mxu0 %vm544_vm1, %v1563_v39  ;;  %v1571_v39 = vsel %vm1524_vm4, %v1566_v53, %v1570_v59  ;;  %v9482_v53 = vshrl.u32 %v7641_v15, 16 }
 0x103   : > { %v1574_v60 = vor.u32 %v1573_v9, %v1572_v62  ;;  %v1590_v9 = vrot.slane %v1588_v14, 5 }
 0x104   : > { %v1587_v62 = vrot.slane %v9482_v53, 4 }
 0x105   : > { %v1575_v58 = vsel %vm1524_vm4, %v1570_v59, %v1574_v60 }
 0x106   : > { %v1591_v40 = vor.u32 %v1590_v9, %v1587_v62 }
 0x109   : > { %6497 = vmatmul.mubr.msk.bf16.gmra.mrb[16].mxu0 %vm544_vm1, %v1567_v18  ;;  %v1581_v18 = vrot.slane %v9480_v36, 5 }
 0x10a   : > { %6500 = vmatprep.mubr.msk.bf16.mxu0 %vm544_vm1, %v1571_v39  ;;  %v1579_v39 = vsel %vm1524_vm4, %v1574_v60, %v1578_v57  ;;  %v1594_v60 = vshll.u32 %v7787_v61, 16 }
 0x10b   : > { %v1582_v59 = vor.u32 %v1581_v18, %v1580_v46  ;;  %v1844_v46 = vrot.slane %v7408_v13, 5 }
 0x10c   : > { %v1596_v53 = vrot.slane %v1594_v60, 5 }
 0x10d   : > { %v1583_v36 = vsel %vm1524_vm4, %v1578_v57, %v1582_v59  ;;  %v1592_v3 = vsel %vm1524_vm4, %v1582_v59, %v1591_v40 }
 0x10e   : > { %v1597_v18 = vsel %vm1524_vm4, %v1591_v40, %v1596_v53  ;;  %v2131_v40 = vsel %vm593_vm0, %v7699_v41, 0  ;;  %v1853_v41 = vsel %vm1842_vm5, %v1850_v21, %v1852_v24 }
 0x111   : > { %6501 = vmatmul.mubr.msk.bf16.gmra.mrb[20].mxu0 %vm544_vm1, %v1575_v58  ;;  %v1843_v58 = vrot.slane %v7405_v11, 5  ;;  %v7887_v11 = vld [vmem:[%s9457_s1 + $0x10] sm:$0x3] }
 0x112   : > { %6504 = vmatprep.mubr.msk.bf16.mxu0 %vm544_vm1, %v1579_v39  ;;  %v7807_v39 = vld [vmem:[%s9457_s1 + $0xc] ss:$0 sps:$4 sm:$0xcc]  }
 0x113   : > { %v1845_v57 = vsel %vm1842_vm5, %v1843_v58, %v1844_v46  ;;  %v2343_v9 = vrot.slane %v7807_v39, 2  ;;  %v1854_v58 = vrot.slane %v7448_v31, 5  ;;  %v455_v39 = vrot.slane %v453_v63, 1 }
 0x119   : > { %6505 = vmatmul.mubr.msk.bf16.gmra.mrb[24].mxu0 %vm544_vm1, %v1583_v36  ;;  %v1846_v36 = vrot.slane %v7424_v19, 5 }
 0x11a   : > { %6508 = vmatprep.mubr.msk.bf16.mxu0 %vm544_vm1, %v1592_v3  ;;  %v1848_v3 = vrot.slane %v7426_v20, 5 }
 0x11b   : > { %v1847_v62 = vsel %vm1842_vm5, %v1844_v46, %v1846_v36  ;;  %v1856_v46 = vrot.slane %v7450_v32, 5 }
 0x11c   : > { %v1849_v53 = vsel %vm1842_vm5, %v1846_v36, %v1848_v3  ;;  %v1851_v59 = vsel %vm1842_vm5, %v1848_v3, %v1850_v21  ;;  %v1858_v36 = vrot.slane %v7460_v37, 5  ;;  %v1860_v3 = vrot.slane %v7462_v38, 5 }
 0x11d   : > { %v1864_v21 = vrot.slane %v7474_v44, 5 }
 0x121   : > { %6509 = vmatmul.mubr.msk.bf16.gmra.mrb[28].mxu0 %vm544_vm1, %v1597_v18  ;;  %v1855_v18 = vsel %vm1842_vm5, %v1852_v24, %v1854_v58 }
 0x122   : > { %6514 = vmatprep.mubr.msk.bf16.mxu0 %vm544_vm1, %v1845_v57  ;;  %v1857_v57 = vsel %vm1842_vm5, %v1854_v58, %v1856_v46  ;;  %v1868_v58 = vrot.slane %v7486_v50, 5 }
 0x129   : > { %6515 = vmatmul.mubr.msk.bf16.vlgmr.msra.gmra.mrb[0].mxu0 %vm544_vm1, %v1847_v62  ;;  %v1859_v62 = vsel %vm1842_vm5, %v1856_v46, %v1858_v36 }
 0x12a   : > { %6547 = vmatpush3.bf16.msra.mxu0 %v2131_v40  ;;  %6518 = vmatprep.mubr.msk.bf16.mxu0 %vm544_vm1, %v1849_v53  ;;  %v1861_v40 = vsel %vm1842_vm5, %v1858_v36, %v1860_v3  ;;  %v1862_v53 = vrot.slane %v7472_v43, 5  ;;  %v1872_v36 = vrot.slane %v7641_v15, 5 }
 0x12b   : > { %6950 = vmatprep.subr.msk.bf16.mxu0 %vm593_vm0, %v2343_v9 }
 0x12c   : > { %v1863_v24 = vsel %vm1842_vm5, %v1860_v3, %v1862_v53 }
 0x131   : > { %6519 = vmatmul.mubr.msk.bf16.gmra.mrb[4].mxu0 %vm544_vm1, %v1851_v59  ;;  %v1865_v59 = vsel %vm1842_vm5, %v1862_v53, %v1864_v21 }
 0x132   : > { %6522 = vmatprep.mubr.msk.bf16.mxu0 %vm544_vm1, %v1853_v41  ;;  %v1866_v41 = vrot.slane %v7484_v49, 5 }
 0x134   : > { %v1867_v46 = vsel %vm1842_vm5, %v1864_v21, %v1866_v41  ;;  %v7037_v21 = vld [vmem:[%s9457_s1] ss:$0 sps:$4 sm:$0xcc]  }
 0x139   : > { %6523 = vmatmul.mubr.msk.bf16.gmra.mrb[8].mxu0 %vm544_vm1, %v1855_v18  ;;  %v1869_v18 = vsel %vm1842_vm5, %v1866_v41, %v1868_v58  ;;  %v414_v41 = vshrl.u32 %v7400_v7, 16 }
 0x13a   : > { %6526 = vmatprep.mubr.msk.bf16.mxu0 %vm544_vm1, %v1857_v57  ;;  %v1870_v57 = vrot.slane %v7496_v55, 5 }
 0x13c   : > { %v1871_v3 = vsel %vm1842_vm5, %v1868_v58, %v1870_v57 }
 0x141   : > { %6527 = vmatmul.mubr.msk.bf16.gmra.mrb[12].mxu0 %vm544_vm1, %v1859_v62  ;;  %v1873_v62 = vsel %vm1842_vm5, %v1870_v57, %v1872_v36 }
 0x142   : > { %6530 = vmatprep.mubr.msk.bf16.mxu0 %vm544_vm1, %v1861_v40  ;;  %v1874_v40 = vrot.slane %v7787_v61, 5 }
 0x144   : > { %v1875_v53 = vsel %vm1842_vm5, %v1872_v36, %v1874_v40  ;;  %v2357_v40 = vsel %vm593_vm0, %v2343_v9, 0 }
 0x149   : > { %6531 = vmatmul.mubr.msk.bf16.gmra.mrb[16].mxu0 %vm544_vm1, %v1863_v24  ;;  %v416_v24 = vshll.u32 %v7400_v7, 16 }
 0x14a   : > { %6534 = vmatprep.mubr.msk.bf16.mxu0 %vm544_vm1, %v1865_v59  ;;  %v543_v59 = vrot.slane %v7037_v21, 2  ;;  %v9490_v21 = vshll.u32 %v7462_v38, 16 }
 0x14b   : > { %v418_v58 = vrot.slane %v416_v24, 1 }
 0x14c   : > { %6943 = vmatprep.subr.msk.bf16.mxu1 %vm593_vm0, %v543_v59  ;;  %v595_v57 = vsel %vm593_vm0, %v543_v59, 0  ;;  %v495_v24 = vrot.slane %v9490_v21, 1  ;;  %v9493_v59 = vshll.u32 %v7472_v43, 16 }
 0x14d   : > { %v419_v36 = vor.u32 %v418_v58, %v414_v41  ;;  %6343 = vmatpush3.bf16.msra.mxu1 %v595_v57  ;;  %v7251_v58 = vmov 0  }
 0x14e   : > { %v503_v41 = vrot.slane %v9493_v59, 1  ;;  %7032 = vset.pattern.permute.xlu0 %v7251_v58  ;;  %7033 = vset.pattern.permute.xlu1 %v7251_v58 }
 0x151   : > { %6535 = vmatmul.mubr.msk.bf16.gmra.mrb[20].mxu0 %vm544_vm1, %v1867_v46  ;;  %v423_v46 = vrot.slane %v421_v30, 1  ;;  %v439_v30 = vrot.slane %v437_v48, 1 }
 0x152   : > { %6538 = vmatprep.mubr.msk.bf16.mxu0 %vm544_vm1, %v1869_v18  ;;  %v431_v18 = vrot.slane %v429_v34, 1 }
 0x153   : > { %v427_v7 = vor.u32 %v425_v33, %v423_v46  ;;  %v443_v33 = vor.u32 %v441_v51, %v439_v30 }
 0x154   : > { %v435_v48 = vor.u32 %v433_v35, %v431_v18  ;;  %v459_v35 = vor.u32 %v457_v0, %v455_v39 }
 0x155   : > { %v432_v34 = vsel %vm412_vm6, %v427_v7, %v431_v18  ;;  %v9494_v18 = vshll.u32 %v7474_v44, 16 }
 0x156   : > { %v440_v9 = vsel %vm412_vm6, %v435_v48, %v439_v30  ;;  %v2873_v30 = vld [vmem:[%s7975_s20 + $0x10] sm:$0xff]  ;;  %v2875_v48 = vld [vmem:[%s7975_s20 + $0x20] sm:$0xff] }
 0x157   : > { %v511_v57 = vrot.slane %v9494_v18, 1  ;;  %2914 = vperm.xlu1 %7033, %v2873_v30   ;;  %v2885_v18 = vld [vmem:[%s7975_s20 + $0x70] sm:$0xff] }
 0x158   : > { %v2889_v30 = vld [vmem:[%s7975_s20 + $0x90] sm:$0xff] }
 0x159   : > { %6539 = vmatmul.mubr.msk.bf16.gmra.mrb[24].mxu0 %vm544_vm1, %v1871_v3  ;;  %v424_v3 = vsel %vm412_vm6, %v419_v36, %v423_v46  ;;  %v9495_v36 = vshrl.u32 %v7472_v43, 16 }
 0x15a   : > { %6542 = vmatprep.mubr.msk.bf16.mxu0 %vm544_vm1, %v1873_v62  ;;  %6344 = vmatprep.mubr.msk.bf16.mxu1 %vm544_vm1, %v424_v3  ;;  %v447_v62 = vrot.slane %v445_v54, 1  ;;  %v2872_v3 = vld [vmem:[%s7975_s20 + $0x8] sm:$0xff] }
 0x15b   : > { %6345 = vmatmul.mubr.msk.bf16.vlgmr.msra.gmra.mrb[0].mxu1 %vm544_vm1, %v432_v34  ;;  %v507_v7 = vor.u32 %v9495_v36, %v503_v41  ;;  %v9496_v34 = vshrl.u32 %v7474_v44, 16  ;;  %v2571_v36 = vsel %vm593_vm0, %v7887_v11, 0 }
 0x15c   : > { %v451_v54 = vor.u32 %v449_v56, %v447_v62  ;;  %6348 = vmatprep.mubr.msk.bf16.mxu1 %vm544_vm1, %v440_v9  ;;  %v7906_v13 = vsel %vm412_vm6, %v443_v33, %v447_v62  ;;  %v471_v56 = vrot.slane %v469_v45, 1 }
 0x15d   : > { %v515_v62 = vor.u32 %v9496_v34, %v511_v57  ;;  %v2888_v34 = vld [vmem:[%s7975_s20 + $0x88] sm:$0xff] }
 0x161   : > { %6543 = vmatmul.mubr.msk.bf16.gmra.mrb[28].mxu0 %vm544_vm1, %v1875_v53 }
 0x162   : > { %6548 = vmatprep.mubr.msk.bf16.mxu0 %vm544_vm1, %v7424_v19  ;;  %v7909_v19 = vsel %vm412_vm6, %v451_v54, %v455_v39  ;;  %v9498_v39 = vshll.u32 %v7486_v50, 16 }
 0x163   : > { %6349 = vmatmul.mubr.msk.bf16.gmra.mrb[4].mxu1 %vm544_vm1, %v7906_v13 }
 0x164   : > { %6352 = vmatprep.mubr.msk.bf16.mxu1 %vm544_vm1, %v7909_v19  ;;  %v527_v9 = vrot.slane %v9498_v39, 1  ;;  %v2892_v39 = vld [vmem:[%s7975_s20 + $0xa8] sm:$0xff] }
 0x169   : > { %6549 = vmatmul.mubr.msk.bf16.vlgmr.msra.gmra.mrb[0].mxu0 %vm544_vm1, %v7426_v20  ;;  %v463_v20 = vrot.slane %v461_v4, 1 }
 0x16a   : > { %6581 = vmatpush3.bf16.msra.mxu0 %v2357_v40  ;;  %6552 = vmatprep.mubr.msk.bf16.mxu0 %vm544_vm1, %v7436_v25  ;;  %v479_v25 = vrot.slane %v477_v47, 1  ;;  %v9497_v40 = vshll.u32 %v7484_v49, 16 }
 0x16b   : > { %6951 = vmatprep.subr.msk.bf16.mxu0 %vm593_vm0, %v7887_v11  ;;  %v467_v51 = vor.u32 %v465_v8, %v463_v20  ;;  %v7928_v63 = vsel %vm412_vm6, %v459_v35, %v463_v20  ;;  %v9489_v8 = vshll.u32 %v7460_v37, 16  ;;  %v2874_v35 = vld [vmem:[%s7975_s20 + $0x18] sm:$0xff]  ;;  %v7040_v11 = vld [vmem:[%s9458_s2 + $0x48] sm:$0xff]  }
 0x16c   : > { %6353 = vmatmul.mubr.msk.bf16.gmra.mrb[8].mxu1 %vm544_vm1, %v7928_v63  ;;  %v483_v0 = vor.u32 %v481_v52, %v479_v25  ;;  %v519_v33 = vrot.slane %v9497_v40, 1  ;;  %2919 = vperm.xlu1 %7033, %v2874_v35   ;;  %v7042_v40 = vld [vmem:[%s9458_s2 + $0x50] sm:$0xff]   ;;  %v2896_v35 = vld [vmem:[%s7975_s20 + $0xc8] sm:$0xff] }
 0x16d   : > { %v7931_v4 = vsel %vm412_vm6, %v467_v51, %v471_v56  ;;  %v487_v45 = vrot.slane %v9489_v8, 1  ;;  %v2877_v51 = vld [vmem:[%s7975_s20 + $0x30] sm:$0xff]  ;;  %v2876_v8 = vld [vmem:[%s7975_s20 + $0x28] sm:$0xff] }
 0x16e   : > { %6356 = vmatprep.mubr.msk.bf16.mxu1 %vm544_vm1, %v7931_v4  ;;  %v8007_v54 = vsel %vm412_vm6, %v515_v62, %v519_v33  ;;  %v2891_v62 = vld [vmem:[%s7975_s20 + $0xa0] sm:$0xff] }
 0x16f   : > { %v7953_v53 = vsel %vm412_vm6, %v483_v0, %v487_v45 }
 0x170   : > { %2929 = vperm.xlu1 %7033, %v2876_v8  }
 0x171   : > { %6553 = vmatmul.mubr.msk.bf16.gmra.mrb[4].mxu0 %vm544_vm1, %v7438_v26  ;;  %v475_v26 = vor.u32 %v473_v42, %v471_v56  ;;  %v9492_v42 = vshrl.u32 %v7462_v38, 16  ;;  %v9500_v56 = vshrl.u32 %v7486_v50, 16 }
 0x172   : > { %6556 = vmatprep.mubr.msk.bf16.mxu0 %vm544_vm1, %v7448_v31  ;;  %v9491_v31 = vshrl.u32 %v7460_v37, 16 }
 0x173   : > { %v7950_v47 = vsel %vm412_vm6, %v475_v26, %v479_v25  ;;  %v499_v52 = vor.u32 %v9492_v42, %v495_v24  ;;  %v531_v25 = vor.u32 %v9500_v56, %v527_v9  ;;  %v9501_v26 = vshll.u32 %v7496_v55, 16  ;;  %v2880_v42 = vld [vmem:[%s7975_s20 + $0x48] sm:$0xff]  ;;  %v2898_v56 = vld [vmem:[%s7975_s20 + $0xd8] sm:$0xff] }
 0x174   : > { %6357 = vmatmul.mubr.msk.bf16.gmra.mrb[12].mxu1 %vm544_vm1, %v7950_v47 }
 0x175   : > { %6360 = vmatprep.mubr.msk.bf16.mxu1 %vm544_vm1, %v7953_v53  ;;  %v535_v0 = vrot.slane %v9501_v26, 1 }
 0x177   : > { %v8033_v21 = vsel %vm412_vm6, %v531_v25, %v535_v0  ;;  %v2901_v25 = vld [vmem:[%s7975_s20 + $0xf0] sm:$0xff] }
 0x179   : > { %6557 = vmatmul.mubr.msk.bf16.gmra.mrb[8].mxu0 %vm544_vm1, %v7450_v32  ;;  %v491_v32 = vor.u32 %v9491_v31, %v487_v45  ;;  %v389_v31 = vld [vmem:[%s7395_s26 + $0x120] sm:$0xff] }
 0x17a   : > { %6560 = vmatprep.mubr.msk.bf16.mxu0 %vm544_vm1, %v7460_v37  ;;  %v2871_v37 = vld [vmem:[%s7975_s20] sm:$0xff] }
 0x17b   : > { %v7979_v46 = vsel %vm412_vm6, %v491_v32, %v495_v24  ;;  %2904 = vperm.xlu0 %7032, %v2871_v37   ;;  %v2881_v24 = vld [vmem:[%s7975_s20 + $0x50] sm:$0xff]  ;;  %v390_v32 = vld [vmem:[%s7395_s26 + $0x128] sm:$0xff]  ;;  %v2882_v37 = vld [vmem:[%s7975_s20 + $0x58] sm:$0xff]  ;;  %s6957_s26 = smul.u32 48, %s7237_s9 }
 0x17c   : > { %6361 = vmatmul.mubr.msk.bf16.gmra.mrb[16].mxu1 %vm544_vm1, %v7979_v46  ;;  %v8053_v58 = vpack.c.bf16 %v390_v32, %v389_v31 }
 0x17d   : > { %s5287_s30 = sadd.s32 %s6957_s26, %s6956_s17  ;;  %s7161_s17 = scalar_lea.vmem %s7160_s13, 6144 }
 0x17e   : > { %s5694_s21 = sshll.u32 %s5287_s30, 7 }
 0x17f   : > { %2909 = vperm.xlu0 %7032, %v2872_v3   ;;  %v2886_v3 = vld [vmem:[%s7975_s20 + $0x78] sm:$0xff]  ;;  %s9398_s25 = scalar_lea.hbm %s9464_s8, %s5694_s21 }
 0x181   : > { %6561 = vmatmul.mubr.msk.bf16.gmra.mrb[12].mxu0 %vm544_vm1, %v7462_v38  ;;  %v7982_v38 = vsel %vm412_vm6, %v499_v52, %v503_v41  ;;  %v9502_v52 = vshrl.u32 %v7496_v55, 16  ;;  %v2883_v41 = vld [vmem:[%s7975_s20 + $0x60] sm:$0xff] }
 0x182   : > { %6564 = vmatprep.mubr.msk.bf16.mxu0 %vm544_vm1, %v7472_v43  ;;  %6364 = vmatprep.mubr.msk.bf16.mxu1 %vm544_vm1, %v7982_v38  ;;  %v8004_v43 = vsel %vm412_vm6, %v507_v7, %v511_v57  ;;  %v2887_v57 = vld [vmem:[%s7975_s20 + $0x80] sm:$0xff] }
 0x183   : > { %2924 = vperm.xlu0 %7032, %v2875_v48   ;;  %v8050_v59 = vor.u32 %v9502_v52, %v535_v0  ;;  %v7038_v7 = vld [vmem:[%s9458_s2 + $0x40] sm:$0xff]   ;;  %v7043_v48 = vld [vmem:[%s9458_s2 + $0x10] sm:$0xff]   ;;  %v2328_v0 = vrot.slane %v1594_v60, 1 }
 0x184   : > { %6365 = vmatmul.mubr.msk.bf16.gmra.mrb[20].mxu1 %vm544_vm1, %v8004_v43  ;;  %5970 = vmatprep.subr.bf16.mxu1 %v7038_v7  ;;  %v7047_v60 = vld [vmem:[%s9458_s2 + $0x20] sm:$0xff]   ;;  %v7052_v7 = vld [vmem:[%s9458_s2 + $0x78] sm:$0xff]  }
 0x185   : > { %6368 = vmatprep.mubr.msk.bf16.mxu1 %vm544_vm1, %v8007_v54 }
 0x187   : > { %2934 = vperm.xlu0 %7032, %v2877_v51   ;;  %v2899_v51 = vld [vmem:[%s7975_s20 + $0xe0] sm:$0xff] }
 0x189   : > { %6565 = vmatmul.mubr.msk.bf16.gmra.mrb[16].mxu0 %vm544_vm1, %v7474_v44  ;;  %v9499_v44 = vshrl.u32 %v7484_v49, 16 }
 0x18a   : > { %6568 = vmatprep.mubr.msk.bf16.mxu0 %vm544_vm1, %v7484_v49  ;;  %v2879_v49 = vld [vmem:[%s7975_s20 + $0x40] sm:$0xff] }
 0x18b   : > { %v523_v20 = vor.u32 %v9499_v44, %v519_v33  ;;  %2944 = vperm.xlu0 %7032, %v2879_v49   ;;  %v2890_v33 = vld [vmem:[%s7975_s20 + $0x98] sm:$0xff] }
 0x18c   : > { %v7044_v44 = vld [vmem:[%s9458_s2 + $0x58] sm:$0xff]  }
 0x18d   : > { %v8030_v45 = vsel %vm412_vm6, %v523_v20, %v527_v9  ;;  %v2895_v9 = vld [vmem:[%s7975_s20 + $0xc0] sm:$0xff]  ;;  %v2897_v20 = vld [vmem:[%s7975_s20 + $0xd0] sm:$0xff] }
 0x18e   : > { %6369 = vmatmul.mubr.msk.bf16.gmra.mrb[24].mxu1 %vm544_vm1, %v8030_v45 }
 0x18f   : > { %6372 = vmatprep.mubr.msk.bf16.mxu1 %vm544_vm1, %v8033_v21  ;;  %2954 = vperm.xlu0 %7032, %v2881_v24   ;;  %v2337_v24 = vshrl.u32 %v8053_v58, 16 }
 0x191   : > { %6569 = vmatmul.mubr.msk.bf16.gmra.mrb[20].mxu0 %vm544_vm1, %v7486_v50  ;;  %v2878_v50 = vld [vmem:[%s7975_s20 + $0x38] sm:$0xff] }
 0x192   : > { %6572 = vmatprep.mubr.msk.bf16.mxu0 %vm544_vm1, %v7496_v55  ;;  %2939 = vperm.xlu1 %7033, %v2878_v50   ;;  %v2884_v55 = vld [vmem:[%s7975_s20 + $0x68] sm:$0xff] }
 0x193   : > { %2964 = vperm.xlu0 %7032, %v2883_v41   ;;  %v7049_v41 = vld [vmem:[%s9458_s2 + $0x28] sm:$0xff]  }
 0x196   : > { %2949 = vperm.xlu1 %7033, %v2880_v42   ;;  %6373 = vmatmul.mubr.msk.bf16.gmra.mrb[28].mxu1 %vm544_vm1, %v8050_v59  ;;  %v7048_v42 = vld [vmem:[%s9458_s2 + $0x68] sm:$0xff]  }
 0x197   : > { %2974 = vperm.xlu0 %7032, %v2885_v18   ;;  %v7051_v18 = vld [vmem:[%s9458_s2 + $0x30] sm:$0xff]  }
 0x199   : > { %6573 = vmatmul.mubr.msk.bf16.gmra.mrb[24].mxu0 %vm544_vm1, %v7641_v15 }
 0x19a   : > { %6576 = vmatprep.mubr.msk.bf16.mxu0 %vm544_vm1, %v7787_v61  ;;  %2959 = vperm.xlu1 %7033, %v2882_v37  }
 0x19b   : > { %2984 = vperm.xlu0 %7032, %v2887_v57  }
 0x19e   : > { %2969 = vperm.xlu1 %7033, %v2884_v55  }
 0x19f   : > { %2994 = vperm.xlu0 %7032, %v2889_v30  }
 0x1a1   : > { %6577 = vmatmul.mubr.msk.bf16.gmra.mrb[28].mxu0 %vm544_vm1, %v8053_v58 }
 0x1a2   : > { %6582 = vmatprep.mubr.msk.bf16.mxu0 %vm544_vm1, %v7906_v13  ;;  %v7039_v13 = vld [vmem:[%s9458_s2] sm:$0xff]   ;;  %2979 = vperm.xlu1 %7033, %v2886_v3   ;;  %v7053_v3 = vld [vmem:[%s9458_s2 + $0x38] sm:$0xff]  }
 0x1a3   : > { %5971 = vmatpush3.bf16.msra.mxu1 %v7039_v13  ;;  %3004 = vperm.xlu0 %7032, %v2891_v62   ;;  %v7056_v62 = vld [vmem:[%s9458_s2 + $0xc0] sm:$0xff]  }
 0x1a4   : > { %5972 = vmatprep.subr.bf16.mxu1 %v7040_v11 }
 0x1a6   : > { %2989 = vperm.xlu1 %7033, %v2888_v34  }
 0x1a9   : > { %6583 = vmatmul.mubr.msk.bf16.vlgmr.msra.gmra.mrb[0].mxu0 %vm544_vm1, %v7909_v19  ;;  %v7041_v19 = vld [vmem:[%s9458_s2 + $0x8] sm:$0xff]  }
 0x1aa   : > { %6615 = vmatpush3.bf16.msra.mxu0 %v2571_v36  ;;  %6586 = vmatprep.mubr.msk.bf16.mxu0 %vm544_vm1, %v7928_v63  ;;  %v2893_v63 = vld [vmem:[%s7975_s20 + $0xb0] sm:$0xff] }
 0x1ab   : > { %5973 = vmatpush3.bf16.msra.mxu1 %v7041_v19  ;;  %2999 = vperm.xlu1 %7033, %v2890_v33  }
 0x1ac   : > { %5974 = vmatprep.subr.bf16.mxu1 %v7042_v40  ;;  %3014 = vperm.xlu0 %7032, %v2893_v63  }
 0x1af   : > { %5975 = vmatpush3.bf16.msra.mxu1 %v7043_v48  ;;  %3009 = vperm.xlu1 %7033, %v2892_v39  }
 0x1b0   : > { %3024 = vperm.xlu0 %7032, %v2895_v9   ;;  %5976 = vmatprep.subr.bf16.mxu1 %v7044_v44 }
 0x1b1   : > { %6587 = vmatmul.mubr.msk.bf16.gmra.mrb[4].mxu0 %vm544_vm1, %v7931_v4  ;;  %v7045_v4 = vld [vmem:[%s9458_s2 + $0x18] sm:$0xff]  }
 0x1b2   : > { %6590 = vmatprep.mubr.msk.bf16.mxu0 %vm544_vm1, %v7950_v47  ;;  %v2894_v47 = vld [vmem:[%s7975_s20 + $0xb8] sm:$0xff] }
 0x1b3   : > { %5977 = vmatpush3.bf16.msra.mxu1 %v7045_v4  ;;  %3019 = vperm.xlu1 %7033, %v2894_v47  }
 0x1b4   : > { %3034 = vperm.xlu0 %7032, %v2897_v20  }
 0x1b7   : > { %3029 = vperm.xlu1 %7033, %v2896_v35  }
 0x1b8   : > { %3044 = vperm.xlu0 %7032, %v2899_v51  }
 0x1b9   : > { %6591 = vmatmul.mubr.msk.bf16.gmra.mrb[8].mxu0 %vm544_vm1, %v7953_v53  ;;  %v2900_v53 = vld [vmem:[%s7975_s20 + $0xe8] sm:$0xff]  ;;  %s335_s20 = sand.u32 1, %s7225_s28  }
 0x1ba   : > { %6594 = vmatprep.mubr.msk.bf16.mxu0 %vm544_vm1, %v7979_v46  ;;  %v2325_v46 = vrot.slane %v1588_v14, 1  ;;  %s6952_s15 = smul.u32 192, %s335_s20  ;;  %s9404_s11 = scalar_lea.sflag [#allocation4], %s335_s20 }
 0x1bb   : > { %3039 = vperm.xlu1 %7033, %v2898_v56  }
 0x1bc   : > { %3054 = vperm.xlu0 %7032, %v2901_v25   ;;  %v2326_v26 = vsel %vm412_vm6, %v8050_v59, %v2325_v46  ;;  %s9306_s14 = scalar_lea.vmem [#allocation3], %s6952_s15 }
 0x1bd   : > { %s5290_s9 = sshll.u32 %s9306_s14, 4  ;;  %s9392_s9 = int_to_ptr.vmem [resolvable:$true] %s5290_s9 }
 0x1be   : > { %s7155_s15 = scalar_lea.vmem %s9392_s9, 3072  ;;  %p7162_p4 = scmp.lt.s32.totalorder %s9392_s9, %s7160_s13 }
 0x1bf   : > { %3049 = vperm.xlu1 %7033, %v2900_v53   ;;  %p7156_p0 = scmp.ne.s32.totalorder %s9392_s9, %s7155_s15  ;;  %p7163_p5 = scmp.lt.s32.totalorder %s7161_s17, %s7155_s15 }
 0x1c1   : > { %6595 = vmatmul.mubr.msk.bf16.gmra.mrb[12].mxu0 %vm544_vm1, %v7982_v38  ;;  %v2330_v38 = vshrl.u32 %v7787_v61, 16  ;;  %p7157_p1 = pnand %p7156_p0, %p7351_p3  ;;  %p7164_p6 = por %p7163_p5, %p7162_p4 }
 0x1c2   : > { %6598 = vmatprep.mubr.msk.bf16.mxu0 %vm544_vm1, %v8004_v43  ;;  %v2333_v43 = vshll.u32 %v8053_v58, 16 }
 0x1c3   : > { %v2332_v49 = vor.u32 %v2330_v38, %v2328_v0  ;;  %p7158_p2 = pneg %p7157_p1 }
 0x1c4   : > { %v2335_v14 = vrot.slane %v2333_v43, 1 }
 0x1c5   : > { %p7165_p7 = pnand %p7164_p6, %p7158_p2 }
 0x1c6   : > { %v2336_v50 = vsel %vm412_vm6, %v2332_v49, %v2335_v14 }
 0x1c9   : > { %6599 = vmatmul.mubr.msk.bf16.gmra.mrb[16].mxu0 %vm544_vm1, %v8007_v54  ;;  %v9503_v54 = vshrl.u32 %v7641_v15, 16 }
 0x1ca   : > { %6602 = vmatprep.mubr.msk.bf16.mxu0 %vm544_vm1, %v8030_v45 }
 0x1cb   : > { %v2327_v8 = vor.u32 %v2325_v46, %v9503_v54 }
 0x1cd   : > { %v2329_v45 = vsel %vm412_vm6, %v2327_v8, %v2328_v0  ;;  %v8280_v8 = vld [vmem:[%s9459_s3] ss:$0 sm:$0xff] }
 0x1d1   : > { %6603 = vmatmul.mubr.msk.bf16.gmra.mrb[20].mxu0 %vm544_vm1, %v8033_v21  ;;  %v2339_v21 = vor.u32 %v2337_v24, %v2335_v14 }
 0x1d2   : > { %6606 = vmatprep.mubr.msk.bf16.mxu0 %vm544_vm1, %v2326_v26 }
 0x1d6   : > { %v2915_v25 = vpop.permute.xlu1 %2914 }
 0x1d9   : > { %6607 = vmatmul.mubr.msk.bf16.gmra.mrb[24].mxu0 %vm544_vm1, %v2329_v45  ;;  %v8285_v45 = vld [vmem:[%s9460_s4] ss:$0 sm:$0xff] }
 0x1da   : > { %6610 = vmatprep.mubr.msk.bf16.mxu0 %vm544_vm1, %v2336_v50 }
 0x1e1   : > { %6611 = vmatmul.mubr.msk.bf16.gmra.mrb[28].mxu0 %vm544_vm1, %v2339_v21 }
 0x1e2   : > { %6616 = vmatprep.mubr.msk.bf16.mxu0 %vm544_vm1, %v7518_v1  ;;  %v2552_v1 = vrot.slane %v7641_v15, 1  ;;  %v7046_v15 = vld [vmem:[%s9458_s2 + $0x60] sm:$0xff]  }
 0x1e3   : > { %5978 = vmatprep.subr.bf16.mxu1 %v7046_v15 }
 0x1e4   : > { %5979 = vmatpush3.bf16.msra.mxu1 %v7047_v60 }
 0x1e5   : > { %5980 = vmatprep.subr.bf16.mxu1 %v7048_v42 }
 0x1e8   : > { %5981 = vmatpush3.bf16.msra.mxu1 %v7049_v41 }
 0x1e9   : > { %6617 = vmatmul.mubr.msk.bf16.vlgmr.msra.gmra.mrb[0].mxu0 %vm544_vm1, %v7521_v2  ;;  %v2553_v2 = vsel %vm969_vm2, %v7577_v27, %v2552_v1 }
 0x1ea   : > { %6620 = vmatprep.mubr.msk.bf16.mxu0 %vm544_vm1, %v7530_v5  ;;  %v2554_v5 = vrot.slane %v7787_v61, 1 }
 0x1eb   : > { %v2920_v46 = vpop.permute.xlu1 %2919 }
 0x1ef   : > { %v8271_v38 = vpop.permute.xlu1 %2929 }
 0x1f1   : > { %6621 = vmatmul.mubr.msk.bf16.gmra.mrb[4].mxu0 %vm544_vm1, %v7533_v6  ;;  %v2556_v6 = vrot.slane %v8053_v58, 1  ;;  %v7050_v58 = vld [vmem:[%s9458_s2 + $0x70] sm:$0xff]  }
 0x1f2   : > { %6624 = vmatprep.mubr.msk.bf16.mxu0 %vm544_vm1, %v7542_v10  ;;  %v2555_v10 = vsel %vm969_vm2, %v2552_v1, %v2554_v5  ;;  %5982 = vmatprep.subr.bf16.mxu1 %v7050_v58 }
 0x1f3   : > { %5983 = vmatpush3.bf16.msra.mxu1 %v7051_v18 }
 0x1f4   : > { %5984 = vmatprep.subr.bf16.mxu1 %v7052_v7 }
 0x1f7   : > { %5985 = vmatpush3.bf16.msra.mxu1 %v7053_v3 }
 0x1f8   : > { %6058 = vmatprep.subr.bf16.mxu1 %v7056_v62 }
 0x1f9   : > { %6625 = vmatmul.mubr.msk.bf16.gmra.mrb[8].mxu0 %vm544_vm1, %v7545_v12  ;;  %v2557_v12 = vsel %vm969_vm2, %v2554_v5, %v2556_v6 }
 0x1fa   : > { %6628 = vmatprep.mubr.msk.bf16.mxu0 %vm544_vm1, %v7554_v16  ;;  %v2905_v51 = vpop.permute.xlu0 %2904 }
 0x1fe   : > { %v2910_v56 = vpop.permute.xlu0 %2909 }
 0x201   : > { %6629 = vmatmul.mubr.msk.bf16.gmra.mrb[12].mxu0 %vm544_vm1, %v7557_v17 }
 0x202   : > { %6632 = vmatprep.mubr.msk.bf16.mxu0 %vm544_vm1, %v7566_v22  ;;  %v8267_v53 = vpop.permute.xlu0 %2924 }
 0x206   : > { %v8269_v26 = vpop.permute.xlu0 %2934 }
 0x209   : > { %6633 = vmatmul.mubr.msk.bf16.gmra.mrb[16].mxu0 %vm544_vm1, %v7569_v23 }
 0x20a   : > { %6636 = vmatprep.mubr.msk.bf16.mxu0 %vm544_vm1, %v7580_v28  ;;  %v8273_v43 = vpop.permute.xlu0 %2944 }
 0x20e   : > { %v8288_v21 = vpop.permute.xlu0 %2954 }
 0x211   : > { %6637 = vmatmul.mubr.msk.bf16.gmra.mrb[20].mxu0 %vm544_vm1, %v7584_v29  ;;  %v8275_v0 = vpop.permute.xlu1 %2939 }
 0x212   : > { %6640 = vmatprep.mubr.msk.bf16.mxu0 %vm544_vm1, %v2553_v2  ;;  %v8302_v7 = vpop.permute.xlu0 %2964 }
 0x219   : > { %6641 = vmatmul.mubr.msk.bf16.gmra.mrb[24].mxu0 %vm544_vm1, %v2555_v10 }
 0x21a   : > { %6644 = vmatprep.mubr.msk.bf16.mxu0 %vm544_vm1, %v2557_v12 }
 0x221   : > { %6645 = vmatmul.mubr.msk.bf16.gmra.mrb[28].mxu0 %vm544_vm1, %v2556_v6  ;;  %v8292_v6 = vpop.permute.xlu1 %2949 }
 0x22e   : > { %v6346_v16 = vpop.f32.mrb[0].mxu1 }
 0x22f   : > { %v8180_v17 = vpop.f32.mrb[1].mxu1 }
 0x230   : > { %v8182_v22 = vpop.f32.mrb[2].mxu1 }
 0x231   : > { %v8184_v23 = vpop.f32.mrb[3].mxu1 }
 0x236   : > { %v8186_v27 = vpop.f32.mrb[4].mxu1 }
 0x237   : > { %v8188_v28 = vpop.f32.mrb[5].mxu1 }
 0x238   : > { %v8190_v29 = vpop.f32.mrb[6].mxu1 }
 0x239   : > { %v8195_v61 = vpop.f32.mrb[7].mxu1 }
 0x23f   : > { %v8200_v31 = vpop.f32.mrb[8].mxu1 }
 0x240   : > { %v8202_v32 = vpop.f32.mrb[9].mxu1 }
 0x241   : > { %v8207_v52 = vpop.f32.mrb[10].mxu1 }
 0x242   : > { %v8209_v59 = vpop.f32.mrb[11].mxu1 }
 0x247   : > { %v8217_v37 = vpop.f32.mrb[12].mxu1 }
 0x248   : > { %v8222_v55 = vpop.f32.mrb[13].mxu1 }
 0x249   : > { %v8224_v57 = vpop.f32.mrb[14].mxu1 }
 0x24a   : > { %v8226_v36 = vpop.f32.mrb[15].mxu1 }
 0x24f   : > { %v8234_v30 = vpop.f32.mrb[16].mxu1 }
 0x250   : > { %v8236_v13 = vpop.f32.mrb[17].mxu1 }
 0x251   : > { %v8238_v11 = vpop.f32.mrb[18].mxu1 }
 0x252   : > { %v8240_v34 = vpop.f32.mrb[19].mxu1 }
 0x257   : > { %v8245_v19 = vpop.f32.mrb[20].mxu1 }
 0x258   : > { %v8247_v40 = vpop.f32.mrb[21].mxu1 }
 0x259   : > { %v8249_v33 = vpop.f32.mrb[22].mxu1 }
 0x25a   : > { %v8251_v63 = vpop.f32.mrb[23].mxu1 }
 0x261   : > { %v8253_v48 = vpop.f32.mrb[24].mxu1 }
 0x262   : > { %v8255_v39 = vpop.f32.mrb[25].mxu1 }
 0x263   : > { %v8257_v9 = vpop.f32.mrb[26].mxu1 }
 0x264   : > { %v8259_v44 = vpop.f32.mrb[27].mxu1 }
 0x269   : > { %v8261_v4 = vpop.f32.mrb[28].mxu1 }
 0x26a   : > { %v8263_v47 = vpop.f32.mrb[29].mxu1 }
 0x26b   : > { %v6375_v20 = vpop.f32.mrb[30].mxu1 }
 0x26c   : > { %v8265_v35 = vpop.f32.mrb[31].mxu1  ;;  %v8305_v20 = vpop.permute.xlu1 %2959 }
 0x2bc   : > { %v6618_v54 = vpop.f32.mrb[0].mxu0 }
 0x2bd   : > { %v6688_v49 = vadd.f32 %v6618_v54, %v6346_v16  ;;  %v2607_v14 = vpop.f32.mrb[1].mxu0 }
 0x2be   : > { %v6689_v50 = vadd.f32 %v2607_v14, %v8180_v17  ;;  %v6619_v24 = vpop.f32.mrb[2].mxu0 }
 0x2bf   : > { %v2773_v1 = vmul.f32 %v6688_v49, %v8280_v8  ;;  %v6690_v2 = vadd.f32 %v6619_v24, %v8182_v22  ;;  %v2610_v5 = vpop.f32.mrb[3].mxu0 }
 0x2c0   : > { %v2771_v10 = vmul.f32 %v6689_v50, %v8280_v8  ;;  %v6691_v12 = vadd.f32 %v2610_v5, %v8184_v23 }
 0x2c1   : > { %v2811_v16 = vadd.f32 %v8285_v45, %v2773_v1  ;;  %v2774_v15 = vmul.f32 %v6690_v2, %v8280_v8 }
 0x2c2   : > { %v2809_v17 = vadd.f32 %v8285_v45, %v2771_v10  ;;  %v2772_v60 = vmul.f32 %v6691_v12, %v8280_v8 }
 0x2c3   : > { %v2842_v42 = vmax.f32 %v2811_v16, 0.0  ;;  %v2812_v41 = vadd.f32 %v8285_v45, %v2774_v15 }
 0x2c4   : > { %v2840_v58 = vmax.f32 %v2809_v17, 0.0  ;;  %v2810_v22 = vadd.f32 %v8285_v45, %v2772_v60  ;;  %v6622_v18 = vpop.f32.mrb[4].mxu0 }
 0x2c5   : > { %v2843_v3 = vmax.f32 %v2812_v41, 0.0  ;;  %v6692_v23 = vadd.f32 %v6622_v18, %v8186_v27  ;;  %v2623_v62 = vpop.f32.mrb[5].mxu0  ;;  %v3059_v50 = vmul.f32 %v2915_v25, %v2842_v42  ;;  %v8316_v42 = vpop.permute.xlu0 %2974 }
 0x2c6   : > { %v2841_v54 = vmax.f32 %v2810_v22, 0.0  ;;  %v6693_v49 = vadd.f32 %v2623_v62, %v8188_v28  ;;  %v6623_v14 = vpop.f32.mrb[6].mxu0  ;;  %v3057_v10 = vmul.f32 %v2905_v51, %v2840_v58 }
 0x2c7   : > { %v3060_v24 = vmul.f32 %v2920_v46, %v2843_v3  ;;  %v2777_v1 = vmul.f32 %v6692_v23, %v8280_v8  ;;  %v6694_v2 = vadd.f32 %v6623_v14, %v8190_v29  ;;  %v2626_v5 = vpop.f32.mrb[7].mxu0 }
 0x2c8   : > { %v3058_v12 = vmul.f32 %v2910_v56, %v2841_v54  ;;  %v2775_v16 = vmul.f32 %v6693_v49, %v8280_v8  ;;  %v6695_v27 = vadd.f32 %v2626_v5, %v8195_v61  ;;  %v8319_v56 = vpop.permute.xlu1 %2969 }
 0x2c9   : > { %v5736_v15 = vpack.c.bf16 %v3060_v24, %v3059_v50  ;;  %v2815_v17 = vadd.f32 %v8285_v45, %v2777_v1  ;;  %v2778_v60 = vmul.f32 %v6694_v2, %v8280_v8 }
 0x2ca   : > { %v5731_v28 = vpack.c.bf16 %v3058_v12, %v3057_v10  ;;  %v2813_v25 = vadd.f32 %v8285_v45, %v2775_v16  ;;  %v2776_v46 = vmul.f32 %v6695_v27, %v8280_v8  ;;  %v8332_v12 = vpop.permute.xlu0 %2984 }
 0x2cb   : > { %5803 = vst [vmem:[#allocation2 + $0x8] sm:$0xff] %v5736_v15   ;;  %v2846_v29 = vmax.f32 %v2815_v17, 0.0  ;;  %v2816_v51 = vadd.f32 %v8285_v45, %v2778_v60 }
 0x2cc   : > { %5732 = vst [vmem:[#allocation2] sm:$0xff] %v5731_v28   ;;  %v2844_v61 = vmax.f32 %v2813_v25, 0.0  ;;  %v2814_v41 = vadd.f32 %v8285_v45, %v2776_v46  ;;  %v6626_v58 = vpop.f32.mrb[8].mxu0  ;;  %v8336_v16 = vpop.permute.xlu1 %2979 }
 0x2cd   : > { %v2847_v22 = vmax.f32 %v2816_v51, 0.0  ;;  %v6696_v18 = vadd.f32 %v6626_v58, %v8200_v31  ;;  %v2639_v3 = vpop.f32.mrb[9].mxu0  ;;  %v3063_v49 = vmul.f32 %v8269_v26, %v2846_v29 }
 0x2ce   : > { %v2845_v23 = vmax.f32 %v2814_v41, 0.0  ;;  %v6697_v62 = vadd.f32 %v2639_v3, %v8202_v32  ;;  %v6627_v54 = vpop.f32.mrb[10].mxu0  ;;  %v3061_v2 = vmul.f32 %v8267_v53, %v2844_v61 }
 0x2cf   : > { %v3064_v14 = vmul.f32 %v8275_v0, %v2847_v22  ;;  %v2781_v50 = vmul.f32 %v6696_v18, %v8280_v8  ;;  %v6698_v24 = vadd.f32 %v6627_v54, %v8207_v52  ;;  %v2642_v1 = vpop.f32.mrb[11].mxu0 }
 0x2d0   : > { %v3062_v5 = vmul.f32 %v8271_v38, %v2845_v23  ;;  %v2779_v31 = vmul.f32 %v6697_v62, %v8280_v8  ;;  %v6699_v10 = vadd.f32 %v2642_v1, %v8209_v59 }
 0x2d1   : > { %v5746_v32 = vpack.c.bf16 %v3064_v14, %v3063_v49  ;;  %v2819_v26 = vadd.f32 %v8285_v45, %v2781_v50  ;;  %v2782_v0 = vmul.f32 %v6698_v24, %v8280_v8  ;;  %v8358_v50 = vpop.permute.xlu0 %2994 }
 0x2d2   : > { %v5741_v27 = vpack.c.bf16 %v3062_v5, %v3061_v2  ;;  %v2817_v52 = vadd.f32 %v8285_v45, %v2779_v31  ;;  %v2780_v53 = vmul.f32 %v6699_v10, %v8280_v8  ;;  %v3246_v15 = vld [vmem:[#allocation2 + $0x8] sm:$0xf]  ;;  %v8340_v38 = vld [vmem:[#allocation2 + $0xc] sm:$0xf]  ;;  %v8364_v5 = vpop.permute.xlu1 %2989 }
 0x2d3   : > { %5805 = vst [vmem:[#allocation2 + $0x18] sm:$0xff] %v5746_v32   ;;  %v2850_v17 = vmax.f32 %v2819_v26, 0.0  ;;  %v2820_v59 = vadd.f32 %v8285_v45, %v2782_v0  ;;  %v3244_v60 = vld [vmem:[#allocation2] sm:$0xf]  ;;  %v8343_v28 = vld [vmem:[#allocation2 + $0x4] sm:$0xf]  ;;  %v8346_v25 = vcombine.low %v3246_v15, %v8340_v38 }
 0x2d4   : > { %5804 = vst [vmem:[#allocation2 + $0x10] sm:$0xff] %v5741_v27   ;;  %v2848_v46 = vmax.f32 %v2817_v52, 0.0  ;;  %v2818_v29 = vadd.f32 %v8285_v45, %v2780_v53  ;;  %v6630_v51 = vpop.f32.mrb[12].mxu0  ;;  %v8350_v61 = vcombine.low %v3244_v60, %v8343_v28 }
 0x2d5   : > { %v3067_v41 = vmul.f32 %v8288_v21, %v2850_v17  ;;  %v2851_v58 = vmax.f32 %v2820_v59, 0.0  ;;  %v6700_v22 = vadd.f32 %v6630_v51, %v8217_v37  ;;  %v2655_v18 = vpop.f32.mrb[13].mxu0  ;;  %v3387_v3 = vshll.u32 %v8346_v25, 16 }
 0x2d6   : > { %v3065_v23 = vmul.f32 %v8273_v43, %v2848_v46  ;;  %v2849_v62 = vmax.f32 %v2818_v29, 0.0  ;;  %v6701_v54 = vadd.f32 %v2655_v18, %v8222_v55  ;;  %v6631_v49 = vpop.f32.mrb[14].mxu0  ;;  %v3380_v14 = vshrl.u32 %v8350_v61, 16 }
 0x2d7   : > { %v3068_v24 = vmul.f32 %v8305_v20, %v2851_v58  ;;  %v2785_v21 = vmul.f32 %v6700_v22, %v8280_v8  ;;  %v6702_v1 = vadd.f32 %v6631_v49, %v8224_v57  ;;  %v2658_v37 = vpop.f32.mrb[15].mxu0  ;;  %v3382_v2 = vshll.u32 %v8350_v61, 16  ;;  %v7057_v22 = vld [vmem:[%s9458_s2 + $0x80] sm:$0xff]  }
 0x2d8   : > { %v3066_v43 = vmul.f32 %v8292_v6, %v2849_v62  ;;  %v2783_v55 = vmul.f32 %v6701_v54, %v8280_v8  ;;  %v6703_v31 = vadd.f32 %v2658_v37, %v8226_v36  ;;  %v3389_v10 = vrot.slane %v3387_v3, 1 }
 0x2d9   : > { %v5756_v32 = vpack.c.bf16 %v3068_v24, %v3067_v41  ;;  %v2823_v26 = vadd.f32 %v8285_v45, %v2785_v21  ;;  %v2786_v20 = vmul.f32 %v6702_v1, %v8280_v8  ;;  %v3384_v0 = vrot.slane %v3382_v2, 1  ;;  %v7060_v21 = vld [vmem:[%s9458_s2 + $0xc8] sm:$0xff]   ;;  %v3000_v1 = vpop.permute.xlu1 %2999 }
 0x2da   : > { %v5751_v27 = vpack.c.bf16 %v3066_v43, %v3065_v23  ;;  %v2821_v57 = vadd.f32 %v8285_v45, %v2783_v55  ;;  %v2784_v52 = vmul.f32 %v6703_v31, %v8280_v8  ;;  %v3391_v53 = vshrl.u32 %v8346_v25, 16  ;;  %v8374_v15 = vld [vmem:[#allocation2 + $0x18] sm:$0xf]  ;;  %v8376_v6 = vld [vmem:[#allocation2 + $0x1c] sm:$0xf]  ;;  %v8395_v23 = vpop.permute.xlu0 %3004 }
 0x2db   : > { %5807 = vst [vmem:[#allocation2 + $0x28] sm:$0xff] %v5756_v32   ;;  %v2854_v36 = vmax.f32 %v2823_v26, 0.0  ;;  %v2824_v17 = vadd.f32 %v8285_v45, %v2786_v20  ;;  %v3385_v59 = vor.u32 %v3384_v0, %v3380_v14  ;;  %v8379_v60 = vld [vmem:[#allocation2 + $0x10] sm:$0xf]  ;;  %v8381_v46 = vld [vmem:[#allocation2 + $0x14] sm:$0xf]  ;;  %v8385_v29 = vcombine.low %v8374_v15, %v8376_v6 }
 0x2dc   : > { %5806 = vst [vmem:[#allocation2 + $0x20] sm:$0xff] %v5751_v27   ;;  %v2852_v51 = vmax.f32 %v2821_v57, 0.0  ;;  %v2822_v41 = vadd.f32 %v8285_v45, %v2784_v52  ;;  %v6634_v58 = vpop.f32.mrb[16].mxu0  ;;  %v8393_v18 = vcombine.low %v8379_v60, %v8381_v46  ;;  %v3393_v3 = vor.u32 %v3391_v53, %v3389_v10 }
 0x2dd   : > { %v3071_v62 = vmul.f32 %v8316_v42, %v2854_v36  ;;  %v2855_v54 = vmax.f32 %v2824_v17, 0.0  ;;  %v6704_v49 = vadd.f32 %v6634_v58, %v8234_v30  ;;  %v2671_v14 = vpop.f32.mrb[17].mxu0  ;;  %v3390_v24 = vsel %vm412_vm6, %v3385_v59, %v3389_v10 }
 0x2de   : > { %v3069_v37 = vmul.f32 %v8302_v7, %v2852_v51  ;;  %v2853_v2 = vmax.f32 %v2822_v41, 0.0  ;;  %v6705_v43 = vadd.f32 %v2671_v14, %v8236_v13  ;;  %4551 = vmatprep.mubr.bf16.mxu1 %v3390_v24  ;;  %v6635_v55 = vpop.f32.mrb[18].mxu0  ;;  %v3395_v42 = vshll.u32 %v8393_v18, 16  ;;  %v8426_v17 = vpop.permute.xlu0 %3014 }
 0x2df   : > { %v3072_v31 = vmul.f32 %v8336_v16, %v2855_v54  ;;  %v2789_v30 = vmul.f32 %v6704_v49, %v8280_v8  ;;  %v6706_v10 = vadd.f32 %v6635_v55, %v8238_v11  ;;  %4552 = vmatmul.mubr.bf16.vlgmr.msra.gmra.mrb[32].mxu1 %v8350_v61  ;;  %v2674_v32 = vpop.f32.mrb[19].mxu0  ;;  %v3399_v26 = vshrl.u32 %v8393_v18, 16  ;;  %v7061_v16 = vld [vmem:[%s9458_s2 + $0x88] sm:$0xff]   ;;  %v8436_v54 = vpop.permute.xlu1 %3009 }
 0x2e0   : > { %v3070_v7 = vmul.f32 %v8319_v56, %v2853_v2  ;;  %v2787_v20 = vmul.f32 %v6705_v43, %v8280_v8  ;;  %6059 = vmatpush3.bf16.msra.mxu1 %v7057_v22  ;;  %v6707_v13 = vadd.f32 %v2674_v32, %v8240_v34  ;;  %v3397_v0 = vrot.slane %v3395_v42, 1  ;;  %v7063_v56 = vld [vmem:[%s9458_s2 + $0xd0] sm:$0xff]  }
 0x2e1   : > { %v5766_v27 = vpack.c.bf16 %v3072_v31, %v3071_v62  ;;  %v2827_v11 = vadd.f32 %v8285_v45, %v2789_v30  ;;  %v2790_v61 = vmul.f32 %v6706_v10, %v8280_v8  ;;  %v3403_v57 = vshll.u32 %v8385_v29, 16  ;;  %6060 = vmatprep.subr.bf16.mxu1 %v7060_v21  ;;  %v7064_v62 = vld [vmem:[%s9458_s2 + $0x90] sm:$0xff]  }
 0x2e2   : > { %v5761_v52 = vpack.c.bf16 %v3070_v7, %v3069_v37  ;;  %v2825_v34 = vadd.f32 %v8285_v45, %v2787_v20  ;;  %v2788_v53 = vmul.f32 %v6707_v13, %v8280_v8  ;;  %v3398_v36 = vsel %vm412_vm6, %v3393_v3, %v3397_v0  ;;  %v7067_v37 = vld [vmem:[%s9458_s2 + $0xd8] sm:$0xff]  }
 0x2e3   : > { %5809 = vst [vmem:[#allocation2 + $0x38] sm:$0xff] %v5766_v27   ;;  %v2858_v59 = vmax.f32 %v2827_v11, 0.0  ;;  %v2828_v51 = vadd.f32 %v8285_v45, %v2790_v61  ;;  %4559 = vmatprep.mubr.bf16.mxu1 %v3398_v36  ;;  %v3401_v41 = vor.u32 %v3399_v26, %v3397_v0  ;;  %v8429_v58 = vld [vmem:[#allocation2 + $0x20] sm:$0xf]  ;;  %v8431_v22 = vld [vmem:[#allocation2 + $0x24] sm:$0xf] }
 0x2e4   : > { %5808 = vst [vmem:[#allocation2 + $0x30] sm:$0xff] %v5761_v52   ;;  %v2856_v3 = vmax.f32 %v2825_v34, 0.0  ;;  %v2826_v49 = vadd.f32 %v8285_v45, %v2788_v53  ;;  %v6638_v14 = vpop.f32.mrb[20].mxu0  ;;  %v3405_v24 = vrot.slane %v3403_v57, 1  ;;  %6061 = vmatpush3.bf16.msra.mxu1 %v7061_v16  ;;  %v8441_v21 = vcombine.low %v8429_v58, %v8431_v22  ;;  %v3020_v57 = vpop.permute.xlu1 %3019  ;;  %v8473_v36 = vld [vmem:[#allocation2 + $0x2c] sm:$0xf] }
 0x2e5   : > { %v3075_v2 = vmul.f32 %v8358_v50, %v2858_v59  ;;  %v2859_v43 = vmax.f32 %v2828_v51, 0.0  ;;  %v6708_v55 = vadd.f32 %v6638_v14, %v8245_v19  ;;  %v2687_v42 = vpop.f32.mrb[21].mxu0  ;;  %6062 = vmatprep.subr.bf16.mxu1 %v7063_v56  ;;  %v3407_v61 = vshrl.u32 %v8385_v29, 16 }
 0x2e6   : > { %v3073_v31 = vmul.f32 %v8332_v12, %v2856_v3  ;;  %v2857_v30 = vmax.f32 %v2826_v49, 0.0  ;;  %v6709_v10 = vadd.f32 %v2687_v42, %v8247_v40  ;;  %v6639_v32 = vpop.f32.mrb[22].mxu0  ;;  %v3406_v26 = vsel %vm412_vm6, %v3401_v41, %v3405_v24  ;;  %v7068_v40 = vld [vmem:[%s9458_s2 + $0x98] sm:$0xff]  }
 0x2e7   : > { %v3076_v7 = vmul.f32 %v3000_v1, %v2859_v43  ;;  %v2793_v20 = vmul.f32 %v6708_v55, %v8280_v8  ;;  %v6710_v13 = vadd.f32 %v6639_v32, %v8249_v33  ;;  %4560 = vmatmul.mubr.bf16.gmra.mrb[36].mxu1 %v8346_v25  ;;  %v2690_v50 = vpop.f32.mrb[23].mxu0  ;;  %v3411_v19 = vshll.u32 %v8441_v21, 16  ;;  %v8461_v1 = vpop.permute.xlu0 %3024  ;;  %v7071_v55 = vld [vmem:[%s9458_s2 + $0xa0] sm:$0xff]  }
 0x2e8   : > { %v3074_v0 = vmul.f32 %v8364_v5, %v2857_v30  ;;  %v2791_v12 = vmul.f32 %v6709_v10, %v8280_v8  ;;  %v6711_v16 = vadd.f32 %v2690_v50, %v8251_v63  ;;  %4567 = vmatprep.mubr.bf16.mxu1 %v3406_v26  ;;  %6063 = vmatpush3.bf16.msra.mxu1 %v7064_v62  ;;  %v8466_v5 = vld [vmem:[#allocation2 + $0x28] sm:$0xf]  ;;  %v7070_v63 = vld [vmem:[%s9458_s2 + $0xe0] sm:$0xff]   ;;  %v3415_v10 = vshrl.u32 %v8441_v21, 16 }
 0x2e9   : > { %v5776_v33 = vpack.c.bf16 %v3076_v7, %v3075_v2  ;;  %v2831_v27 = vadd.f32 %v8285_v45, %v2793_v20  ;;  %v2794_v11 = vmul.f32 %v6710_v13, %v8280_v8  ;;  %6064 = vmatprep.subr.bf16.mxu1 %v7067_v37  ;;  %v3413_v53 = vrot.slane %v3411_v19, 1 }
 0x2ea   : > { %v5771_v56 = vpack.c.bf16 %v3074_v0, %v3073_v31  ;;  %v2829_v52 = vadd.f32 %v8285_v45, %v2791_v12  ;;  %v2792_v34 = vmul.f32 %v6711_v16, %v8280_v8  ;;  %v3409_v49 = vor.u32 %v3407_v61, %v3405_v24  ;;  %v3030_v0 = vpop.permute.xlu1 %3029  ;;  %v7075_v61 = vld [vmem:[%s9458_s2 + $0xa8] sm:$0xff]  }
 0x2eb   : > { %5811 = vst [vmem:[#allocation2 + $0x48] sm:$0xff] %v5776_v33   ;;  %v2862_v59 = vmax.f32 %v2831_v27, 0.0  ;;  %v2832_v51 = vadd.f32 %v8285_v45, %v2794_v11  ;;  %v8480_v43 = vcombine.low %v8466_v5, %v8473_v36  ;;  %v3035_v32 = vpop.permute.xlu0 %3034  ;;  %v8495_v50 = vld [vmem:[#allocation2 + $0x30] sm:$0xf]  ;;  %v8497_v19 = vld [vmem:[#allocation2 + $0x34] sm:$0xf] }
 0x2ec   : > { %5810 = vst [vmem:[#allocation2 + $0x40] sm:$0xff] %v5771_v56   ;;  %v2860_v41 = vmax.f32 %v2829_v52, 0.0  ;;  %v2830_v62 = vadd.f32 %v8285_v45, %v2792_v34  ;;  %v6642_v3 = vpop.f32.mrb[24].mxu0  ;;  %6065 = vmatpush3.bf16.msra.mxu1 %v7068_v40  ;;  %v3414_v24 = vsel %vm412_vm6, %v3409_v49, %v3413_v53  ;;  %v3417_v34 = vor.u32 %v3415_v10, %v3413_v53 }
 0x2ed   : > { %v2863_v14 = vmax.f32 %v2832_v51, 0.0  ;;  %v6712_v37 = vadd.f32 %v6642_v3, %v8253_v48  ;;  %v2703_v2 = vpop.f32.mrb[25].mxu0  ;;  %6066 = vmatprep.subr.bf16.mxu1 %v7070_v63  ;;  %v7074_v48 = vld [vmem:[%s9458_s2 + $0xe8] sm:$0xff]   ;;  %v3079_v26 = vmul.f32 %v8426_v17, %v2862_v59  ;;  %v3419_v11 = vshll.u32 %v8480_v43, 16 }
 0x2ee   : > { %v2861_v42 = vmax.f32 %v2830_v62, 0.0  ;;  %v6713_v31 = vadd.f32 %v2703_v2, %v8255_v39  ;;  %v6643_v30 = vpop.f32.mrb[26].mxu0  ;;  %v3077_v12 = vmul.f32 %v8395_v23, %v2860_v41  ;;  %v7078_v2 = vld [vmem:[%s9458_s2 + $0xb0] sm:$0xff]  }
 0x2ef   : > { %v3080_v7 = vmul.f32 %v3020_v57, %v2863_v14  ;;  %v2797_v20 = vmul.f32 %v6712_v37, %v8280_v8  ;;  %v6714_v13 = vadd.f32 %v6643_v30, %v8257_v9  ;;  %4568 = vmatmul.mubr.bf16.gmra.mrb[40].mxu1 %v8393_v18  ;;  %v2706_v39 = vpop.f32.mrb[27].mxu0  ;;  %v7077_v57 = vld [vmem:[%s9458_s2 + $0xf0] sm:$0xff]   ;;  %v3045_v62 = vpop.permute.xlu0 %3044  ;;  %v3421_v37 = vrot.slane %v3419_v11, 1 }
 0x2f0   : > { %v3078_v16 = vmul.f32 %v8436_v54, %v2861_v42  ;;  %v2795_v40 = vmul.f32 %v6713_v31, %v8280_v8  ;;  %v6715_v17 = vadd.f32 %v2706_v39, %v8259_v44  ;;  %4575 = vmatprep.mubr.bf16.mxu1 %v3414_v24  ;;  %6067 = vmatpush3.bf16.msra.mxu1 %v7071_v55  ;;  %v3040_v55 = vpop.permute.xlu1 %3039  ;;  %v7081_v24 = vld [vmem:[%s9458_s2 + $0xf8] sm:$0xff]  }
 0x2f1   : > { %v5786_v33 = vpack.c.bf16 %v3080_v7, %v3079_v26  ;;  %v2835_v9 = vadd.f32 %v8285_v45, %v2797_v20  ;;  %v2798_v27 = vmul.f32 %v6714_v13, %v8280_v8  ;;  %v8513_v44 = vcombine.low %v8495_v50, %v8497_v19  ;;  %6068 = vmatprep.subr.bf16.mxu1 %v7074_v48 }
 0x2f2   : > { %v5781_v23 = vpack.c.bf16 %v3078_v16, %v3077_v12  ;;  %v2833_v54 = vadd.f32 %v8285_v45, %v2795_v40  ;;  %v2796_v63 = vmul.f32 %v6715_v17, %v8280_v8  ;;  %v3422_v7 = vsel %vm412_vm6, %v3417_v34, %v3421_v37  ;;  %v7084_v40 = vld [vmem:[%s9458_s2 + $0x140] sm:$0xff]  }
 0x2f3   : > { %5813 = vst [vmem:[#allocation2 + $0x58] sm:$0xff] %v5786_v33   ;;  %v2866_v56 = vmax.f32 %v2835_v9, 0.0  ;;  %v2836_v52 = vadd.f32 %v8285_v45, %v2798_v27  ;;  %v3427_v30 = vshll.u32 %v8513_v44, 16  ;;  %v3258_v33 = vld [vmem:[#allocation2 + $0x38] sm:$0xf]  ;;  %v3423_v27 = vshrl.u32 %v8480_v43, 16 }
 0x2f4   : > { %5812 = vst [vmem:[#allocation2 + $0x50] sm:$0xff] %v5781_v23   ;;  %v2864_v59 = vmax.f32 %v2833_v54, 0.0  ;;  %v2834_v51 = vadd.f32 %v8285_v45, %v2796_v63  ;;  %v6646_v41 = vpop.f32.mrb[28].mxu0  ;;  %6069 = vmatpush3.bf16.msra.mxu1 %v7075_v61  ;;  %v3055_v61 = vpop.permute.xlu0 %3054 }
 0x2f5   : > { %v2867_v3 = vmax.f32 %v2836_v52, 0.0  ;;  %v6716_v49 = vadd.f32 %v6646_v41, %v8261_v4  ;;  %v2719_v14 = vpop.f32.mrb[29].mxu0  ;;  %6070 = vmatprep.subr.bf16.mxu1 %v7077_v57  ;;  %v3083_v4 = vmul.f32 %v3035_v32, %v2866_v56  ;;  %v7082_v32 = vld [vmem:[%s9458_s2 + $0xb8] sm:$0xff]   ;;  %v3429_v11 = vrot.slane %v3427_v30, 1  ;;  %v3050_v34 = vpop.permute.xlu1 %3049  ;;  %v3260_v41 = vld [vmem:[#allocation2 + $0x40] sm:$0xf] }
 0x2f6   : > { %v2865_v42 = vmax.f32 %v2834_v51, 0.0  ;;  %v6717_v53 = vadd.f32 %v2719_v14, %v8263_v47  ;;  %v6647_v31 = vpop.f32.mrb[30].mxu0  ;;  %v3081_v20 = vmul.f32 %v8461_v1, %v2864_v59  ;;  %v3425_v57 = vor.u32 %v3423_v27, %v3421_v37 }
 0x2f7   : > { %v3084_v10 = vmul.f32 %v3040_v55, %v2867_v3  ;;  %v2801_v48 = vmul.f32 %v6716_v49, %v8280_v8  ;;  %4576 = vmatmul.mubr.bf16.gmra.mrb[44].mxu1 %v8385_v29  ;;  %v2722_v26 = vpop.f32.mrb[31].mxu0  ;;  %v3261_v3 = vld [vmem:[#allocation2 + $0x44] sm:$0xf]  ;;  %v3497_v30 = vrot.slane %v8393_v18, 1  ;;  %v7107_v18 = vld [vmem:[%s9458_s2 + $0x130] sm:$0xff]  }
 0x2f8   : > { %v3082_v47 = vmul.f32 %v3030_v0, %v2865_v42  ;;  %v2799_v13 = vmul.f32 %v6717_v53, %v8280_v8  ;;  %v6718_v39 = vadd.f32 %v2722_v26, %v8265_v35  ;;  %4583 = vmatprep.mubr.bf16.mxu1 %v3422_v7  ;;  %6071 = vmatpush3.bf16.msra.mxu1 %v7078_v2  ;;  %v3259_v35 = vld [vmem:[#allocation2 + $0x3c] sm:$0xf]  ;;  %v3263_v7 = vld [vmem:[#allocation2 + $0x4c] sm:$0xf] }
 0x2f9   : > { %v5796_v12 = vpack.c.bf16 %v3084_v10, %v3083_v4  ;;  %v2839_v16 = vadd.f32 %v8285_v45, %v2801_v48  ;;  %6072 = vmatprep.subr.bf16.mxu1 %v7081_v24  ;;  %v8546_v56 = vcombine.low %v3258_v33, %v3259_v35  ;;  %v3430_v51 = vsel %vm412_vm6, %v3425_v57, %v3429_v11  ;;  %v3262_v10 = vld [vmem:[#allocation2 + $0x48] sm:$0xf] }
 0x2fa   : > { %v5791_v17 = vpack.c.bf16 %v3082_v47, %v3081_v20  ;;  %v2837_v1 = vadd.f32 %v8285_v45, %v2799_v13  ;;  %v2800_v0 = vmul.f32 %v6718_v39, %v8280_v8  ;;  %v3269_v8 = vld [vmem:[#allocation2] sm:$0xe]  ;;  %v8554_v2 = vcombine.low %v8340_v38, %v8379_v60 }
 0x2fb   : > { %5815 = vst [vmem:[#allocation2 + $0x68] sm:$0xff] %v5796_v12   ;;  %v2870_v9 = vmax.f32 %v2839_v16, 0.0  ;;  %v3435_v37 = vshll.u32 %v8546_v56, 16  ;;  %v5588_v55 = vcombine.low %v3269_v8, %v8343_v28  ;;  %v8559_v42 = vcombine.low %v8381_v46, %v8374_v15  ;;  %v3274_v16 = vld [vmem:[#allocation2 + $0xc] sm:$0xe] }
 0x2fc   : > { %5814 = vst [vmem:[#allocation2 + $0x60] sm:$0xff] %v5791_v17   ;;  %v2868_v23 = vmax.f32 %v2837_v1, 0.0  ;;  %v2838_v54 = vadd.f32 %v8285_v45, %v2800_v0  ;;  %6073 = vmatpush3.bf16.msra.mxu1 %v7082_v32  ;;  %v3431_v45 = vshrl.u32 %v8513_v44, 16  ;;  %v8561_v31 = vcombine.low %v3260_v41, %v3261_v3 }
 0x2fd   : > { %v3087_v63 = vmul.f32 %v3055_v61, %v2870_v9  ;;  %6146 = vmatprep.subr.bf16.mxu1 %v7084_v40  ;;  %v8567_v4 = vcombine.low %v8376_v6, %v8429_v58  ;;  %v8571_v38 = vcombine.low %v8431_v22, %v8466_v5  ;;  %v8575_v28 = vcombine.low %v8473_v36, %v8495_v50  ;;  %v3265_v36 = vld [vmem:[#allocation2 + $0x54] sm:$0xf]  ;;  %v3266_v50 = vld [vmem:[#allocation2 + $0x58] sm:$0xf] }
 0x2fe   : > { %v2869_v52 = vmax.f32 %v2838_v54, 0.0  ;;  %v3085_v49 = vmul.f32 %v3045_v62, %v2868_v23  ;;  %v3495_v62 = vrot.slane %v8346_v25, 1  ;;  %v3433_v24 = vor.u32 %v3431_v45, %v3429_v11  ;;  %v3264_v25 = vld [vmem:[#allocation2 + $0x50] sm:$0xf] }
 0x2ff   : > { %v5727_v59 = vpack.c.bf16 %v3087_v63, %v3087_v63  ;;  %4584 = vmatmul.mubr.bf16.gmra.mrb[48].mxu1 %v8441_v21  ;;  %v3494_v15 = vrot.slane %v5588_v55, 1  ;;  %v3437_v46 = vrot.slane %v3435_v37, 1  ;;  %v3443_v6 = vshll.u32 %v8561_v31, 16  ;;  %v8636_v55 = vld [vmem:[#allocation2 + $0x5c] sm:$0xf] }
 0x300   : > { %v3086_v14 = vmul.f32 %v3050_v34, %v2869_v52  ;;  %4591 = vmatprep.mubr.bf16.mxu1 %v3430_v51  ;;  %v8580_v48 = vsel %vm969_vm2, %v3495_v62, %v3497_v30  ;;  %v3567_v58 = vshll.u32 %v8554_v2, 16  ;;  %v8590_v26 = vcombine.low %v8497_v19, %v3258_v33 }
 0x301   : > { %3243 = vst [vmem:[#allocation2 + $0x78] sm:$0xf] %v5727_v59  ;;  %v8585_v22 = vsel %vm969_vm2, %v3494_v15, %v3495_v62  ;;  %v3438_v5 = vsel %vm412_vm6, %v3433_v24, %v3437_v46  ;;  %v8592_v20 = vcombine.low %v3259_v35, %v3260_v41  ;;  %v8594_v47 = vcombine.low %v3261_v3, %v3262_v10 }
 0x302   : > { %v5801_v53 = vpack.c.bf16 %v3086_v14, %v3085_v49  ;;  %v8596_v13 = vcombine.low %v3263_v7, %v3264_v25  ;;  %v3569_v39 = vrot.slane %v3567_v58, 1  ;;  %v8598_v12 = vcombine.low %v3265_v36, %v3266_v50 }
 0x303   : > { %v3439_v32 = vshrl.u32 %v8546_v56, 16  ;;  %v3445_v40 = vrot.slane %v3443_v6, 1  ;;  %v3565_v17 = vshrl.u32 %v8554_v2, 16  ;;  %v5602_v19 = vcombine.low %v3274_v16, %v8379_v60  ;;  %v8646_v58 = vld [vmem:[#allocation2 + $0x60] ss:$0 sps:$4 sm:$0x11]  }
 0x304   : > { %5816 = vst [vmem:[#allocation2 + $0x70] sm:$0xff] %v5801_v53   ;;  %v8603_v0 = vcombine.low %v3262_v10, %v3263_v7  ;;  %v3680_v33 = vrot.slane %v8559_v42, 1  ;;  %v3572_v27 = vshll.u32 %v8559_v42, 16  ;;  %v3682_v11 = vrot.slane %v8567_v4, 1  ;;  %v8651_v7 = vld [vmem:[#allocation2 + $0x60] sm:$0xf] }
 0x305   : > { %v3441_v1 = vor.u32 %v3439_v32, %v3437_v46  ;;  %v3679_v35 = vrot.slane %v5602_v19, 1  ;;  %v3570_v9 = vor.u32 %v3569_v39, %v3565_v17  ;;  %v3580_v23 = vshll.u32 %v8567_v4, 16  ;;  %v8653_v39 = vld [vmem:[#allocation2 + $0x64] sm:$0xf]  ;;  %v8656_v17 = vld [vmem:[#allocation2 + $0x1c] sm:$0xf] }
 0x306   : > { %v3574_v54 = vrot.slane %v3572_v27, 1  ;;  %v8617_v63 = vsel %vm969_vm2, %v3680_v33, %v3682_v11  ;;  %v3576_v57 = vshrl.u32 %v8559_v42, 16  ;;  %v3447_v52 = vshrl.u32 %v8561_v31, 16  ;;  %v8666_v27 = vld [vmem:[#allocation2 + $0x30] sm:$0xff]  }
 0x307   : > { %4592 = vmatmul.mubr.bf16.gmra.mrb[52].mxu1 %v8480_v43  ;;  %v3446_v61 = vsel %vm412_vm6, %v3441_v1, %v3445_v40  ;;  %v8612_v60 = vsel %vm969_vm2, %v3679_v35, %v3680_v33  ;;  %v3451_v8 = vshll.u32 %v8603_v0, 16  ;;  %v8622_v34 = vrot.slane %v3580_v23, 1  ;;  %v8660_v1 = vld [vmem:[#allocation2 + $0x20] sm:$0xff]   ;;  %v8662_v33 = vld [vmem:[#allocation2 + $0x28] sm:$0xff]   ;;  %v3303_v35 = vld [vmem:[#allocation2 + $0x18] sm:$0xe] }
 0x308   : > { %4599 = vmatprep.mubr.bf16.mxu1 %v3438_v5  ;;  %v8625_v59 = vsel %vm412_vm6, %v3570_v9, %v3574_v54  ;;  %v3578_v51 = vor.u32 %v3576_v57, %v3574_v54  ;;  %v3449_v41 = vor.u32 %v3447_v52, %v3445_v40  ;;  %v8627_v3 = vcombine.low %v3264_v25, %v3265_v36  ;;  %v8670_v23 = vld [vmem:[#allocation2 + $0x40] sm:$0xff]   ;;  %v8672_v54 = vld [vmem:[#allocation2 + $0x48] sm:$0xff]   ;;  %v8674_v57 = vld [vmem:[#allocation2 + $0x50] sm:$0xff]  }
 0x309   : > { %v3453_v14 = vrot.slane %v3451_v8, 1  ;;  %v3455_v53 = vshrl.u32 %v8603_v0, 16  ;;  %v8640_v15 = vcombine.low %v3266_v50, %v8636_v55  ;;  %v3475_v50 = vshll.u32 %v8646_v58, 16  ;;  %v8677_v8 = vld [vmem:[#allocation2 + $0x58] sm:$0xff]  }
 0x30a   : > { %v8631_v49 = vsel %vm412_vm6, %v3578_v51, %v8622_v34  ;;  %v3459_v37 = vshll.u32 %v8627_v3, 16  ;;  %v3463_v10 = vshrl.u32 %v8627_v3, 16  ;;  %v5619_v52 = vcombine.low %v3303_v35, %v8656_v17 }
 0x30b   : > { %v3454_v45 = vsel %vm412_vm6, %v3449_v41, %v3453_v14  ;;  %v3457_v24 = vor.u32 %v3455_v53, %v3453_v14  ;;  %v3467_v25 = vshll.u32 %v8640_v15, 16  ;;  %v3471_v16 = vshrl.u32 %v8640_v15, 16  ;;  %v8681_v14 = vld [vmem:[#allocation2 + $0x60] sm:$0xff]  }
 0x30c   : > { %v3461_v62 = vrot.slane %v3459_v37, 1  ;;  %v3477_v32 = vrot.slane %v3475_v50, 1  ;;  %v3907_v51 = vrot.slane %v8660_v1, 1  ;;  %v3909_v41 = vrot.slane %v8662_v33, 1 }
 0x30d   : > { %v3469_v5 = vrot.slane %v3467_v25, 1  ;;  %v3906_v37 = vrot.slane %v5619_v52, 1  ;;  %v3911_v53 = vrot.slane %v8666_v27, 1  ;;  %v3923_v35 = vrot.slane %v8681_v14, 1 }
 0x30e   : > { %v3462_v46 = vsel %vm412_vm6, %v3457_v24, %v3461_v62  ;;  %v3465_v6 = vor.u32 %v3463_v10, %v3461_v62  ;;  %v8687_v62 = vsel %vm969_vm2, %v3907_v51, %v3909_v41  ;;  %v3917_v10 = vrot.slane %v8672_v54, 1 }
 0x30f   : > { %4600 = vmatmul.mubr.bf16.gmra.mrb[56].mxu1 %v8513_v44  ;;  %v3473_v40 = vor.u32 %v3471_v16, %v3469_v5  ;;  %v8693_v25 = vsel %vm969_vm2, %v3906_v37, %v3907_v51  ;;  %v7086_v37 = vld [vmem:[%s9458_s2 + $0x100] sm:$0xff]  }
 0x310   : > { %4607 = vmatprep.mubr.bf16.mxu1 %v3446_v61  ;;  %v3470_v36 = vsel %vm412_vm6, %v3465_v6, %v3469_v5  ;;  %v8668_v61 = vld [vmem:[#allocation2 + $0x38] sm:$0xff]   ;;  %v8696_v6 = vsel %vm969_vm2, %v3909_v41, %v3911_v53  ;;  %v3919_v5 = vrot.slane %v8674_v57, 1 }
 0x311   : > { %v3478_v9 = vsel %vm412_vm6, %v3473_v40, %v3477_v32  ;;  %v3913_v24 = vrot.slane %v8668_v61, 1  ;;  %9504 = vst [vmem:[#allocation9_spill] sm:$0xff] %v8696_v6  ;;  %v3921_v32 = vrot.slane %v8677_v8, 1 }
 0x312   : > { %v8711_v40 = vsel %vm969_vm2, %v3917_v10, %v3919_v5 }
 0x313   : > { %9508 = vst [vmem:[#allocation13_spill] sm:$0xff] %v8711_v40  ;;  %v8717_v52 = vsel %vm969_vm2, %v3919_v5, %v3921_v32  ;;  %v8720_v51 = vsel %vm969_vm2, %v3921_v32, %v3923_v35  ;;  %v3499_v5 = vrot.slane %v8385_v29, 1  ;;  %v7100_v32 = vld [vmem:[%s9458_s2 + $0x120] sm:$0xff]  }
 0x314   : > { %9509 = vst [vmem:[#allocation14_spill] sm:$0xff] %v8717_v52  ;;  %9510 = vst [vmem:[#allocation15_spill] sm:$0xff] %v8720_v51 }
 0x317   : > { %4608 = vmatmul.mubr.bf16.gmra.mrb[60].mxu1 %v8546_v56 }
 0x318   : > { %4615 = vmatprep.mubr.bf16.mxu1 %v3454_v45  ;;  %v8683_v45 = vld [vmem:[#allocation2 + $0x68] sm:$0xff]  }
 0x31f   : > { %4616 = vmatmul.mubr.bf16.gmra.mrb[64].mxu1 %v8561_v31 }
 0x320   : > { %4623 = vmatprep.mubr.bf16.mxu1 %v3462_v46  ;;  %v3915_v46 = vrot.slane %v8670_v23, 1 }
 0x322   : > { %v8703_v50 = vsel %vm969_vm2, %v3913_v24, %v3915_v46  ;;  %v8706_v16 = vsel %vm969_vm2, %v3915_v46, %v3917_v10  ;;  %v7093_v46 = vld [vmem:[%s9458_s2 + $0x110] sm:$0xff]   ;;  %v7099_v10 = vld [vmem:[%s9458_s2 + $0x160] sm:$0xff]  }
 0x323   : > { %9506 = vst [vmem:[#allocation11_spill] sm:$0xff] %v8703_v50  ;;  %9507 = vst [vmem:[#allocation12_spill] sm:$0xff] %v8706_v16 }
 0x327   : > { %4624 = vmatmul.mubr.bf16.gmra.mrb[68].mxu1 %v8603_v0 }
 0x328   : > { %4631 = vmatprep.mubr.bf16.mxu1 %v3470_v36  ;;  %v8700_v36 = vsel %vm969_vm2, %v3911_v53, %v3913_v24  ;;  %v7089_v53 = vld [vmem:[%s9458_s2 + $0x148] sm:$0xff]   ;;  %v7092_v24 = vld [vmem:[%s9458_s2 + $0x150] sm:$0xff]  }
 0x329   : > { %9505 = vst [vmem:[#allocation10_spill] sm:$0xff] %v8700_v36 }
 0x32f   : > { %4632 = vmatmul.mubr.bf16.gmra.mrb[72].mxu1 %v8627_v3 }
 0x330   : > { %4639 = vmatprep.mubr.bf16.mxu1 %v3478_v9  ;;  %v9483_v9 = vrot.slane %v8683_v45, 1 }
 0x332   : > { %v8725_v41 = vsel %vm969_vm2, %v3923_v35, %v9483_v9  ;;  %v3500_v35 = vsel %vm969_vm2, %v3497_v30, %v3499_v5  ;;  %v7110_v30 = vld [vmem:[%s9458_s2 + $0x178] sm:$0xff]  }
 0x333   : > { %9511 = vst [vmem:[#allocation16_spill] sm:$0xff] %v8725_v41 }
 0x337   : > { %4640 = vmatmul.mubr.bf16.gmra.mrb[76].mxu1 %v8640_v15 }
 0x338   : > { %4680 = vmatprep.mubr.bf16.mxu1 %v8554_v2  ;;  %v7090_v2 = vld [vmem:[%s9458_s2 + $0x108] sm:$0xff]  }
 0x33f   : > { %4681 = vmatmul.mubr.bf16.vlgmr.msra.gmra.mrb[80].mxu1 %v8585_v22  ;;  %v7096_v22 = vld [vmem:[%s9458_s2 + $0x158] sm:$0xff]  }
 0x340   : > { %6147 = vmatpush3.bf16.msra.mxu1 %v7086_v37  ;;  %4688 = vmatprep.mubr.bf16.mxu1 %v8559_v42  ;;  %v7097_v42 = vld [vmem:[%s9458_s2 + $0x118] sm:$0xff]   ;;  %v7104_v37 = vld [vmem:[%s9458_s2 + $0x128] sm:$0xff]  }
 0x341   : > { %6148 = vmatprep.subr.bf16.mxu1 %v7089_v53  ;;  %v7106_v53 = vld [vmem:[%s9458_s2 + $0x170] sm:$0xff]  }
 0x344   : > { %6149 = vmatpush3.bf16.msra.mxu1 %v7090_v2  ;;  %v3501_v2 = vrot.slane %v8441_v21, 1 }
 0x345   : > { %6150 = vmatprep.subr.bf16.mxu1 %v7092_v24 }
 0x346   : > { %v3502_v24 = vsel %vm969_vm2, %v3499_v5, %v3501_v2  ;;  %v3505_v5 = vrot.slane %v8513_v44, 1 }
 0x347   : > { %4689 = vmatmul.mubr.bf16.gmra.mrb[84].mxu1 %v8580_v48  ;;  %v7103_v48 = vld [vmem:[%s9458_s2 + $0x168] sm:$0xff]  }
 0x348   : > { %4696 = vmatprep.mubr.bf16.mxu1 %v8567_v4  ;;  %6151 = vmatpush3.bf16.msra.mxu1 %v7093_v46  ;;  %v7111_v46 = vld [vmem:[%s9458_s2 + $0x138] sm:$0xff]  }
 0x349   : > { %6152 = vmatprep.subr.bf16.mxu1 %v7096_v22  ;;  %v7113_v22 = vld [vmem:[%s9458_s2 + $0x1c0] sm:$0xff]  }
 0x34c   : > { %6153 = vmatpush3.bf16.msra.mxu1 %v7097_v42  ;;  %v3503_v42 = vrot.slane %v8480_v43, 1 }
 0x34d   : > { %6154 = vmatprep.subr.bf16.mxu1 %v7099_v10 }
 0x34e   : > { %v3504_v10 = vsel %vm969_vm2, %v3501_v2, %v3503_v42  ;;  %v3511_v2 = vrot.slane %v8603_v0, 1 }
 0x34f   : > { %4697 = vmatmul.mubr.bf16.gmra.mrb[88].mxu1 %v3500_v35 }
 0x350   : > { %4704 = vmatprep.mubr.bf16.mxu1 %v8571_v38  ;;  %6155 = vmatpush3.bf16.msra.mxu1 %v7100_v32  ;;  %v3506_v32 = vsel %vm969_vm2, %v3503_v42, %v3505_v5  ;;  %v8810_v42 = vld [vmem:[#allocation2 + $0x68] sm:$0xf] }
 0x351   : > { %6156 = vmatprep.subr.bf16.mxu1 %v7103_v48  ;;  %v3507_v48 = vrot.slane %v8546_v56, 1 }
 0x353   : > { %v3508_v35 = vsel %vm969_vm2, %v3505_v5, %v3507_v48  ;;  %v8815_v5 = vcombine.low %v8653_v39, %v8810_v42 }
 0x354   : > { %6157 = vmatpush3.bf16.msra.mxu1 %v7104_v37  ;;  %v3509_v37 = vrot.slane %v8561_v31, 1 }
 0x355   : > { %6158 = vmatprep.subr.bf16.mxu1 %v7106_v53 }
 0x356   : > { %v3510_v53 = vsel %vm969_vm2, %v3507_v48, %v3509_v37  ;;  %v7114_v48 = vld [vmem:[%s9458_s2 + $0x180] sm:$0xff]  }
 0x357   : > { %4705 = vmatmul.mubr.bf16.gmra.mrb[92].mxu1 %v3502_v24 }
 0x358   : > { %4712 = vmatprep.mubr.bf16.mxu1 %v8575_v28  ;;  %6159 = vmatpush3.bf16.msra.mxu1 %v7107_v18  ;;  %v3512_v18 = vsel %vm969_vm2, %v3509_v37, %v3511_v2  ;;  %v3684_v37 = vrot.slane %v8571_v38, 1 }
 0x359   : > { %6160 = vmatprep.subr.bf16.mxu1 %v7110_v30  ;;  %v3513_v30 = vrot.slane %v8627_v3, 1 }
 0x35b   : > { %v3514_v24 = vsel %vm969_vm2, %v3511_v2, %v3513_v30  ;;  %v3584_v2 = vshrl.u32 %v8567_v4, 16  ;;  %v7122_v4 = vld [vmem:[%s9458_s2 + $0x1a0] sm:$0xff]  }
 0x35c   : > { %6161 = vmatpush3.bf16.msra.mxu1 %v7111_v46  ;;  %v8806_v46 = vcombine.low %v8636_v55, %v8651_v7 }
 0x35d   : > { %6234 = vmatprep.subr.bf16.mxu1 %v7113_v22  ;;  %v3515_v22 = vrot.slane %v8640_v15, 1 }
 0x35f   : > { %4713 = vmatmul.mubr.bf16.gmra.mrb[96].mxu1 %v3504_v10  ;;  %v3516_v10 = vsel %vm969_vm2, %v3513_v30, %v3515_v22  ;;  %v7120_v30 = vld [vmem:[%s9458_s2 + $0x198] sm:$0xff]  }
 0x360   : > { %4720 = vmatprep.mubr.bf16.mxu1 %v8590_v26 }
 0x367   : > { %4721 = vmatmul.mubr.bf16.gmra.mrb[100].mxu1 %v3506_v32  ;;  %v3517_v32 = vrot.slane %v8646_v58, 1  ;;  %v7116_v58 = vld [vmem:[%s9458_s2 + $0x188] sm:$0xff]  }
 0x368   : > { %4728 = vmatprep.mubr.bf16.mxu1 %v8592_v20 }
 0x369   : > { %v3518_v55 = vsel %vm969_vm2, %v3515_v22, %v3517_v32  ;;  %v3686_v22 = vrot.slane %v8575_v28, 1 }
 0x36f   : > { %4729 = vmatmul.mubr.bf16.gmra.mrb[104].mxu1 %v3508_v35  ;;  %v7115_v35 = vld [vmem:[%s9458_s2 + $0x1c8] sm:$0xff]  }
 0x370   : > { %4736 = vmatprep.mubr.bf16.mxu1 %v8594_v47 }
 0x377   : > { %4737 = vmatmul.mubr.bf16.gmra.mrb[108].mxu1 %v3510_v53  ;;  %v7118_v53 = vld [vmem:[%s9458_s2 + $0x190] sm:$0xff]  }
 0x378   : > { %4744 = vmatprep.mubr.bf16.mxu1 %v8596_v13 }
 0x37f   : > { %4745 = vmatmul.mubr.bf16.gmra.mrb[112].mxu1 %v3512_v18  ;;  %v3588_v18 = vshll.u32 %v8571_v38, 16 }
 0x380   : > { %4752 = vmatprep.mubr.bf16.mxu1 %v8598_v12 }
 0x387   : > { %4753 = vmatmul.mubr.bf16.gmra.mrb[116].mxu1 %v3514_v24  ;;  %v7121_v24 = vld [vmem:[%s9458_s2 + $0x1e0] sm:$0xff]  }
 0x388   : > { %4760 = vmatprep.mubr.bf16.mxu1 %v8806_v46 }
 0x38f   : > { %4761 = vmatmul.mubr.bf16.gmra.mrb[120].mxu1 %v3516_v10  ;;  %v7123_v10 = vld [vmem:[%s9458_s2 + $0x1e8] sm:$0xff]  }
 0x390   : > { %4768 = vmatprep.mubr.bf16.mxu1 %v8815_v5 }
 0x397   : > { %4769 = vmatmul.mubr.bf16.gmra.mrb[124].mxu1 %v3518_v55  ;;  %v3596_v55 = vshll.u32 %v8575_v28, 16 }
 0x398   : > { %4809 = vmatprep.mubr.bf16.mxu1 %v8612_v60  ;;  %v7117_v60 = vld [vmem:[%s9458_s2 + $0x1d0] sm:$0xff]  }
 0x39f   : > { %4810 = vmatmul.mubr.bf16.vlgmr.msra.gmra.mrb[128].mxu1 %v8625_v59  ;;  %v3685_v59 = vsel %vm969_vm2, %v3682_v11, %v3684_v37  ;;  %v3590_v11 = vrot.slane %v3588_v18, 1 }
 0x3a0   : > { %6235 = vmatpush3.bf16.msra.mxu1 %v7114_v48  ;;  %4817 = vmatprep.mubr.bf16.mxu1 %v8617_v63  ;;  %v7119_v63 = vld [vmem:[%s9458_s2 + $0x1d8] sm:$0xff]   ;;  %v7124_v48 = vld [vmem:[%s9458_s2 + $0x1a8] sm:$0xff]  }
 0x3a1   : > { %6236 = vmatprep.subr.bf16.mxu1 %v7115_v35  ;;  %v7125_v35 = vld [vmem:[%s9458_s2 + $0x1f0] sm:$0xff]  }
 0x3a4   : > { %6237 = vmatpush3.bf16.msra.mxu1 %v7116_v58 }
 0x3a5   : > { %6238 = vmatprep.subr.bf16.mxu1 %v7117_v60  ;;  %v3592_v60 = vshrl.u32 %v8571_v38, 16 }
 0x3a7   : > { %4818 = vmatmul.mubr.bf16.gmra.mrb[132].mxu1 %v8631_v49  ;;  %v3586_v49 = vor.u32 %v3584_v2, %v8622_v34  ;;  %v3687_v34 = vsel %vm969_vm2, %v3684_v37, %v3686_v22  ;;  %v3594_v18 = vor.u32 %v3592_v60, %v3590_v11 }
 0x3a8   : > { %4825 = vmatprep.mubr.bf16.mxu1 %v3685_v59  ;;  %6239 = vmatpush3.bf16.msra.mxu1 %v7118_v53  ;;  %v3598_v53 = vrot.slane %v3596_v55, 1  ;;  %v3688_v59 = vrot.slane %v8590_v26, 1  ;;  %v7129_v55 = vld [vmem:[%s9458_s2 + $0x1b8] sm:$0xff]  }
 0x3a9   : > { %6240 = vmatprep.subr.bf16.mxu1 %v7119_v63  ;;  %v3591_v32 = vsel %vm412_vm6, %v3586_v49, %v3590_v11  ;;  %v7128_v49 = vld [vmem:[%s9458_s2 + $0x1f8] sm:$0xff]   ;;  %v3600_v11 = vshrl.u32 %v8575_v28, 16 }
 0x3ac   : > { %6241 = vmatpush3.bf16.msra.mxu1 %v7120_v30  ;;  %v7126_v30 = vld [vmem:[%s9458_s2 + $0x1b0] sm:$0xff]  }
 0x3ad   : > { %6242 = vmatprep.subr.bf16.mxu1 %v7121_v24 }
 0x3af   : > { %4826 = vmatmul.mubr.bf16.gmra.mrb[136].mxu1 %v3591_v32  ;;  %v3604_v32 = vshll.u32 %v8590_v26, 16 }
 0x3b0   : > { %4833 = vmatprep.mubr.bf16.mxu1 %v3687_v34  ;;  %6243 = vmatpush3.bf16.msra.mxu1 %v7122_v4  ;;  %v3599_v4 = vsel %vm412_vm6, %v3594_v18, %v3598_v53  ;;  %v8893_v34 = vld [vmem:[%s9458_s2 + $0x200] sm:$0xff]  }
 0x3b1   : > { %6244 = vmatprep.subr.bf16.mxu1 %v7123_v10  ;;  %v3689_v10 = vsel %vm969_vm2, %v3686_v22, %v3688_v59  ;;  %v3690_v22 = vrot.slane %v8592_v20, 1 }
 0x3b2   : > { %v5986_v58 = vpop.f32.mrb[32].mxu1 }
 0x3b3   : > { %v5987_v63 = vpop.f32.mrb[33].mxu1 }
 0x3b4   : > { %v8873_v2 = vadd.f32 %v5987_v63, %v5986_v58  ;;  %v5989_v37 = vpop.f32.mrb[34].mxu1  ;;  %6245 = vmatpush3.bf16.msra.mxu1 %v7124_v48  ;;  %v3606_v63 = vrot.slane %v3604_v32, 1  ;;  %v3692_v32 = vrot.slane %v8594_v47, 1 }
 0x3b5   : > { %v5990_v24 = vpop.f32.mrb[35].mxu1  ;;  %6246 = vmatprep.subr.bf16.mxu1 %v7125_v35  ;;  %v3602_v35 = vor.u32 %v3600_v11, %v3598_v53  ;;  %v3691_v53 = vsel %vm969_vm2, %v3688_v59, %v3690_v22 }
 0x3b6   : > { %v8881_v38 = vadd.f32 %v5990_v24, %v5989_v37  ;;  %v3612_v24 = vshll.u32 %v8592_v20, 16  ;;  %v3693_v59 = vsel %vm969_vm2, %v3690_v22, %v3692_v32  ;;  %v3628_v22 = vshll.u32 %v8596_v13, 16 }
 0x3b7   : > { %4834 = vmatmul.mubr.bf16.gmra.mrb[140].mxu1 %v3599_v4  ;;  %v3608_v4 = vshrl.u32 %v8590_v26, 16  ;;  %v3620_v26 = vshll.u32 %v8594_v47, 16 }
 0x3b8   : > { %4841 = vmatprep.mubr.bf16.mxu1 %v3689_v10  ;;  %6247 = vmatpush3.bf16.msra.mxu1 %v7126_v30  ;;  %v3607_v30 = vsel %vm412_vm6, %v3602_v35, %v3606_v63  ;;  %v3614_v10 = vrot.slane %v3612_v24, 1 }
 0x3b9   : > { %6248 = vmatprep.subr.bf16.mxu1 %v7128_v49 }
 0x3ba   : > { %v5992_v48 = vpop.f32.mrb[36].mxu1 }
 0x3bb   : > { %v5993_v58 = vpop.f32.mrb[37].mxu1 }
 0x3bc   : > { %v8896_v60 = vadd.f32 %v5993_v58, %v5992_v48  ;;  %v5995_v28 = vpop.f32.mrb[38].mxu1  ;;  %6249 = vmatpush3.bf16.msra.mxu1 %v7129_v55  ;;  %v3610_v58 = vor.u32 %v3608_v4, %v3606_v63  ;;  %v3622_v4 = vrot.slane %v3620_v26, 1 }
 0x3bd   : > { %v5996_v37 = vpop.f32.mrb[39].mxu1  ;;  %6648 = vmatprep.subr.bf16.mxu1 %v8893_v34 }
 0x3be   : > { %v8899_v18 = vadd.f32 %v5996_v37, %v5995_v28  ;;  %v3615_v35 = vsel %vm412_vm6, %v3610_v58, %v3614_v10 }
 0x3bf   : > { %4842 = vmatmul.mubr.bf16.gmra.mrb[144].mxu1 %v3607_v30  ;;  %v3616_v30 = vshrl.u32 %v8592_v20, 16 }
 0x3c0   : > { %4849 = vmatprep.mubr.bf16.mxu1 %v3691_v53 }
 0x3c1   : > { %v3618_v53 = vor.u32 %v3616_v30, %v3614_v10  ;;  %v3624_v10 = vshrl.u32 %v8594_v47, 16  ;;  %v3636_v47 = vshll.u32 %v8598_v12, 16 }
 0x3c2   : > { %v5998_v49 = vpop.f32.mrb[40].mxu1 }
 0x3c3   : > { %v5999_v11 = vpop.f32.mrb[41].mxu1  ;;  %v3623_v58 = vsel %vm412_vm6, %v3618_v53, %v3622_v4 }
 0x3c4   : > { %v8906_v55 = vadd.f32 %v5999_v11, %v5998_v49  ;;  %v6001_v48 = vpop.f32.mrb[42].mxu1  ;;  %v3694_v49 = vrot.slane %v8596_v13, 1 }
 0x3c5   : > { %v6002_v28 = vpop.f32.mrb[43].mxu1 }
 0x3c6   : > { %v8908_v37 = vadd.f32 %v6002_v28, %v6001_v48  ;;  %v3695_v20 = vsel %vm969_vm2, %v3692_v32, %v3694_v49 }
 0x3c7   : > { %4850 = vmatmul.mubr.bf16.gmra.mrb[148].mxu1 %v3615_v35 }
 0x3c8   : > { %4857 = vmatprep.mubr.bf16.mxu1 %v3693_v59  ;;  %v3630_v59 = vrot.slane %v3628_v22, 1 }
 0x3ca   : > { %v6004_v24 = vpop.f32.mrb[44].mxu1 }
 0x3cb   : > { %v6005_v9 = vpop.f32.mrb[45].mxu1 }
 0x3cc   : > { %v8915_v11 = vadd.f32 %v6005_v9, %v6004_v24  ;;  %v6007_v63 = vpop.f32.mrb[46].mxu1  ;;  %v3696_v9 = vrot.slane %v8598_v12, 1 }
 0x3cd   : > { %v6008_v48 = vpop.f32.mrb[47].mxu1 }
 0x3ce   : > { %v8917_v28 = vadd.f32 %v6008_v48, %v6007_v63  ;;  %v3626_v63 = vor.u32 %v3624_v10, %v3622_v4  ;;  %v3697_v32 = vsel %vm969_vm2, %v3694_v49, %v3696_v9  ;;  %v3638_v10 = vrot.slane %v3636_v47, 1 }
 0x3cf   : > { %4858 = vmatmul.mubr.bf16.gmra.mrb[152].mxu1 %v3623_v58  ;;  %v3632_v58 = vshrl.u32 %v8596_v13, 16  ;;  %v3644_v49 = vshll.u32 %v8806_v46, 16 }
 0x3d0   : > { %4865 = vmatprep.mubr.bf16.mxu1 %v3695_v20  ;;  %v3631_v53 = vsel %vm412_vm6, %v3626_v63, %v3630_v59 }
 0x3d1   : > { %v3634_v20 = vor.u32 %v3632_v58, %v3630_v59  ;;  %v3640_v59 = vshrl.u32 %v8598_v12, 16  ;;  %v3648_v12 = vshrl.u32 %v8806_v46, 16 }
 0x3d2   : > { %v6010_v35 = vpop.f32.mrb[48].mxu1 }
 0x3d3   : > { %v6011_v30 = vpop.f32.mrb[49].mxu1  ;;  %v3639_v63 = vsel %vm412_vm6, %v3634_v20, %v3638_v10 }
 0x3d4   : > { %v8924_v24 = vadd.f32 %v6011_v30, %v6010_v35  ;;  %v6013_v26 = vpop.f32.mrb[50].mxu1  ;;  %v3698_v35 = vrot.slane %v8806_v46, 1 }
 0x3d5   : > { %v6014_v48 = vpop.f32.mrb[51].mxu1 }
 0x3d6   : > { %v8926_v19 = vadd.f32 %v6014_v48, %v6013_v26  ;;  %v3699_v13 = vsel %vm969_vm2, %v3696_v9, %v3698_v35 }
 0x3d7   : > { %4866 = vmatmul.mubr.bf16.gmra.mrb[156].mxu1 %v3631_v53 }
 0x3d8   : > { %4873 = vmatprep.mubr.bf16.mxu1 %v3697_v32  ;;  %v3646_v32 = vrot.slane %v3644_v49, 1  ;;  %v3652_v49 = vshll.u32 %v8815_v5, 16 }
 0x3da   : > { %v6016_v22 = vpop.f32.mrb[52].mxu1  ;;  %v3650_v52 = vor.u32 %v3648_v12, %v3646_v32 }
 0x3db   : > { %v6017_v41 = vpop.f32.mrb[53].mxu1 }
 0x3dc   : > { %v8933_v30 = vadd.f32 %v6017_v41, %v6016_v22  ;;  %v6019_v4 = vpop.f32.mrb[54].mxu1  ;;  %v3700_v41 = vrot.slane %v8815_v5, 1 }
 0x3dd   : > { %v6020_v26 = vpop.f32.mrb[55].mxu1 }
 0x3de   : > { %v8935_v48 = vadd.f32 %v6020_v26, %v6019_v4  ;;  %v3642_v4 = vor.u32 %v3640_v59, %v3638_v10  ;;  %v3701_v9 = vsel %vm969_vm2, %v3698_v35, %v3700_v41 }
 0x3df   : > { %4874 = vmatmul.mubr.bf16.gmra.mrb[160].mxu1 %v3639_v63  ;;  %v3278_v63 = vld [vmem:[#allocation2 + $0x18] sm:$0xf] }
 0x3e0   : > { %4881 = vmatprep.mubr.bf16.mxu1 %v3699_v13  ;;  %v3647_v20 = vsel %vm412_vm6, %v3642_v4, %v3646_v32  ;;  %v7127_v13 = vld [vmem:[#allocation2 + $0x6c] ss:$0 sps:$4 sm:$0x11]  }
 0x3e1   : > { %v3702_v40 = vrot.slane %v7127_v13, 1  ;;  %v3660_v32 = vshll.u32 %v7127_v13, 16  ;;  %v3807_v13 = vshll.u32 %v8662_v33, 16 }
 0x3e2   : > { %v6022_v53 = vpop.f32.mrb[56].mxu1 }
 0x3e3   : > { %v6023_v58 = vpop.f32.mrb[57].mxu1  ;;  %v3703_v46 = vsel %vm969_vm2, %v3700_v41, %v3702_v40  ;;  %v3803_v41 = vshrl.u32 %v8660_v1, 16 }
 0x3e4   : > { %v8942_v22 = vadd.f32 %v6023_v58, %v6022_v53  ;;  %v6025_v47 = vpop.f32.mrb[58].mxu1  ;;  %v5606_v53 = vcombine.low %v3278_v63, %v8656_v17  ;;  %v3656_v17 = vshrl.u32 %v8815_v5, 16 }
 0x3e5   : > { %v6026_v26 = vpop.f32.mrb[59].mxu1 }
 0x3e6   : > { %v8944_v51 = vadd.f32 %v6026_v26, %v6025_v47  ;;  %v3654_v26 = vrot.slane %v3652_v49, 1 }
 0x3e7   : > { %4882 = vmatmul.mubr.bf16.gmra.mrb[164].mxu1 %v3647_v20  ;;  %v3794_v20 = vshll.u32 %v5606_v53, 16 }
 0x3e8   : > { %4889 = vmatprep.mubr.bf16.mxu1 %v3701_v9  ;;  %v3655_v35 = vsel %vm412_vm6, %v3650_v52, %v3654_v26  ;;  %v3799_v9 = vshll.u32 %v8660_v1, 16 }
 0x3e9   : > { %v3796_v63 = vrot.slane %v3794_v20, 1 }
 0x3ea   : > { %v6028_v58 = vpop.f32.mrb[60].mxu1  ;;  %v3801_v50 = vrot.slane %v3799_v9, 1 }
 0x3eb   : > { %v6029_v10 = vpop.f32.mrb[61].mxu1 }
 0x3ec   : > { %v8951_v59 = vadd.f32 %v6029_v10, %v6028_v58  ;;  %v6031_v47 = vpop.f32.mrb[62].mxu1  ;;  %v3658_v58 = vor.u32 %v3656_v17, %v3654_v26  ;;  %v3792_v10 = vshrl.u32 %v5606_v53, 16  ;;  %v3805_v20 = vor.u32 %v3803_v41, %v3801_v50 }
 0x3ed   : > { %v6032_v4 = vpop.f32.mrb[63].mxu1 }
 0x3ee   : > { %v8953_v16 = vadd.f32 %v6032_v4, %v6031_v47  ;;  %v3662_v4 = vrot.slane %v3660_v32, 1  ;;  %v3809_v32 = vrot.slane %v3807_v13, 1  ;;  %v3823_v13 = vshll.u32 %v8668_v61, 16 }
 0x3ef   : > { %4890 = vmatmul.mubr.bf16.gmra.mrb[168].mxu1 %v3655_v35  ;;  %v3797_v35 = vor.u32 %v3796_v63, %v3792_v10  ;;  %v7135_v63 = vld [vmem:[%s9458_s2 + $0x208] sm:$0xff]  }
 0x3f0   : > { %4897 = vmatprep.mubr.bf16.mxu1 %v3703_v46  ;;  %v3663_v40 = vsel %vm412_vm6, %v3658_v58, %v3662_v4  ;;  %v3810_v1 = vsel %vm412_vm6, %v3805_v20, %v3809_v32  ;;  %v3815_v58 = vshll.u32 %v8666_v27, 16 }
 0x3f1   : > { %v3802_v5 = vsel %vm412_vm6, %v3797_v35, %v3801_v50  ;;  %v7137_v50 = vld [vmem:[%s9458_s2 + $0x210] sm:$0xff]  }
 0x3f2   : > { %v6034_v12 = vpop.f32.mrb[64].mxu1  ;;  %v3817_v4 = vrot.slane %v3815_v58, 1 }
 0x3f3   : > { %v6035_v49 = vpop.f32.mrb[65].mxu1 }
 0x3f4   : > { %v8959_v36 = vadd.f32 %v6035_v49, %v6034_v12  ;;  %v6037_v47 = vpop.f32.mrb[66].mxu1 }
 0x3f5   : > { %v6038_v52 = vpop.f32.mrb[67].mxu1 }
 0x3f6   : > { %v8961_v6 = vadd.f32 %v6038_v52, %v6037_v47  ;;  %v3811_v47 = vshrl.u32 %v8662_v33, 16  ;;  %v3819_v33 = vshrl.u32 %v8666_v27, 16  ;;  %v7145_v27 = vld [vmem:[%s9458_s2 + $0x228] sm:$0xff]  }
 0x3f7   : > { %4898 = vmatmul.mubr.bf16.gmra.mrb[172].mxu1 %v3663_v40 }
 0x3f8   : > { %4938 = vmatprep.mubr.bf16.mxu1 %v3802_v5  ;;  %v3813_v40 = vor.u32 %v3811_v47, %v3809_v32 }
 0x3fa   : > { %v6040_v53 = vpop.f32.mrb[68].mxu1  ;;  %v3818_v41 = vsel %vm412_vm6, %v3813_v40, %v3817_v4 }
 0x3fb   : > { %v6041_v26 = vpop.f32.mrb[69].mxu1 }
 0x3fc   : > { %v8967_v46 = vadd.f32 %v6041_v26, %v6040_v53  ;;  %v6043_v9 = vpop.f32.mrb[70].mxu1  ;;  %v7142_v53 = vld [vmem:[%s9458_s2 + $0x220] sm:$0xff]  }
 0x3fd   : > { %v6044_v17 = vpop.f32.mrb[71].mxu1 }
 0x3fe   : > { %v8972_v12 = vadd.f32 %v6044_v17, %v6043_v9  ;;  %v3821_v9 = vor.u32 %v3819_v33, %v3817_v4  ;;  %v3827_v4 = vshrl.u32 %v8668_v61, 16 }
 0x3ff   : > { %4939 = vmatmul.mubr.bf16.vlgmr.msra.gmra.mrb[176].mxu1 %v8385_v29 }
 0x400   : > { %6649 = vmatpush3.bf16.msra.mxu1 %v8893_v34  ;;  %4946 = vmatprep.mubr.bf16.mxu1 %v3810_v1  ;;  %v7140_v34 = vld [vmem:[%s9458_s2 + $0x218] sm:$0xff]  }
 0x401   : > { %6650 = vmatprep.subr.bf16.mxu1 %v7135_v63 }
 0x402   : > { %v6046_v49 = vpop.f32.mrb[72].mxu1 }
 0x403   : > { %v6047_v10 = vpop.f32.mrb[73].mxu1 }
 0x404   : > { %v8982_v52 = vadd.f32 %v6047_v10, %v6046_v49  ;;  %v6049_v29 = vpop.f32.mrb[74].mxu1  ;;  %6651 = vmatpush3.bf16.msra.mxu1 %v7135_v63  ;;  %v3825_v63 = vrot.slane %v3823_v13, 1  ;;  %v7147_v49 = vld [vmem:[%s9458_s2 + $0x230] sm:$0xff]  }
 0x405   : > { %v6050_v35 = vpop.f32.mrb[75].mxu1  ;;  %6652 = vmatprep.subr.bf16.mxu1 %v7137_v50 }
 0x406   : > { %v8987_v5 = vadd.f32 %v6050_v35, %v6049_v29  ;;  %v3826_v58 = vsel %vm412_vm6, %v3821_v9, %v3825_v63 }
 0x407   : > { %4947 = vmatmul.mubr.bf16.gmra.mrb[180].mxu1 %v8441_v21 }
 0x408   : > { %4954 = vmatprep.mubr.bf16.mxu1 %v3818_v41  ;;  %6653 = vmatpush3.bf16.msra.mxu1 %v7137_v50  ;;  %v3831_v50 = vshll.u32 %v8670_v23, 16  ;;  %v7152_v41 = vld [vmem:[%s9458_s2 + $0x238] sm:$0xff]  }
 0x409   : > { %6654 = vmatprep.subr.bf16.mxu1 %v7140_v34 }
 0x40a   : > { %v6052_v26 = vpop.f32.mrb[76].mxu1  ;;  %v3833_v29 = vrot.slane %v3831_v50, 1 }
 0x40b   : > { %v6053_v20 = vpop.f32.mrb[77].mxu1 }
 0x40c   : > { %v8996_v17 = vadd.f32 %v6053_v20, %v6052_v26  ;;  %v6055_v32 = vpop.f32.mrb[78].mxu1  ;;  %6655 = vmatpush3.bf16.msra.mxu1 %v7140_v34  ;;  %v3829_v34 = vor.u32 %v3827_v4, %v3825_v63  ;;  %v3835_v26 = vshrl.u32 %v8670_v23, 16  ;;  %v3839_v20 = vshll.u32 %v8672_v54, 16 }
 0x40d   : > { %v6056_v21 = vpop.f32.mrb[79].mxu1  ;;  %6656 = vmatprep.subr.bf16.mxu1 %v7142_v53  ;;  %v3847_v23 = vshll.u32 %v8674_v57, 16  ;;  %v3843_v4 = vshrl.u32 %v8672_v54, 16  ;;  %v3855_v54 = vshll.u32 %v8677_v8, 16 }
 0x40e   : > { %v9001_v1 = vadd.f32 %v6056_v21, %v6055_v32  ;;  %v3837_v21 = vor.u32 %v3835_v26, %v3833_v29 }
 0x40f   : > { %4955 = vmatmul.mubr.bf16.gmra.mrb[184].mxu1 %v8480_v43 }
 0x410   : > { %4962 = vmatprep.mubr.bf16.mxu1 %v3826_v58  ;;  %6657 = vmatpush3.bf16.msra.mxu1 %v7142_v53  ;;  %v3834_v53 = vsel %vm412_vm6, %v3829_v34, %v3833_v29  ;;  %v3849_v29 = vrot.slane %v3847_v23, 1 }
 0x411   : > { %6658 = vmatprep.subr.bf16.mxu1 %v7145_v27 }
 0x412   : > { %v6074_v10 = vpop.f32.mrb[80].mxu1 }
 0x413   : > { %v6075_v47 = vpop.f32.mrb[81].mxu1 }
 0x414   : > { %v6076_v35 = vadd.f32 %v6075_v47, %v6074_v10  ;;  %v6077_v40 = vpop.f32.mrb[82].mxu1  ;;  %6659 = vmatpush3.bf16.msra.mxu1 %v7145_v27 }
 0x415   : > { %v6078_v43 = vpop.f32.mrb[83].mxu1  ;;  %6660 = vmatprep.subr.bf16.mxu1 %v7147_v49 }
 0x416   : > { %v9014_v33 = vadd.f32 %v6076_v35, %v8873_v2  ;;  %v6079_v13 = vadd.f32 %v6078_v43, %v6077_v40 }
 0x417   : > { %4963 = vmatmul.mubr.bf16.gmra.mrb[188].mxu1 %v8513_v44  ;;  %v3841_v44 = vrot.slane %v3839_v20, 1 }
 0x418   : > { %v9019_v61 = vadd.f32 %v6079_v13, %v8881_v38  ;;  %4970 = vmatprep.mubr.bf16.mxu1 %v3834_v53  ;;  %6661 = vmatpush3.bf16.msra.mxu1 %v7147_v49  ;;  %v3851_v13 = vshrl.u32 %v8674_v57, 16 }
 0x419   : > { %6662 = vmatprep.subr.bf16.mxu1 %v7152_v41  ;;  %v3842_v50 = vsel %vm412_vm6, %v3837_v21, %v3841_v44  ;;  %v3845_v43 = vor.u32 %v3843_v4, %v3841_v44  ;;  %v3857_v21 = vrot.slane %v3855_v54, 1 }
 0x41a   : > { %v6080_v9 = vpop.f32.mrb[84].mxu1  ;;  %v3853_v20 = vor.u32 %v3851_v13, %v3849_v29 }
 0x41b   : > { %v6081_v32 = vpop.f32.mrb[85].mxu1 }
 0x41c   : > { %v6082_v2 = vadd.f32 %v6081_v32, %v6080_v9  ;;  %v6083_v63 = vpop.f32.mrb[86].mxu1  ;;  %6663 = vmatpush3.bf16.msra.mxu1 %v7152_v41  ;;  %v3850_v41 = vsel %vm412_vm6, %v3845_v43, %v3849_v29 }
 0x41d   : > { %v6084_v27 = vpop.f32.mrb[87].mxu1 }
 0x41e   : > { %v9024_v58 = vadd.f32 %v6082_v2, %v8896_v60  ;;  %v6085_v38 = vadd.f32 %v6084_v27, %v6083_v63  ;;  %v3863_v63 = vshll.u32 %v8681_v14, 16 }
 0x41f   : > { %4971 = vmatmul.mubr.bf16.gmra.mrb[192].mxu1 %v8546_v56 }
 0x420   : > { %v9030_v49 = vadd.f32 %v6085_v38, %v8899_v18  ;;  %4978 = vmatprep.mubr.bf16.mxu1 %v3842_v50  ;;  %v3859_v38 = vshrl.u32 %v8677_v8, 16  ;;  %v3865_v50 = vrot.slane %v3863_v63, 1  ;;  %v3871_v8 = vshll.u32 %v8683_v45, 16  ;;  %v9075_v63 = vld [vmem:[#allocation2 + $0x78] ss:$0 sps:$4 sm:$0x11]  }
 0x422   : > { %v6086_v10 = vpop.f32.mrb[88].mxu1  ;;  %v3873_v54 = vrot.slane %v3871_v8, 1 }
 0x423   : > { %v6087_v47 = vpop.f32.mrb[89].mxu1 }
 0x424   : > { %v6088_v35 = vadd.f32 %v6087_v47, %v6086_v10  ;;  %v6089_v40 = vpop.f32.mrb[90].mxu1  ;;  %v3861_v47 = vor.u32 %v3859_v38, %v3857_v21 }
 0x425   : > { %v6090_v60 = vpop.f32.mrb[91].mxu1 }
 0x426   : > { %v9034_v34 = vadd.f32 %v6088_v35, %v8906_v55  ;;  %v6091_v56 = vadd.f32 %v6090_v60, %v6089_v40  ;;  %v3866_v29 = vsel %vm412_vm6, %v3861_v47, %v3865_v50  ;;  %v3867_v35 = vshrl.u32 %v8681_v14, 16 }
 0x427   : > { %4979 = vmatmul.mubr.bf16.gmra.mrb[196].mxu1 %v8561_v31 }
 0x428   : > { %v9039_v18 = vadd.f32 %v6091_v56, %v8908_v37  ;;  %4986 = vmatprep.mubr.bf16.mxu1 %v3850_v41  ;;  %v3858_v37 = vsel %vm412_vm6, %v3853_v20, %v3857_v21  ;;  %v3869_v43 = vor.u32 %v3867_v35, %v3865_v50  ;;  %v9063_v56 = vld [vmem:[#allocation2 + $0x70] sm:$0xff]  }
 0x429   : > { %v3879_v14 = vshll.u32 %v9063_v56, 16  ;;  %v3883_v50 = vshrl.u32 %v9063_v56, 16 }
 0x42a   : > { %v6092_v53 = vpop.f32.mrb[92].mxu1 }
 0x42b   : > { %v6093_v26 = vpop.f32.mrb[93].mxu1 }
 0x42c   : > { %v6094_v9 = vadd.f32 %v6093_v26, %v6092_v53  ;;  %v6095_v32 = vpop.f32.mrb[94].mxu1 }
 0x42d   : > { %v6096_v55 = vpop.f32.mrb[95].mxu1 }
 0x42e   : > { %v9044_v2 = vadd.f32 %v6094_v9, %v8915_v11  ;;  %v6097_v31 = vadd.f32 %v6096_v55, %v6095_v32  ;;  %v3875_v32 = vshrl.u32 %v8683_v45, 16  ;;  %v3881_v55 = vrot.slane %v3879_v14, 1 }
 0x42f   : > { %4987 = vmatmul.mubr.bf16.gmra.mrb[200].mxu1 %v8603_v0 }
 0x430   : > { %v9050_v57 = vadd.f32 %v6097_v31, %v8917_v28  ;;  %4994 = vmatprep.mubr.bf16.mxu1 %v3858_v37  ;;  %v3877_v37 = vor.u32 %v3875_v32, %v3873_v54 }
 0x432   : > { %v6098_v27 = vpop.f32.mrb[96].mxu1 }
 0x433   : > { %v6099_v44 = vpop.f32.mrb[97].mxu1 }
 0x434   : > { %v6100_v23 = vadd.f32 %v6099_v44, %v6098_v27  ;;  %v6101_v10 = vpop.f32.mrb[98].mxu1  ;;  %v3882_v44 = vsel %vm412_vm6, %v3877_v37, %v3881_v55 }
 0x435   : > { %v6102_v11 = vpop.f32.mrb[99].mxu1 }
 0x436   : > { %v9054_v4 = vadd.f32 %v6100_v23, %v8924_v24  ;;  %v6103_v0 = vadd.f32 %v6102_v11, %v6101_v10  ;;  %v3887_v23 = vshll.u32 %v9075_v63, 16  ;;  %v3275_v11 = vld [vmem:[#allocation2 + $0x6c] sm:$0xf] }
 0x437   : > { %4995 = vmatmul.mubr.bf16.gmra.mrb[204].mxu1 %v8627_v3 }
 0x438   : > { %v9059_v28 = vadd.f32 %v6103_v0, %v8926_v19  ;;  %5002 = vmatprep.mubr.bf16.mxu1 %v3866_v29  ;;  %v3874_v19 = vsel %vm412_vm6, %v3869_v43, %v3873_v54 }
 0x43a   : > { %v6104_v40 = vpop.f32.mrb[100].mxu1 }
 0x43b   : > { %v6105_v60 = vpop.f32.mrb[101].mxu1 }
 0x43c   : > { %v6106_v24 = vadd.f32 %v6105_v60, %v6104_v40  ;;  %v6107_v41 = vpop.f32.mrb[102].mxu1 }
 0x43d   : > { %v6108_v13 = vpop.f32.mrb[103].mxu1 }
 0x43e   : > { %v9066_v3 = vadd.f32 %v6106_v24, %v8933_v30  ;;  %v6109_v53 = vadd.f32 %v6108_v13, %v6107_v41 }
 0x43f   : > { %5003 = vmatmul.mubr.bf16.gmra.mrb[208].mxu1 %v8640_v15 }
 0x440   : > { %v9072_v26 = vadd.f32 %v6109_v53, %v8935_v48  ;;  %5010 = vmatprep.mubr.bf16.mxu1 %v3874_v19  ;;  %v9512_v48 = vcombine.low %v8651_v7, %v8653_v39  ;;  %v5604_v7 = vcombine.low %v8810_v42, %v3275_v11  ;;  %v3889_v39 = vrot.slane %v3887_v23, 1  ;;  %v7153_v53 = vld [vmem:[#allocation2 + $0x70] sm:$0xff]  }
 0x442   : > { %v6110_v20 = vpop.f32.mrb[104].mxu1 }
 0x443   : > { %v6111_v9 = vpop.f32.mrb[105].mxu1 }
 0x444   : > { %v6112_v21 = vadd.f32 %v6111_v9, %v6110_v20  ;;  %v6113_v31 = vpop.f32.mrb[106].mxu1 }
 0x445   : > { %v6114_v30 = vpop.f32.mrb[107].mxu1 }
 0x446   : > { %v9078_v15 = vadd.f32 %v6112_v21, %v8942_v22  ;;  %v6115_v27 = vadd.f32 %v6114_v30, %v6113_v31  ;;  %v3885_v22 = vor.u32 %v3883_v50, %v3881_v55  ;;  %v9513_v31 = vld [vmem:[#allocation9_spill] sm:$0xff]  ;;  %v9514_v50 = vld [vmem:[#allocation10_spill] sm:$0xff] }
 0x447   : > { %5011 = vmatmul.mubr.bf16.gmra.mrb[212].mxu1 %v9512_v48 }
 0x448   : > { %v9085_v38 = vadd.f32 %v6115_v27, %v8944_v51  ;;  %5018 = vmatprep.mubr.bf16.mxu1 %v3882_v44  ;;  %v3890_v40 = vsel %vm412_vm6, %v3885_v22, %v3889_v39 }
 0x44a   : > { %v6116_v10 = vpop.f32.mrb[108].mxu1 }
 0x44b   : > { %v6117_v47 = vpop.f32.mrb[109].mxu1 }
 0x44c   : > { %v6118_v0 = vadd.f32 %v6117_v47, %v6116_v10  ;;  %v6119_v29 = vpop.f32.mrb[110].mxu1 }
 0x44d   : > { %v6120_v35 = vpop.f32.mrb[111].mxu1 }
 0x44e   : > { %v9091_v8 = vadd.f32 %v6118_v0, %v8951_v59  ;;  %v6121_v51 = vadd.f32 %v6120_v35, %v6119_v29  ;;  %v9516_v29 = vld [vmem:[#allocation12_spill] sm:$0xff]  ;;  %v9517_v35 = vld [vmem:[#allocation13_spill] sm:$0xff] }
 0x44f   : > { %5019 = vmatmul.mubr.bf16.gmra.mrb[216].mxu1 %v5604_v7 }
 0x450   : > { %v9095_v60 = vadd.f32 %v6121_v51, %v8953_v16  ;;  %5026 = vmatprep.mubr.bf16.mxu1 %v3890_v40 }
 0x452   : > { %v6122_v43 = vpop.f32.mrb[112].mxu1 }
 0x453   : > { %v6123_v24 = vpop.f32.mrb[113].mxu1 }
 0x454   : > { %v6124_v41 = vadd.f32 %v6123_v24, %v6122_v43  ;;  %v6125_v13 = vpop.f32.mrb[114].mxu1 }
 0x455   : > { %v6126_v54 = vpop.f32.mrb[115].mxu1 }
 0x456   : > { %v9098_v42 = vadd.f32 %v6124_v41, %v8959_v36  ;;  %v6127_v19 = vadd.f32 %v6126_v54, %v6125_v13  ;;  %v9518_v41 = vld [vmem:[#allocation14_spill] sm:$0xff]  ;;  %v9519_v13 = vld [vmem:[#allocation15_spill] sm:$0xff] }
 0x457   : > { %5027 = vmatmul.mubr.bf16.gmra.mrb[220].mxu1 %v7153_v53  ;;  %v3927_v53 = vrot.slane %v9063_v56, 1 }
 0x458   : > { %v9101_v59 = vadd.f32 %v6127_v19, %v8961_v6  ;;  %6664 = vmatprep.mubr.bf16.mxu1 %v8693_v25 }
 0x45a   : > { %v6128_v14 = vpop.f32.mrb[116].mxu1 }
 0x45b   : > { %v6129_v16 = vpop.f32.mrb[117].mxu1 }
 0x45c   : > { %v6130_v20 = vadd.f32 %v6129_v16, %v6128_v14  ;;  %v6131_v9 = vpop.f32.mrb[118].mxu1 }
 0x45d   : > { %v6132_v32 = vpop.f32.mrb[119].mxu1 }
 0x45e   : > { %v9105_v55 = vadd.f32 %v6130_v20, %v8967_v46  ;;  %v6133_v21 = vadd.f32 %v6132_v32, %v6131_v9  ;;  %v9520_v9 = vld [vmem:[#allocation16_spill] sm:$0xff]  ;;  %v9521_v32 = vrot.slane %v8683_v45, 1 }
 0x45f   : > { %6665 = vmatmul.mubr.bf16.vlgmr.msra.gmra.mrb[224].mxu1 %v8687_v62  ;;  %v9515_v62 = vld [vmem:[#allocation11_spill] sm:$0xff] }
 0x460   : > { %v9109_v36 = vadd.f32 %v6133_v21, %v8972_v12  ;;  %6668 = vmatprep.mubr.bf16.mxu1 %v9513_v31 }
 0x462   : > { %v6134_v6 = vpop.f32.mrb[120].mxu1 }
 0x463   : > { %v6135_v30 = vpop.f32.mrb[121].mxu1 }
 0x464   : > { %v6136_v37 = vadd.f32 %v6135_v30, %v6134_v6  ;;  %v6137_v25 = vpop.f32.mrb[122].mxu1 }
 0x465   : > { %v6138_v27 = vpop.f32.mrb[123].mxu1 }
 0x466   : > { %v9113_v48 = vadd.f32 %v6136_v37, %v8982_v52  ;;  %v6139_v44 = vadd.f32 %v6138_v27, %v6137_v25  ;;  %v3929_v37 = vrot.slane %v9075_v63, 1 }
 0x467   : > { %6669 = vmatmul.mubr.bf16.gmra.mrb[228].mxu1 %v9514_v50 }
 0x468   : > { %v9117_v46 = vadd.f32 %v6139_v44, %v8987_v5  ;;  %6672 = vmatprep.mubr.bf16.mxu1 %v9515_v62  ;;  %v3930_v44 = vsel %vm969_vm2, %v3927_v53, %v3929_v37 }
 0x46a   : > { %v6140_v12 = vpop.f32.mrb[124].mxu1 }
 0x46b   : > { %v6141_v23 = vpop.f32.mrb[125].mxu1 }
 0x46c   : > { %v6142_v10 = vadd.f32 %v6141_v23, %v6140_v12  ;;  %v6143_v11 = vpop.f32.mrb[126].mxu1 }
 0x46d   : > { %v6144_v47 = vpop.f32.mrb[127].mxu1 }
 0x46e   : > { %v9121_v22 = vadd.f32 %v6142_v10, %v8996_v17  ;;  %v6145_v0 = vadd.f32 %v6144_v47, %v6143_v11 }
 0x46f   : > { %6673 = vmatmul.mubr.bf16.gmra.mrb[232].mxu1 %v9516_v29 }
 0x470   : > { %v9125_v52 = vadd.f32 %v6145_v0, %v9001_v1  ;;  %6676 = vmatprep.mubr.bf16.mxu1 %v9517_v35 }
 0x472   : > { %v6162_v5 = vpop.f32.mrb[128].mxu1 }
 0x473   : > { %v6163_v7 = vpop.f32.mrb[129].mxu1 }
 0x474   : > { %v6164_v39 = vadd.f32 %v6163_v7, %v6162_v5  ;;  %v6165_v51 = vpop.f32.mrb[130].mxu1 }
 0x475   : > { %v6166_v40 = vpop.f32.mrb[131].mxu1 }
 0x476   : > { %v9129_v43 = vadd.f32 %v6164_v39, %v9014_v33  ;;  %v6167_v24 = vadd.f32 %v6166_v40, %v6165_v51 }
 0x477   : > { %6677 = vmatmul.mubr.bf16.gmra.mrb[236].mxu1 %v9518_v41 }
 0x478   : > { %v9133_v17 = vadd.f32 %v6167_v24, %v9019_v61  ;;  %6680 = vmatprep.mubr.bf16.mxu1 %v9519_v13  ;;  %v3928_v61 = vsel %vm969_vm2, %v9521_v32, %v3927_v53 }
 0x47a   : > { %v6168_v1 = vpop.f32.mrb[132].mxu1 }
 0x47b   : > { %v6169_v54 = vpop.f32.mrb[133].mxu1 }
 0x47c   : > { %v6170_v19 = vadd.f32 %v6169_v54, %v6168_v1  ;;  %v6171_v14 = vpop.f32.mrb[134].mxu1 }
 0x47d   : > { %v6172_v16 = vpop.f32.mrb[135].mxu1 }
 0x47e   : > { %v9138_v20 = vadd.f32 %v6170_v19, %v9024_v58  ;;  %v6173_v33 = vadd.f32 %v6172_v16, %v6171_v14 }
 0x47f   : > { %6681 = vmatmul.mubr.bf16.gmra.mrb[240].mxu1 %v9520_v9 }
 0x480   : > { %v9145_v21 = vadd.f32 %v6173_v33, %v9030_v49  ;;  %6684 = vmatprep.mubr.bf16.mxu1 %v3928_v61 }
 0x482   : > { %v6174_v31 = vpop.f32.mrb[136].mxu1 }
 0x483   : > { %v6175_v6 = vpop.f32.mrb[137].mxu1 }
 0x484   : > { %v6176_v56 = vadd.f32 %v6175_v6, %v6174_v31  ;;  %v6177_v30 = vpop.f32.mrb[138].mxu1 }
 0x485   : > { %v6178_v25 = vpop.f32.mrb[139].mxu1 }
 0x486   : > { %v9149_v58 = vadd.f32 %v6176_v56, %v9034_v34  ;;  %v6179_v27 = vadd.f32 %v6178_v25, %v6177_v30 }
 0x487   : > { %6685 = vmatmul.mubr.bf16.gmra.mrb[244].mxu1 %v3930_v44 }
 0x488   : > { %v9153_v45 = vadd.f32 %v6179_v27, %v9039_v18 }
 0x48a   : > { %v6180_v49 = vpop.f32.mrb[140].mxu1 }
 0x48b   : > { %v6181_v50 = vpop.f32.mrb[141].mxu1 }
 0x48c   : > { %v6182_v62 = vadd.f32 %v6181_v50, %v6180_v49  ;;  %v6183_v12 = vpop.f32.mrb[142].mxu1 }
 0x48d   : > { %v6184_v23 = vpop.f32.mrb[143].mxu1 }
 0x48e   : > { %v9156_v10 = vadd.f32 %v6182_v62, %v9044_v2  ;;  %v6185_v63 = vadd.f32 %v6184_v23, %v6183_v12 }
 0x490   : > { %v9159_v11 = vadd.f32 %v6185_v63, %v9050_v57 }
 0x492   : > { %v6186_v34 = vpop.f32.mrb[144].mxu1 }
 0x493   : > { %v6187_v47 = vpop.f32.mrb[145].mxu1 }
 0x494   : > { %v6188_v0 = vadd.f32 %v6187_v47, %v6186_v34  ;;  %v6189_v29 = vpop.f32.mrb[146].mxu1 }
 0x495   : > { %v6190_v35 = vpop.f32.mrb[147].mxu1 }
 0x496   : > { %v9162_v18 = vadd.f32 %v6188_v0, %v9054_v4  ;;  %v6191_v5 = vadd.f32 %v6190_v35, %v6189_v29 }
 0x498   : > { %v9165_v7 = vadd.f32 %v6191_v5, %v9059_v28 }
 0x49a   : > { %v6192_v39 = vpop.f32.mrb[148].mxu1 }
 0x49b   : > { %v6193_v51 = vpop.f32.mrb[149].mxu1 }
 0x49c   : > { %v6194_v2 = vadd.f32 %v6193_v51, %v6192_v39  ;;  %v6195_v40 = vpop.f32.mrb[150].mxu1 }
 0x49d   : > { %v6196_v24 = vpop.f32.mrb[151].mxu1 }
 0x49e   : > { %v9168_v57 = vadd.f32 %v6194_v2, %v9066_v3  ;;  %v6197_v41 = vadd.f32 %v6196_v24, %v6195_v40 }
 0x4a0   : > { %v9171_v13 = vadd.f32 %v6197_v41, %v9072_v26 }
 0x4a2   : > { %v6198_v1 = vpop.f32.mrb[152].mxu1 }
 0x4a3   : > { %v6199_v54 = vpop.f32.mrb[153].mxu1 }
 0x4a4   : > { %v6200_v4 = vadd.f32 %v6199_v54, %v6198_v1  ;;  %v6201_v53 = vpop.f32.mrb[154].mxu1 }
 0x4a5   : > { %v6202_v19 = vpop.f32.mrb[155].mxu1 }
 0x4a6   : > { %v9174_v28 = vadd.f32 %v6200_v4, %v9078_v15  ;;  %v6203_v14 = vadd.f32 %v6202_v19, %v6201_v53 }
 0x4a8   : > { %v9177_v16 = vadd.f32 %v6203_v14, %v9085_v38 }
 0x4aa   : > { %v6204_v33 = vpop.f32.mrb[156].mxu1 }
 0x4ab   : > { %v6205_v9 = vpop.f32.mrb[157].mxu1 }
 0x4ac   : > { %v6206_v3 = vadd.f32 %v6205_v9, %v6204_v33  ;;  %v6207_v32 = vpop.f32.mrb[158].mxu1 }
 0x4ad   : > { %v6208_v61 = vpop.f32.mrb[159].mxu1 }
 0x4ae   : > { %v9180_v26 = vadd.f32 %v6206_v3, %v9091_v8  ;;  %v6209_v31 = vadd.f32 %v6208_v61, %v6207_v32 }
 0x4b0   : > { %v9183_v6 = vadd.f32 %v6209_v31, %v9095_v60 }
 0x4b2   : > { %v6210_v56 = vpop.f32.mrb[160].mxu1 }
 0x4b3   : > { %v6211_v30 = vpop.f32.mrb[161].mxu1 }
 0x4b4   : > { %v6212_v15 = vadd.f32 %v6211_v30, %v6210_v56  ;;  %v6213_v37 = vpop.f32.mrb[162].mxu1 }
 0x4b5   : > { %v6214_v25 = vpop.f32.mrb[163].mxu1 }
 0x4b6   : > { %v9186_v38 = vadd.f32 %v6212_v15, %v9098_v42  ;;  %v6215_v27 = vadd.f32 %v6214_v25, %v6213_v37 }
 0x4b8   : > { %v9189_v44 = vadd.f32 %v6215_v27, %v9101_v59 }
 0x4ba   : > { %v6216_v49 = vpop.f32.mrb[164].mxu1 }
 0x4bb   : > { %v6217_v50 = vpop.f32.mrb[165].mxu1 }
 0x4bc   : > { %v6218_v8 = vadd.f32 %v6217_v50, %v6216_v49  ;;  %v6219_v62 = vpop.f32.mrb[166].mxu1 }
 0x4bd   : > { %v6220_v12 = vpop.f32.mrb[167].mxu1 }
 0x4be   : > { %v9192_v60 = vadd.f32 %v6218_v8, %v9105_v55  ;;  %v6221_v23 = vadd.f32 %v6220_v12, %v6219_v62 }
 0x4c0   : > { %v9195_v63 = vadd.f32 %v6221_v23, %v9109_v36 }
 0x4c2   : > { %v6222_v34 = vpop.f32.mrb[168].mxu1 }
 0x4c3   : > { %v6223_v47 = vpop.f32.mrb[169].mxu1 }
 0x4c4   : > { %v6224_v42 = vadd.f32 %v6223_v47, %v6222_v34  ;;  %v6225_v0 = vpop.f32.mrb[170].mxu1 }
 0x4c5   : > { %v6226_v29 = vpop.f32.mrb[171].mxu1 }
 0x4c6   : > { %v9198_v59 = vadd.f32 %v6224_v42, %v9113_v48  ;;  %v6227_v35 = vadd.f32 %v6226_v29, %v6225_v0 }
 0x4c8   : > { %v9201_v5 = vadd.f32 %v6227_v35, %v9117_v46 }
 0x4ca   : > { %v6228_v39 = vpop.f32.mrb[172].mxu1 }
 0x4cb   : > { %v6229_v51 = vpop.f32.mrb[173].mxu1 }
 0x4cc   : > { %v6230_v55 = vadd.f32 %v6229_v51, %v6228_v39  ;;  %v6231_v2 = vpop.f32.mrb[174].mxu1 }
 0x4cd   : > { %v6232_v40 = vpop.f32.mrb[175].mxu1 }
 0x4ce   : > { %v9204_v36 = vadd.f32 %v6230_v55, %v9121_v22  ;;  %v6233_v24 = vadd.f32 %v6232_v40, %v6231_v2 }
 0x4d0   : > { %v9207_v41 = vadd.f32 %v6233_v24, %v9125_v52 }
 0x4d2   : > { %v6250_v1 = vpop.f32.mrb[176].mxu1 }
 0x4d3   : > { %v6251_v54 = vpop.f32.mrb[177].mxu1 }
 0x4d4   : > { %v6252_v48 = vadd.f32 %v6251_v54, %v6250_v1  ;;  %v6253_v4 = vpop.f32.mrb[178].mxu1 }
 0x4d5   : > { %v6254_v53 = vpop.f32.mrb[179].mxu1 }
 0x4d6   : > { %v6255_v19 = vadd.f32 %v6254_v53, %v6253_v4  ;;  %v9210_v46 = vadd.f32 %v6252_v48, %v9129_v43 }
 0x4d8   : > { %v9213_v14 = vadd.f32 %v6255_v19, %v9133_v17 }
 0x4da   : > { %v6256_v33 = vpop.f32.mrb[180].mxu1 }
 0x4db   : > { %v6257_v9 = vpop.f32.mrb[181].mxu1 }
 0x4dc   : > { %v6258_v22 = vadd.f32 %v6257_v9, %v6256_v33  ;;  %v6259_v3 = vpop.f32.mrb[182].mxu1 }
 0x4dd   : > { %v6260_v32 = vpop.f32.mrb[183].mxu1 }
 0x4de   : > { %v6261_v61 = vadd.f32 %v6260_v32, %v6259_v3  ;;  %v9216_v52 = vadd.f32 %v6258_v22, %v9138_v20 }
 0x4e0   : > { %v9219_v31 = vadd.f32 %v6261_v61, %v9145_v21 }
 0x4e2   : > { %v6262_v56 = vpop.f32.mrb[184].mxu1 }
 0x4e3   : > { %v6263_v30 = vpop.f32.mrb[185].mxu1 }
 0x4e4   : > { %v6264_v15 = vadd.f32 %v6263_v30, %v6262_v56  ;;  %v6265_v43 = vpop.f32.mrb[186].mxu1 }
 0x4e5   : > { %v6266_v37 = vpop.f32.mrb[187].mxu1 }
 0x4e6   : > { %v6267_v25 = vadd.f32 %v6266_v37, %v6265_v43  ;;  %v9222_v17 = vadd.f32 %v6264_v15, %v9149_v58 }
 0x4e8   : > { %v9225_v27 = vadd.f32 %v6267_v25, %v9153_v45 }
 0x4ea   : > { %v6268_v49 = vpop.f32.mrb[188].mxu1 }
 0x4eb   : > { %v6269_v50 = vpop.f32.mrb[189].mxu1 }
 0x4ec   : > { %v6270_v8 = vadd.f32 %v6269_v50, %v6268_v49  ;;  %v6271_v20 = vpop.f32.mrb[190].mxu1 }
 0x4ed   : > { %v6272_v62 = vpop.f32.mrb[191].mxu1 }
 0x4ee   : > { %v6273_v12 = vadd.f32 %v6272_v62, %v6271_v20  ;;  %v9228_v21 = vadd.f32 %v6270_v8, %v9156_v10 }
 0x4f0   : > { %v9231_v23 = vadd.f32 %v6273_v12, %v9159_v11 }
 0x4f2   : > { %v6274_v34 = vpop.f32.mrb[192].mxu1 }
 0x4f3   : > { %v6275_v47 = vpop.f32.mrb[193].mxu1 }
 0x4f4   : > { %v6276_v42 = vadd.f32 %v6275_v47, %v6274_v34  ;;  %v6277_v58 = vpop.f32.mrb[194].mxu1 }
 0x4f5   : > { %v6278_v0 = vpop.f32.mrb[195].mxu1 }
 0x4f6   : > { %v6279_v29 = vadd.f32 %v6278_v0, %v6277_v58  ;;  %v9234_v45 = vadd.f32 %v6276_v42, %v9162_v18 }
 0x4f8   : > { %v9237_v35 = vadd.f32 %v6279_v29, %v9165_v7 }
 0x4fa   : > { %v6280_v39 = vpop.f32.mrb[196].mxu1 }
 0x4fb   : > { %v6281_v51 = vpop.f32.mrb[197].mxu1 }
 0x4fc   : > { %v6282_v55 = vadd.f32 %v6281_v51, %v6280_v39  ;;  %v6283_v10 = vpop.f32.mrb[198].mxu1 }
 0x4fd   : > { %v6284_v2 = vpop.f32.mrb[199].mxu1 }
 0x4fe   : > { %v6285_v40 = vadd.f32 %v6284_v2, %v6283_v10  ;;  %v9240_v11 = vadd.f32 %v6282_v55, %v9168_v57 }
 0x500   : > { %v9243_v24 = vadd.f32 %v6285_v40, %v9171_v13 }
 0x502   : > { %v6286_v1 = vpop.f32.mrb[200].mxu1 }
 0x503   : > { %v6287_v54 = vpop.f32.mrb[201].mxu1 }
 0x504   : > { %v6288_v48 = vadd.f32 %v6287_v54, %v6286_v1  ;;  %v6289_v18 = vpop.f32.mrb[202].mxu1 }
 0x505   : > { %v6290_v4 = vpop.f32.mrb[203].mxu1 }
 0x506   : > { %v6291_v53 = vadd.f32 %v6290_v4, %v6289_v18  ;;  %v9246_v7 = vadd.f32 %v6288_v48, %v9174_v28 }
 0x508   : > { %v9249_v19 = vadd.f32 %v6291_v53, %v9177_v16 }
 0x50a   : > { %v6292_v33 = vpop.f32.mrb[204].mxu1 }
 0x50b   : > { %v6293_v9 = vpop.f32.mrb[205].mxu1 }
 0x50c   : > { %v6294_v22 = vadd.f32 %v6293_v9, %v6292_v33  ;;  %v6295_v57 = vpop.f32.mrb[206].mxu1 }
 0x50d   : > { %v6296_v3 = vpop.f32.mrb[207].mxu1 }
 0x50e   : > { %v6297_v32 = vadd.f32 %v6296_v3, %v6295_v57  ;;  %v9252_v13 = vadd.f32 %v6294_v22, %v9180_v26 }
 0x510   : > { %v9255_v61 = vadd.f32 %v6297_v32, %v9183_v6 }
 0x512   : > { %v6298_v56 = vpop.f32.mrb[208].mxu1 }
 0x513   : > { %v6299_v30 = vpop.f32.mrb[209].mxu1 }
 0x514   : > { %v6300_v15 = vadd.f32 %v6299_v30, %v6298_v56  ;;  %v6301_v28 = vpop.f32.mrb[210].mxu1 }
 0x515   : > { %v6302_v43 = vpop.f32.mrb[211].mxu1 }
 0x516   : > { %v6303_v37 = vadd.f32 %v6302_v43, %v6301_v28  ;;  %v9258_v16 = vadd.f32 %v6300_v15, %v9186_v38 }
 0x518   : > { %v9261_v25 = vadd.f32 %v6303_v37, %v9189_v44 }
 0x51a   : > { %v6304_v49 = vpop.f32.mrb[212].mxu1 }
 0x51b   : > { %v6305_v50 = vpop.f32.mrb[213].mxu1 }
 0x51c   : > { %v6306_v8 = vadd.f32 %v6305_v50, %v6304_v49  ;;  %v6307_v26 = vpop.f32.mrb[214].mxu1 }
 0x51d   : > { %v6308_v20 = vpop.f32.mrb[215].mxu1 }
 0x51e   : > { %v6309_v62 = vadd.f32 %v6308_v20, %v6307_v26  ;;  %v9264_v6 = vadd.f32 %v6306_v8, %v9192_v60 }
 0x520   : > { %v9267_v12 = vadd.f32 %v6309_v62, %v9195_v63 }
 0x522   : > { %v6310_v34 = vpop.f32.mrb[216].mxu1 }
 0x523   : > { %v6311_v47 = vpop.f32.mrb[217].mxu1 }
 0x524   : > { %v6312_v38 = vadd.f32 %v6311_v47, %v6310_v34  ;;  %v6313_v42 = vpop.f32.mrb[218].mxu1 }
 0x525   : > { %v6314_v58 = vpop.f32.mrb[219].mxu1 }
 0x526   : > { %v6315_v44 = vadd.f32 %v6314_v58, %v6313_v42  ;;  %v9270_v0 = vadd.f32 %v6312_v38, %v9198_v59  ;;  %v9285_v59 = vld [vmem:[%s9461_s5] ss:$0 sm:$0xff] }
 0x528   : > { %v9273_v29 = vadd.f32 %v6315_v44, %v9201_v5 }
 0x52a   : > { %v6316_v39 = vpop.f32.mrb[220].mxu1 }
 0x52b   : > { %v6317_v60 = vpop.f32.mrb[221].mxu1 }
 0x52c   : > { %v6318_v51 = vadd.f32 %v6317_v60, %v6316_v39  ;;  %v6319_v55 = vpop.f32.mrb[222].mxu1 }
 0x52d   : > { %v6320_v63 = vpop.f32.mrb[223].mxu1 }
 0x52e   : > { %v6321_v10 = vadd.f32 %v6320_v63, %v6319_v55  ;;  %v9276_v2 = vadd.f32 %v6318_v51, %v9204_v36  ;;  %v9293_v36 = vld [vmem:[%s9462_s6] ss:$0 sm:$0xff] }
 0x530   : > { %v9279_v40 = vadd.f32 %v6321_v10, %v9207_v41 }
 0x532   : > { %v6666_v1 = vpop.f32.mrb[224].mxu1 }
 0x533   : > { %v5078_v5 = vadd.f32 %v6666_v1, %v9216_v52  ;;  %v5069_v54 = vpop.f32.mrb[225].mxu1 }
 0x534   : > { %v5070_v41 = vadd.f32 %v5069_v54, %v9210_v46  ;;  %v6667_v48 = vpop.f32.mrb[226].mxu1 }
 0x535   : > { %v5173_v18 = vmul.f32 %v9285_v59, %v5078_v5  ;;  %v5081_v4 = vadd.f32 %v6667_v48, %v9219_v31  ;;  %v5072_v53 = vpop.f32.mrb[227].mxu1 }
 0x536   : > { %v5171_v33 = vmul.f32 %v9285_v59, %v5070_v41  ;;  %v5073_v52 = vadd.f32 %v5072_v53, %v9213_v14 }
 0x537   : > { %v5204_v9 = vadd.f32 %v9293_v36, %v5173_v18  ;;  %v5174_v22 = vmul.f32 %v9285_v59, %v5081_v4 }
 0x538   : > { %v5202_v57 = vadd.f32 %v9293_v36, %v5171_v33  ;;  %v5172_v3 = vmul.f32 %v9285_v59, %v5073_v52 }
 0x539   : > { %v5228_v32 = vmax.f32 %v5204_v9, 0.0  ;;  %v5205_v46 = vadd.f32 %v9293_v36, %v5174_v22 }
 0x53a   : > { %v5226_v56 = vmax.f32 %v5202_v57, 0.0  ;;  %v5203_v30 = vadd.f32 %v9293_v36, %v5172_v3  ;;  %v6670_v31 = vpop.f32.mrb[228].mxu1 }
 0x53b   : > { %5252 = vst [vmem:[%s9306_s14 + $0x10] sm:$0xff] %v5228_v32  ;;  %v5229_v14 = vmax.f32 %v5205_v46, 0.0  ;;  %v5094_v15 = vadd.f32 %v6670_v31, %v9228_v21  ;;  %v5085_v28 = vpop.f32.mrb[229].mxu1 }
 0x53c   : > { %5250 = vst [vmem:[%s9306_s14] sm:$0xff] %v5226_v56  ;;  %v5227_v43 = vmax.f32 %v5203_v30, 0.0  ;;  %v5086_v37 = vadd.f32 %v5085_v28, %v9222_v17  ;;  %v6671_v49 = vpop.f32.mrb[230].mxu1 }
 0x53d   : > { %5253 = vst [vmem:[%s9306_s14 + $0x18] sm:$0xff] %v5229_v14  ;;  %v5177_v50 = vmul.f32 %v9285_v59, %v5094_v15  ;;  %v5097_v8 = vadd.f32 %v6671_v49, %v9231_v23  ;;  %v5088_v26 = vpop.f32.mrb[231].mxu1 }
 0x53e   : > { %5251 = vst [vmem:[%s9306_s14 + $0x8] sm:$0xff] %v5227_v43  ;;  %v5175_v20 = vmul.f32 %v9285_v59, %v5086_v37  ;;  %v5089_v62 = vadd.f32 %v5088_v26, %v9225_v27 }
 0x53f   : > { %v5208_v21 = vadd.f32 %v9293_v36, %v5177_v50  ;;  %v5178_v34 = vmul.f32 %v9285_v59, %v5097_v8 }
 0x540   : > { %v5206_v17 = vadd.f32 %v9293_v36, %v5175_v20  ;;  %v5176_v47 = vmul.f32 %v9285_v59, %v5089_v62 }
 0x541   : > { %v5232_v38 = vmax.f32 %v5208_v21, 0.0  ;;  %v5209_v42 = vadd.f32 %v9293_v36, %v5178_v34 }
 0x542   : > { %v5230_v23 = vmax.f32 %v5206_v17, 0.0  ;;  %v5207_v58 = vadd.f32 %v9293_v36, %v5176_v47  ;;  %v6674_v44 = vpop.f32.mrb[232].mxu1 }
 0x543   : > { %5256 = vst [vmem:[%s9306_s14 + $0x30] sm:$0xff] %v5232_v38  ;;  %v5233_v39 = vmax.f32 %v5209_v42, 0.0  ;;  %v5110_v27 = vadd.f32 %v6674_v44, %v9240_v11  ;;  %v5101_v60 = vpop.f32.mrb[233].mxu1 }
 0x544   : > { %5254 = vst [vmem:[%s9306_s14 + $0x20] sm:$0xff] %v5230_v23  ;;  %v5231_v51 = vmax.f32 %v5207_v58, 0.0  ;;  %v5102_v55 = vadd.f32 %v5101_v60, %v9234_v45  ;;  %v6675_v63 = vpop.f32.mrb[234].mxu1 }
 0x545   : > { %5257 = vst [vmem:[%s9306_s14 + $0x38] sm:$0xff] %v5233_v39  ;;  %v5181_v10 = vmul.f32 %v9285_v59, %v5110_v27  ;;  %v5113_v1 = vadd.f32 %v6675_v63, %v9243_v24  ;;  %v5104_v5 = vpop.f32.mrb[235].mxu1 }
 0x546   : > { %5255 = vst [vmem:[%s9306_s14 + $0x28] sm:$0xff] %v5231_v51  ;;  %v5179_v54 = vmul.f32 %v9285_v59, %v5102_v55  ;;  %v5105_v41 = vadd.f32 %v5104_v5, %v9237_v35 }
 0x547   : > { %v5212_v11 = vadd.f32 %v9293_v36, %v5181_v10  ;;  %v5182_v48 = vmul.f32 %v9285_v59, %v5113_v1 }
 0x548   : > { %v5210_v45 = vadd.f32 %v9293_v36, %v5179_v54  ;;  %v5180_v18 = vmul.f32 %v9285_v59, %v5105_v41 }
 0x549   : > { %v5236_v4 = vmax.f32 %v5212_v11, 0.0  ;;  %v5213_v53 = vadd.f32 %v9293_v36, %v5182_v48 }
 0x54a   : > { %v5234_v24 = vmax.f32 %v5210_v45, 0.0  ;;  %v5211_v33 = vadd.f32 %v9293_v36, %v5180_v18  ;;  %v6678_v52 = vpop.f32.mrb[236].mxu1 }
 0x54b   : > { %5260 = vst [vmem:[%s9306_s14 + $0x50] sm:$0xff] %v5236_v4  ;;  %v5237_v9 = vmax.f32 %v5213_v53, 0.0  ;;  %v5126_v35 = vadd.f32 %v6678_v52, %v9252_v13  ;;  %v5117_v22 = vpop.f32.mrb[237].mxu1 }
 0x54c   : > { %5258 = vst [vmem:[%s9306_s14 + $0x40] sm:$0xff] %v5234_v24  ;;  %v5235_v57 = vmax.f32 %v5211_v33, 0.0  ;;  %v5118_v3 = vadd.f32 %v5117_v22, %v9246_v7  ;;  %v6679_v32 = vpop.f32.mrb[238].mxu1 }
 0x54d   : > { %5261 = vst [vmem:[%s9306_s14 + $0x58] sm:$0xff] %v5237_v9  ;;  %v5185_v46 = vmul.f32 %v9285_v59, %v5126_v35  ;;  %v5129_v56 = vadd.f32 %v6679_v32, %v9255_v61  ;;  %v5120_v30 = vpop.f32.mrb[239].mxu1 }
 0x54e   : > { %5259 = vst [vmem:[%s9306_s14 + $0x48] sm:$0xff] %v5235_v57  ;;  %v5183_v31 = vmul.f32 %v9285_v59, %v5118_v3  ;;  %v5121_v14 = vadd.f32 %v5120_v30, %v9249_v19 }
 0x54f   : > { %v5216_v13 = vadd.f32 %v9293_v36, %v5185_v46  ;;  %v5186_v15 = vmul.f32 %v9285_v59, %v5129_v56 }
 0x550   : > { %v5214_v7 = vadd.f32 %v9293_v36, %v5183_v31  ;;  %v5184_v28 = vmul.f32 %v9285_v59, %v5121_v14 }
 0x551   : > { %v5240_v43 = vmax.f32 %v5216_v13, 0.0  ;;  %v5217_v37 = vadd.f32 %v9293_v36, %v5186_v15 }
 0x552   : > { %v5238_v61 = vmax.f32 %v5214_v7, 0.0  ;;  %v5215_v49 = vadd.f32 %v9293_v36, %v5184_v28  ;;  %v6682_v50 = vpop.f32.mrb[240].mxu1 }
 0x553   : > { %5264 = vst [vmem:[%s9306_s14 + $0x70] sm:$0xff] %v5240_v43  ;;  %v5241_v8 = vmax.f32 %v5217_v37, 0.0  ;;  %v5142_v19 = vadd.f32 %v6682_v50, %v9264_v6  ;;  %v5133_v26 = vpop.f32.mrb[241].mxu1 }
 0x554   : > { %5262 = vst [vmem:[%s9306_s14 + $0x60] sm:$0xff] %v5238_v61  ;;  %v5239_v20 = vmax.f32 %v5215_v49, 0.0  ;;  %v5134_v62 = vadd.f32 %v5133_v26, %v9258_v16  ;;  %v6683_v21 = vpop.f32.mrb[242].mxu1 }
 0x555   : > { %5265 = vst [vmem:[%s9306_s14 + $0x78] sm:$0xff] %v5241_v8  ;;  %v5189_v34 = vmul.f32 %v9285_v59, %v5142_v19  ;;  %v5145_v17 = vadd.f32 %v6683_v21, %v9267_v12  ;;  %v5136_v47 = vpop.f32.mrb[243].mxu1 }
 0x556   : > { %5263 = vst [vmem:[%s9306_s14 + $0x68] sm:$0xff] %v5239_v20  ;;  %v5187_v38 = vmul.f32 %v9285_v59, %v5134_v62  ;;  %v5137_v6 = vadd.f32 %v5136_v47, %v9261_v25 }
 0x557   : > { %v5220_v42 = vadd.f32 %v9293_v36, %v5189_v34  ;;  %v5190_v23 = vmul.f32 %v9285_v59, %v5145_v17 }
 0x558   : > { %v5218_v16 = vadd.f32 %v9293_v36, %v5187_v38  ;;  %v5188_v58 = vmul.f32 %v9285_v59, %v5137_v6 }
 0x559   : > { %v5244_v44 = vmax.f32 %v5220_v42, 0.0  ;;  %v5221_v12 = vadd.f32 %v9293_v36, %v5190_v23 }
 0x55a   : > { %v5242_v39 = vmax.f32 %v5218_v16, 0.0  ;;  %v5219_v27 = vadd.f32 %v9293_v36, %v5188_v58  ;;  %v6686_v60 = vpop.f32.mrb[244].mxu1 }
 0x55b   : > { %5268 = vst [vmem:[%s9306_s14 + $0x90] sm:$0xff] %v5244_v44  ;;  %v5245_v25 = vmax.f32 %v5221_v12, 0.0  ;;  %v5158_v51 = vadd.f32 %v6686_v60, %v9276_v2  ;;  %v5149_v55 = vpop.f32.mrb[245].mxu1 }
 0x55c   : > { %5266 = vst [vmem:[%s9306_s14 + $0x80] sm:$0xff] %v5242_v39  ;;  %v5243_v63 = vmax.f32 %v5219_v27, 0.0  ;;  %v5150_v10 = vadd.f32 %v5149_v55, %v9270_v0  ;;  %v6687_v1 = vpop.f32.mrb[246].mxu1 }
 0x55d   : > { %5269 = vst [vmem:[%s9306_s14 + $0x98] sm:$0xff] %v5245_v25  ;;  %v5193_v5 = vmul.f32 %v9285_v59, %v5158_v51  ;;  %v5161_v54 = vadd.f32 %v6687_v1, %v9279_v40  ;;  %v5152_v41 = vpop.f32.mrb[247].mxu1 }
 0x55e   : > { %5267 = vst [vmem:[%s9306_s14 + $0x88] sm:$0xff] %v5243_v63  ;;  %v5191_v11 = vmul.f32 %v9285_v59, %v5150_v10  ;;  %v5153_v2 = vadd.f32 %v5152_v41, %v9273_v29 }
 0x55f   : > { %v5224_v48 = vadd.f32 %v9293_v36, %v5193_v5  ;;  %v5194_v0 = vmul.f32 %v9285_v59, %v5161_v54 }
 0x560   : > { %v5222_v45 = vadd.f32 %v9293_v36, %v5191_v11  ;;  %v5192_v40 = vmul.f32 %v9285_v59, %v5153_v2 }
 0x561   : > { %v5248_v18 = vmax.f32 %v5224_v48, 0.0  ;;  %v5225_v4 = vadd.f32 %v9293_v36, %v5194_v0 }
 0x562   : > { %v5246_v53 = vmax.f32 %v5222_v45, 0.0  ;;  %v5223_v29 = vadd.f32 %v9293_v36, %v5192_v40 }
 0x563   : > { %5272 = vst [vmem:[%s9306_s14 + $0xb0] sm:$0xff] %v5248_v18  ;;  %v5249_v24 = vmax.f32 %v5225_v4, 0.0 }
 0x564   : > { %5270 = vst [vmem:[%s9306_s14 + $0xa0] sm:$0xff] %v5246_v53  ;;  %v5247_v33 = vmax.f32 %v5223_v29, 0.0 }
 0x565   : > { %5273 = vst [vmem:[%s9306_s14 + $0xb8] sm:$0xff] %v5249_v24 }
 0x566   : > { %5271 = vst [vmem:[%s9306_s14 + $0xa8] sm:$0xff] %v5247_v33 }
 0x567   : > { %7168 = shalt.err (!%p7165_p7)
}
 0x568   : > { %s7169_s20 = scalar_lea.hbm %s9398_s25, 3072  ;;  %s7173_s30 = scalar_lea.hbm %s9464_s8, 12288 }
 0x569   : > { %p7170_p9 = scmp.ne.s32.totalorder %s9398_s25, %s7169_s20  ;;  %p7174_p12 = scmp.lt.u32.totalorder %s9398_s25, %s9464_s8 }
 0x56a   : > { %p7175_p13 = scmp.lt.u32.totalorder %s7173_s30, %s7169_s20  ;;  %p7177_p1 = scmp.lt.u32.totalorder %s7169_s20, %s9398_s25 }
 0x56b   : > { %p7171_p10 = pnand %p7170_p9, %p7351_p3 }
 0x56c   : > { %p7176_p0 = por %p7175_p13, %p7174_p12 }
 0x56d   : > { %p7172_p11 = pneg %p7171_p10 }
 0x56e   : > { %p7178_p2 = por %p7177_p1, %p7176_p0 }
 0x570   : > { %p7179_p4 = pnand %p7178_p2, %p7172_p11 }
 0x572   : > { %7182 = shalt.err (!%p7179_p4)
}
 0x573   : > { %s7253_s24 = smov 128   ;;  %s7254_s15 = smov 8  }
 0x574   : > { %6958 = dma.vmem_to_hbm [thread:$0]  (%p7351_p3), %s9392_s9, 3072, %s9398_s25, %s9404_s11, %s7253_s24, %s7253_s24, %s7254_s15  }
 0x575 PF: > { %p6964_p5 = scmp.ge.s32.totalorder %s7249_s12, 2  ;;  %s5305_s16 = sand.u32 1, %s7221_s27  }
 0x576   : > { %s5306_s13 = scalar_lea.sflag [#allocation4], %s5305_s16 }
 0x577   : > { %p6961_p6 = pnand %p6964_p5, %p7360_p8 }
 0x579   : > { %7216 = dma.done.wait (!%p6961_p6), %s5306_s13, 3072  }
 0x57a   : > { %7218 = vsyncadd (!%p6961_p6), %s5306_s13, 4294964224  ;;  %s21_s12 = sadd.s32 1, %s7249_s12   ;;  %s9522_s9 = sld [smem:[#allocation6_spill]] }
 0x57b   : > { %p18_p7 = scmp.ge.s32.totalorder %s21_s12, 6   ;;  %s9523_s18 = sld [smem:[#allocation7_spill]] }
 0x57c   : > { %s9524_s11 = sld [smem:[#allocation8_spill]]  ;;  %s9525_s27 = smov %s7225_s28 }
 0x57d   : > { %s9526_s28 = smov %s7229_s29  ;;  %s9527_s29 = smov %s7369_s23 }
 0x57e   : > { %s9528_s30 = smov %s7241_s10  ;;  %20 = sbr.rel (!%p18_p7) target bundleno = 5 (0x5), region = 90 }
 0x581   : > { %s9529_s10 = smov %s9523_s18 }
 0x585   :  { %5311 = vsyncpa [#allocation4], 1 }
 0x586   :  { %5313 = vsyncpa [#allocation4 + $0x1], 1 }

</bundles_post_ra>
